<compile_context>
chip_gen: v7x
topology: tpu7x:2x2x1
jax: 0.10.0
libtpu: 0.0.40
codegen_flags: <defaults>
</compile_context>

<pallas_src>
import functools
import math

import jax
import jax.numpy as jnp
from jax.experimental import pallas as pl
from jax.experimental.pallas import tpu as pltpu

# bf16 MXU operands + fp32 accumulation; set to jnp.float32 for exact parity.
MXU_DTYPE = jnp.bfloat16
EPS = 1e-6
FFN_TILE_ROWS = 1024     # v5e/v6e sweet spot (128 MiB VMEM); use <=512 on v7x


def _round_up(x, m):
    return ((x + m - 1) // m) * m


# ---------------------------------------------------------------------------
# shared in-kernel math
# ---------------------------------------------------------------------------
def _norm_f32(x, alpha, bias, eps, d):
    # torch Norm: alpha * (x - mean) / (std + eps) + bias, std unbiased (n-1).
    mean = jnp.mean(x, axis=-1, keepdims=True)
    diff = x - mean
    var = jnp.sum(diff * diff, axis=-1, keepdims=True) / (d - 1)
    return alpha * diff / (jnp.sqrt(var) + eps) + bias


def _const_spec(shape):
    # whole-array block, same block index for every grid step (kept resident)
    return pl.BlockSpec(shape, lambda *_: (0,) * len(shape))


# ---------------------------------------------------------------------------
# fused kernels
# ---------------------------------------------------------------------------
def self_attention_kernel(x_ref, kv_ref, mask_ref, na_ref, nb_ref,
                          wq_ref, bq_ref, wk_ref, bk_ref, wv_ref, bv_ref,
                          wo_ref, bo_ref, o_ref,
                          *, heads, self_residual, mxu_dtype):
    """norm -> MHA (single KV chunk, plain masked softmax) -> residual."""
    d_model = x_ref.shape[-1]
    dk = d_model // heads
    scale = 1.0 / math.sqrt(dk)

    # ---- norm prologue (fp32) ----
    x2 = _norm_f32(x_ref[...].astype(jnp.float32), na_ref[...], nb_ref[...],
                   EPS, d_model)

    # ---- fused, lane-dense projections: one (rows, D) @ (D, D) each ----
    x2_mm = x2.astype(mxu_dtype)
    kv = kv_ref[...].astype(mxu_dtype)
    q = jnp.dot(x2_mm, wq_ref[...], preferred_element_type=jnp.float32) + bq_ref[...]
    k = jnp.dot(kv, wk_ref[...], preferred_element_type=jnp.float32) + bk_ref[...]
    v = jnp.dot(kv, wv_ref[...], preferred_element_type=jnp.float32) + bv_ref[...]
    q_mm = q.astype(mxu_dtype)
    k_mm = k.astype(mxu_dtype)
    v_mm = v.astype(mxu_dtype)

    # additive mask bias, computed once (not per head): 0 keep / -1e9 masked
    neg = jnp.where(mask_ref[...] < 0.5, -1e9, 0.0).astype(jnp.float32)

    outs = []
    for h in range(heads):                       # static unroll (small H)
        sl = slice(h * dk, (h + 1) * dk)
        s = jax.lax.dot_general(q_mm[:, sl], k_mm[:, sl],
                                (((1,), (1,)), ((), ())),
                                preferred_element_type=jnp.float32) * scale + neg
        m = jnp.max(s, axis=-1, keepdims=True)
        p = jnp.exp(s - m)
        inv_l = pl.reciprocal(jnp.sum(p, axis=-1, keepdims=True), approx=True)
        o_h = jnp.dot(p.astype(mxu_dtype), v_mm[:, sl],
                      preferred_element_type=jnp.float32) * inv_l
        outs.append(o_h)

    # single full-D output projection on the lane-concat of head outputs
    o_cat = jnp.concatenate(outs, axis=-1)
    attn = jnp.dot(o_cat.astype(mxu_dtype), wo_ref[...],
                   preferred_element_type=jnp.float32) + bo_ref[...]

    if self_residual:
        # spec: x = attn_1(x2, y, trg_mask); x = x + dropout_1(x)  (dropout=id)
        out = attn + attn
    else:
        out = x2 + attn
    o_ref[...] = out.astype(o_ref.dtype)


def cross_attention_kernel(x_ref, kv_ref, mask_ref, na_ref, nb_ref,
                           wq_ref, bq_ref, wk_ref, bk_ref, wv_ref, bv_ref,
                           wo_ref, bo_ref, o_ref,
                           x2_sc, q_sc, m_sc, l_sc, acc_sc,
                           *, heads, mxu_dtype):
    """norm -> multi-layer attention with the KV-chunk axis on the grid.

    Flash-style online softmax carried in VMEM scratch across chunk steps.
    """
    n = pl.program_id(1)
    d_model = x_ref.shape[-1]
    dk = d_model // heads
    scale = 1.0 / math.sqrt(dk)

    @pl.when(n == 0)
    def _():
        # norm + Q projection once per batch row (not per chunk)
        x2 = _norm_f32(x_ref[...].astype(jnp.float32), na_ref[...], nb_ref[...],
                       EPS, d_model)
        x2_sc[...] = x2
        q = jnp.dot(x2.astype(mxu_dtype), wq_ref[...],
                    preferred_element_type=jnp.float32) + bq_ref[...]
        q_sc[...] = q.astype(mxu_dtype)
        m_sc[...] = jnp.full_like(m_sc, -1e30)
        l_sc[...] = jnp.zeros_like(l_sc)
        acc_sc[...] = jnp.zeros_like(acc_sc)

    # ---- per-chunk fused K/V projections: one (Se, D) @ (D, D) each ----
    kv = kv_ref[...].astype(mxu_dtype)
    k = jnp.dot(kv, wk_ref[...], preferred_element_type=jnp.float32) + bk_ref[...]
    v = jnp.dot(kv, wv_ref[...], preferred_element_type=jnp.float32) + bv_ref[...]
    k_mm = k.astype(mxu_dtype)
    v_mm = v.astype(mxu_dtype)
    q = q_sc[...]

    # additive mask bias, computed once per chunk (shared across heads)
    neg = jnp.where(mask_ref[...] < 0.5, -1e9, 0.0).astype(jnp.float32)

    for h in range(heads):                       # static unroll (small H)
        sl = slice(h * dk, (h + 1) * dk)
        s = jax.lax.dot_general(q[:, sl], k_mm[:, sl],
                                (((1,), (1,)), ((), ())),
                                preferred_element_type=jnp.float32) * scale + neg
        m_prev = m_sc[h]
        m_new = jnp.maximum(m_prev, jnp.max(s, axis=-1, keepdims=True))
        alpha = jnp.exp(m_prev - m_new)
        p = jnp.exp(s - m_new)
        l_sc[h] = alpha * l_sc[h] + jnp.sum(p, axis=-1, keepdims=True)
        acc_sc[h] = alpha * acc_sc[h] + jnp.dot(p.astype(mxu_dtype), v_mm[:, sl],
                                                preferred_element_type=jnp.float32)
        m_sc[h] = m_new

    @pl.when(n == pl.num_programs(1) - 1)
    def _():
        outs = []
        for h in range(heads):
            inv_l = pl.reciprocal(l_sc[h], approx=True)
            outs.append(acc_sc[h] * inv_l)
        o_cat = jnp.concatenate(outs, axis=-1)
        attn = jnp.dot(o_cat.astype(mxu_dtype), wo_ref[...],
                       preferred_element_type=jnp.float32) + bo_ref[...]
        # spec: x = x2 + dropout_2(attn_2(x2, e_outputs, enc_dec_mask))
        o_ref[...] = (x2_sc[...] + attn).astype(o_ref.dtype)


def ffn_block_kernel(x_ref, na_ref, nb_ref, w1_ref, b1_ref, w2_ref, b2_ref,
                     o_ref, *, mxu_dtype):
    d_model = x_ref.shape[-1]
    x2 = _norm_f32(x_ref[...].astype(jnp.float32), na_ref[...], nb_ref[...],
                   EPS, d_model)
    # ConvFeedForward: Conv1d(d, d_ff, 1) -> ReLU -> Conv1d(d_ff, d, 1)
    # (kernel_size=1 conv == per-position matmul on the (rows, d) slab).
    h = jnp.dot(x2.astype(mxu_dtype), w1_ref[...],
                preferred_element_type=jnp.float32) + b1_ref[...]
    h = jnp.maximum(h, 0.0)
    ff = jnp.dot(h.astype(mxu_dtype), w2_ref[...],
                 preferred_element_type=jnp.float32) + b2_ref[...]
    # spec: x = x2 + dropout_3(ff(x2))  (dropout = identity)
    o_ref[...] = (x2 + ff).astype(o_ref.dtype)


# ---------------------------------------------------------------------------
# pallas_call wrappers
# ---------------------------------------------------------------------------
def self_attention_block(x, kv, mask, norm_a, norm_b, p, *, heads,
                         self_residual):
    """Fused norm -> MHA (single KV chunk) -> residual; grid over batch."""
    B, Sq, D = x.shape
    Sk = kv.shape[1]
    kernel = functools.partial(self_attention_kernel, heads=heads,
                               self_residual=self_residual, mxu_dtype=MXU_DTYPE)
    return pl.pallas_call(
        kernel,
        out_shape=jax.ShapeDtypeStruct((B, Sq, D), x.dtype),
        grid=(B,),
        in_specs=[
            pl.BlockSpec((None, Sq, D), lambda b: (b, 0, 0)),
            pl.BlockSpec((None, Sk, D), lambda b: (b, 0, 0)),
            pl.BlockSpec((None, Sq, Sk), lambda b: (b, 0, 0)),
            _const_spec((1, D)), _const_spec((1, D)),
            _const_spec((D, D)), _const_spec((1, D)),
            _const_spec((D, D)), _const_spec((1, D)),
            _const_spec((D, D)), _const_spec((1, D)),
            _const_spec((D, D)), _const_spec((1, D)),
        ],
        out_specs=pl.BlockSpec((None, Sq, D), lambda b: (b, 0, 0)),
        compiler_params=pltpu.CompilerParams(dimension_semantics=("parallel",)),
    )(x, kv, mask, norm_a, norm_b,
      p["wq"], p["bq"], p["wk"], p["bk"], p["wv"], p["bv"], p["wo"], p["bo"])


def cross_attention_block(x, kv, mask, norm_a, norm_b, p, *, heads):
    """Fused norm -> multi-layer attention -> residual.

    Grid = (batch, kv_chunk); chunk axis is an "arbitrary" reduction axis so
    only one (Se, D) KV tile is resident per step (flash accumulation in
    scratch), the whole (N, Se, D) slab is never in VMEM at once.
    """
    B, Sq, D = x.shape
    _, N, Se, _ = kv.shape
    dk = D // heads
    kernel = functools.partial(cross_attention_kernel, heads=heads,
                               mxu_dtype=MXU_DTYPE)
    return pl.pallas_call(
        kernel,
        out_shape=jax.ShapeDtypeStruct((B, Sq, D), x.dtype),
        grid=(B, N),
        in_specs=[
            pl.BlockSpec((None, Sq, D), lambda b, n: (b, 0, 0)),
            pl.BlockSpec((None, None, Se, D), lambda b, n: (b, n, 0, 0)),
            pl.BlockSpec((None, Sq, Se), lambda b, n: (b, 0, 0)),
            _const_spec((1, D)), _const_spec((1, D)),
            _const_spec((D, D)), _const_spec((1, D)),
            _const_spec((D, D)), _const_spec((1, D)),
            _const_spec((D, D)), _const_spec((1, D)),
            _const_spec((D, D)), _const_spec((1, D)),
        ],
        out_specs=pl.BlockSpec((None, Sq, D), lambda b, n: (b, 0, 0)),
        scratch_shapes=[
            pltpu.VMEM((Sq, D), jnp.float32),          # x2 (for residual)
            pltpu.VMEM((Sq, D), MXU_DTYPE),            # projected Q
            pltpu.VMEM((heads, Sq, 1), jnp.float32),   # running max
            pltpu.VMEM((heads, Sq, 1), jnp.float32),   # running denom
            pltpu.VMEM((heads, Sq, dk), jnp.float32),  # running PV accumulator
        ],
        compiler_params=pltpu.CompilerParams(
            dimension_semantics=("parallel", "arbitrary")),
    )(x, kv, mask, norm_a, norm_b,
      p["wq"], p["bq"], p["wk"], p["bk"], p["wv"], p["bv"], p["wo"], p["bo"])


def ffn_block(x, norm_a, norm_b, p):
    """Fused norm_3 -> ConvFeedForward -> residual; row-tiled over B*S."""
    B, S, D = x.shape
    d_ff = p["w1"].shape[1]
    M = B * S
    tm = min(FFN_TILE_ROWS, _round_up(M, 8))
    M_pad = _round_up(M, tm)                 # pad the tail instead of tm=M
    x2d = x.reshape(M, D)
    if M_pad != M:
        x2d = jnp.pad(x2d, ((0, M_pad - M), (0, 0)))
    kernel = functools.partial(ffn_block_kernel, mxu_dtype=MXU_DTYPE)
    out = pl.pallas_call(
        kernel,
        out_shape=jax.ShapeDtypeStruct((M_pad, D), x.dtype),
        grid=(M_pad // tm,),
        in_specs=[
            pl.BlockSpec((tm, D), lambda i: (i, 0)),
            _const_spec((1, D)), _const_spec((1, D)),
            _const_spec((D, d_ff)), _const_spec((1, d_ff)),
            _const_spec((d_ff, D)), _const_spec((1, D)),
        ],
        out_specs=pl.BlockSpec((tm, D), lambda i: (i, 0)),
        compiler_params=pltpu.CompilerParams(dimension_semantics=("parallel",)),
    )(x2d, norm_a, norm_b, p["w1"], p["b1"], p["w2"], p["b2"])
    if M_pad != M:
        out = out[:M]
    return out.reshape(B, S, D)


def simplex_decoder_layer_conv(x, y, e_outputs, enc_dec_mask, trg_mask, params,
                               *, heads):
    """Forward of SimplexDecoderLayerConv (dropout = identity / eval mode)."""
    B, Sq, D = x.shape
    _, N, Se, _ = e_outputs.shape

    # block 1: x2 = norm_1(x); x = attn_1(x2, y, trg_mask); x = x + dropout_1(x)
    x = self_attention_block(x, y, trg_mask.reshape(B, Sq, Sq),
                             params["norm1_a"], params["norm1_b"],
                             params["attn1"], heads=heads, self_residual=True)

    # block 2: x2 = norm_2(x); x = x2 + dropout_2(attn_2(x2, e_outputs, mask))
    x = cross_attention_block(x, e_outputs, enc_dec_mask.reshape(B, Sq, Se),
                              params["norm2_a"], params["norm2_b"],
                              params["attn2"], heads=heads)

    # block 3: x2 = norm_3(x); x = x2 + dropout_3(ff(x2))
    x = ffn_block(x, params["norm3_a"], params["norm3_b"], params["ff"])
    return x, y


# ---------------------------------------------------------------------------
# parameters (raw torch-like weights + one-time host-side prep for the kernel)
# ---------------------------------------------------------------------------
def make_params(key, d_model, d_ff, heads):
    ks = list(jax.random.split(key, 10))

    def attn_params(k0, k1, k2, k3):
        return dict(
            wq=jax.random.normal(k0, (d_model, d_model), jnp.float32) * 0.05,
            bq=jnp.zeros((d_model,), jnp.float32),
            wk=jax.random.normal(k1, (d_model, d_model), jnp.float32) * 0.05,
            bk=jnp.zeros((d_model,), jnp.float32),
            wv=jax.random.normal(k2, (d_model, d_model), jnp.float32) * 0.05,
            bv=jnp.zeros((d_model,), jnp.float32),
            wo=jax.random.normal(k3, (d_model, d_model), jnp.float32) * 0.05,
            bo=jnp.zeros((d_model,), jnp.float32),
        )

    return dict(
        norm1_a=jnp.ones((d_model,), jnp.float32),
        norm1_b=jnp.zeros((d_model,), jnp.float32),
        norm2_a=jnp.ones((d_model,), jnp.float32),
        norm2_b=jnp.zeros((d_model,), jnp.float32),
        norm3_a=jnp.ones((d_model,), jnp.float32),
        norm3_b=jnp.zeros((d_model,), jnp.float32),
        attn1=attn_params(ks[0], ks[1], ks[2], ks[3]),
        attn2=attn_params(ks[4], ks[5], ks[6], ks[7]),
        ff=dict(
            w1=jax.random.normal(ks[8], (d_model, d_ff), jnp.float32) * 0.05,
            b1=jnp.zeros((d_ff,), jnp.float32),
            w2=jax.random.normal(ks[9], (d_ff, d_model), jnp.float32) * 0.05,
            b2=jnp.zeros((d_model,), jnp.float32),
        ),
    )


def prepare_params(params):
    """One-time host-side prep: pre-cast weights to MXU_DTYPE (bf16), keep
    biases / norm params fp32 and reshaped to (1, D) rows for the kernels.
    No per-head weight splitting — projections are fused full-D matmuls."""
    def attn(p):
        return dict(
            wq=p["wq"].astype(MXU_DTYPE), bq=p["bq"].reshape(1, -1),
            wk=p["wk"].astype(MXU_DTYPE), bk=p["bk"].reshape(1, -1),
            wv=p["wv"].astype(MXU_DTYPE), bv=p["bv"].reshape(1, -1),
            wo=p["wo"].astype(MXU_DTYPE), bo=p["bo"].reshape(1, -1),
        )

    out = dict(params)
    out["attn1"] = attn(params["attn1"])
    out["attn2"] = attn(params["attn2"])
    out["ff"] = dict(
        w1=params["ff"]["w1"].astype(MXU_DTYPE), b1=params["ff"]["b1"].reshape(1, -1),
        w2=params["ff"]["w2"].astype(MXU_DTYPE), b2=params["ff"]["b2"].reshape(1, -1),
    )
    for k in ("norm1_a", "norm1_b", "norm2_a", "norm2_b", "norm3_a", "norm3_b"):
        out[k] = params[k].reshape(1, -1)
    return out


# ---------------------------------------------------------------------------
# plain-JAX fp32 reference (for cross-checking the fused kernels)
# ---------------------------------------------------------------------------
def _norm_ref(x, a, b, eps=EPS):
    mean = x.mean(-1, keepdims=True)
    diff = x - mean
    var = (diff * diff).sum(-1, keepdims=True) / (x.shape[-1] - 1)
    return a * diff / (jnp.sqrt(var) + eps) + b


def _mha_ref(x_q, x_kv, mask, p, heads):
    B, Sq, D = x_q.shape
    Sk = x_kv.shape[1]
    dk = D // heads
    q = (x_q @ p["wq"] + p["bq"]).reshape(B, Sq, heads, dk).transpose(0, 2, 1, 3)
    k = (x_kv @ p["wk"] + p["bk"]).reshape(B, Sk, heads, dk).transpose(0, 2, 1, 3)
    v = (x_kv @ p["wv"] + p["bv"]).reshape(B, Sk, heads, dk).transpose(0, 2, 1, 3)
    s = jnp.einsum("bhqd,bhkd->bhqk", q, k) / math.sqrt(dk)
    s = jnp.where(mask[:, None, :, :] == 0.0, -1e9, s)
    a = jax.nn.softmax(s, axis=-1)
    o = jnp.einsum("bhqk,bhkd->bhqd", a, v).transpose(0, 2, 1, 3).reshape(B, Sq, D)
    return o @ p["wo"] + p["bo"]


def reference_forward(x, y, e_outputs, enc_dec_mask, trg_mask, params, heads):
    B, Sq, D = x.shape
    _, N, Se, _ = e_outputs.shape
    x2 = _norm_ref(x, params["norm1_a"], params["norm1_b"])
    a1 = _mha_ref(x2, y, trg_mask.reshape(B, Sq, Sq), params["attn1"], heads)
    x = a1 + a1
    x2 = _norm_ref(x, params["norm2_a"], params["norm2_b"])
    e_flat = e_outputs.reshape(B, N * Se, D)
    ml_mask = jnp.tile(enc_dec_mask.reshape(B, Sq, Se), (1, 1, N))
    a2 = _mha_ref(x2, e_flat, ml_mask, params["attn2"], heads)
    x = x2 + a2
    x2 = _norm_ref(x, params["norm3_a"], params["norm3_b"])
    ff = jnp.maximum(x2 @ params["ff"]["w1"] + params["ff"]["b1"], 0.0)
    ff = ff @ params["ff"]["w2"] + params["ff"]["b2"]
    return x2 + ff, y


# ---------------------------------------------------------------------------
if __name__ == "__main__":
    d_model, d_ff, heads, N = 32, 64, 4, 2
    B, Sq, Se = 2, 8, 8

    root = jax.random.PRNGKey(0)
    k_par, kx, ky, ke = jax.random.split(root, 4)
    raw_params = make_params(k_par, d_model, d_ff, heads)
    params = prepare_params(raw_params)

    x = jax.random.normal(kx, (B, Sq, d_model), jnp.float32)
    y = jax.random.normal(ky, (B, Sq, d_model), jnp.float32)
    e_outputs = jax.random.normal(ke, (B, N, Se, d_model), jnp.float32)

    # causal target mask, enc-dec mask with last src position masked (1=keep)
    trg_mask = jnp.broadcast_to(
        jnp.tril(jnp.ones((Sq, Sq), jnp.float32))[None, None, :, :],
        (B, 1, Sq, Sq))
    enc_dec_mask = jnp.ones((B, 1, Sq, Se), jnp.float32).at[:, :, :, -1].set(0.0)

    fwd = jax.jit(simplex_decoder_layer_conv, static_argnames=("heads",))
    out_x, out_y = fwd(x, y, e_outputs, enc_dec_mask, trg_mask, params,
                       heads=heads)
    out_x = jax.block_until_ready(out_x)
    out_y = jax.block_until_ready(out_y)

    assert out_x.shape == (B, Sq, d_model) and out_y.shape == (B, Sq, d_model)
    assert bool(jnp.all(jnp.isfinite(out_x)))

    # cross-check fused kernels against the plain-JAX fp32 reference; tolerance
    # covers bf16 MXU operands + approx reciprocal (set MXU_DTYPE = jnp.float32
    # for tighter parity).
    ref_x, ref_y = reference_forward(x, y, e_outputs, enc_dec_mask, trg_mask,
                                     raw_params, heads)
    assert bool(jnp.allclose(out_x, ref_x, rtol=1e-1, atol=1e-1)), \
        "kernel/reference mismatch"
    assert bool(jnp.allclose(out_y, ref_y)), "y must pass through unchanged"

    print("KERNEL_OK")
</pallas_src>

<mosaic_0001>
module attributes {stable_mosaic.version = 11 : i64} {
  func.func @self_attention_kernel(%arg0: i32, %arg1: memref<1x8x32xf32, #tpu.memory_space<vmem>>, %arg2: memref<1x8x32xf32, #tpu.memory_space<vmem>>, %arg3: memref<1x8x8xf32, #tpu.memory_space<vmem>>, %arg4: memref<1x32xf32, #tpu.memory_space<vmem>>, %arg5: memref<1x32xf32, #tpu.memory_space<vmem>>, %arg6: memref<32x32xbf16, #tpu.memory_space<vmem>>, %arg7: memref<1x32xf32, #tpu.memory_space<vmem>>, %arg8: memref<32x32xbf16, #tpu.memory_space<vmem>>, %arg9: memref<1x32xf32, #tpu.memory_space<vmem>>, %arg10: memref<32x32xbf16, #tpu.memory_space<vmem>>, %arg11: memref<1x32xf32, #tpu.memory_space<vmem>>, %arg12: memref<32x32xbf16, #tpu.memory_space<vmem>>, %arg13: memref<1x32xf32, #tpu.memory_space<vmem>>, %arg14: memref<1x8x32xf32, #tpu.memory_space<vmem>>) attributes {dimension_semantics = [#tpu.dimension_semantics<parallel>], iteration_bounds = array<i64: 2>, scalar_prefetch = 0 : i64, scratch_operands = 0 : i64, tpu.core_type = #tpu.core_type<tc>, window_params = [{transform_indices = @transform_0, window_bounds = array<i64: 1, 8, 32>}, {transform_indices = @transform_1, window_bounds = array<i64: 1, 8, 32>}, {transform_indices = @transform_2, window_bounds = array<i64: 1, 8, 8>}, {pipeline_mode = #tpu.pipeline_mode<synchronous>, transform_indices = @transform_3, window_bounds = array<i64: 1, 32>}, {pipeline_mode = #tpu.pipeline_mode<synchronous>, transform_indices = @transform_4, window_bounds = array<i64: 1, 32>}, {pipeline_mode = #tpu.pipeline_mode<synchronous>, transform_indices = @transform_5, window_bounds = array<i64: 32, 32>}, {pipeline_mode = #tpu.pipeline_mode<synchronous>, transform_indices = @transform_6, window_bounds = array<i64: 1, 32>}, {pipeline_mode = #tpu.pipeline_mode<synchronous>, transform_indices = @transform_7, window_bounds = array<i64: 32, 32>}, {pipeline_mode = #tpu.pipeline_mode<synchronous>, transform_indices = @transform_8, window_bounds = array<i64: 1, 32>}, {pipeline_mode = #tpu.pipeline_mode<synchronous>, transform_indices = @transform_9, window_bounds = array<i64: 32, 32>}, {pipeline_mode = #tpu.pipeline_mode<synchronous>, transform_indices = @transform_10, window_bounds = array<i64: 1, 32>}, {pipeline_mode = #tpu.pipeline_mode<synchronous>, transform_indices = @transform_11, window_bounds = array<i64: 32, 32>}, {pipeline_mode = #tpu.pipeline_mode<synchronous>, transform_indices = @transform_12, window_bounds = array<i64: 1, 32>}, {transform_indices = @transform_13, window_bounds = array<i64: 1, 8, 32>}]} {
    %c0 = arith.constant 0 : index
    %c0_0 = arith.constant 0 : index
    %c0_1 = arith.constant 0 : index
    %0 = vector.load %arg1[%c0, %c0_0, %c0_1] : memref<1x8x32xf32, #tpu.memory_space<vmem>>, vector<1x8x32xf32>
    %1 = vector.shape_cast %0 : vector<1x8x32xf32> to vector<8x32xf32>
    %c0_2 = arith.constant 0 : index
    %c0_3 = arith.constant 0 : index
    %2 = vector.load %arg4[%c0_2, %c0_3] : memref<1x32xf32, #tpu.memory_space<vmem>>, vector<1x32xf32>
    %c0_4 = arith.constant 0 : index
    %c0_5 = arith.constant 0 : index
    %3 = vector.load %arg5[%c0_4, %c0_5] : memref<1x32xf32, #tpu.memory_space<vmem>>, vector<1x32xf32>
    %cst = arith.constant dense<0.000000e+00> : vector<8xf32>
    %4 = vector.multi_reduction <add>, %1, %cst [1] : vector<8x32xf32> to vector<8xf32>
    %5 = vector.shape_cast %4 : vector<8xf32> to vector<8x1xf32>
    %cst_6 = arith.constant 3.200000e+01 : f32
    %6 = vector.broadcast %cst_6 : f32 to vector<8x1xf32>
    %7 = arith.divf %5, %6 : vector<8x1xf32>
    %8 = vector.broadcast %7 : vector<8x1xf32> to vector<8x32xf32>
    %9 = arith.subf %1, %8 : vector<8x32xf32>
    %10 = arith.mulf %9, %9 : vector<8x32xf32>
    %cst_7 = arith.constant dense<0.000000e+00> : vector<8xf32>
    %11 = vector.multi_reduction <add>, %10, %cst_7 [1] : vector<8x32xf32> to vector<8xf32>
    %12 = vector.shape_cast %11 : vector<8xf32> to vector<8x1xf32>
    %cst_8 = arith.constant 3.100000e+01 : f32
    %13 = vector.broadcast %cst_8 : f32 to vector<8x1xf32>
    %14 = arith.divf %12, %13 : vector<8x1xf32>
    %15 = vector.broadcast %2 : vector<1x32xf32> to vector<8x32xf32>
    %16 = arith.mulf %15, %9 : vector<8x32xf32>
    %17 = math.sqrt %14 : vector<8x1xf32>
    %cst_9 = arith.constant 9.99999997E-7 : f32
    %18 = vector.broadcast %cst_9 : f32 to vector<8x1xf32>
    %19 = arith.addf %17, %18 : vector<8x1xf32>
    %20 = vector.broadcast %19 : vector<8x1xf32> to vector<8x32xf32>
    %21 = arith.divf %16, %20 : vector<8x32xf32>
    %22 = vector.broadcast %3 : vector<1x32xf32> to vector<8x32xf32>
    %23 = arith.addf %21, %22 : vector<8x32xf32>
    %24 = arith.truncf %23 : vector<8x32xf32> to vector<8x32xbf16>
    %c0_10 = arith.constant 0 : index
    %c0_11 = arith.constant 0 : index
    %c0_12 = arith.constant 0 : index
    %25 = vector.load %arg2[%c0_10, %c0_11, %c0_12] : memref<1x8x32xf32, #tpu.memory_space<vmem>>, vector<1x8x32xf32>
    %26 = vector.shape_cast %25 : vector<1x8x32xf32> to vector<8x32xf32>
    %27 = arith.truncf %26 : vector<8x32xf32> to vector<8x32xbf16>
    %c0_13 = arith.constant 0 : index
    %c0_14 = arith.constant 0 : index
    %28 = vector.load %arg6[%c0_13, %c0_14] : memref<32x32xbf16, #tpu.memory_space<vmem>>, vector<32x32xbf16>
    %cst_15 = arith.constant dense<0.000000e+00> : vector<8x32xf32>
    %29 = tpu.matmul %24, %28, %cst_15 {dimension_numbers = #tpu.dot_dimension_numbers<[1], [0], [0], [1], [0, 0, 1, 1], [], []>} : vector<8x32xbf16>, vector<32x32xbf16>, vector<8x32xf32> -> vector<8x32xf32>
    %c0_16 = arith.constant 0 : index
    %c0_17 = arith.constant 0 : index
    %30 = vector.load %arg7[%c0_16, %c0_17] : memref<1x32xf32, #tpu.memory_space<vmem>>, vector<1x32xf32>
    %31 = vector.broadcast %30 : vector<1x32xf32> to vector<8x32xf32>
    %32 = arith.addf %29, %31 : vector<8x32xf32>
    %c0_18 = arith.constant 0 : index
    %c0_19 = arith.constant 0 : index
    %33 = vector.load %arg8[%c0_18, %c0_19] : memref<32x32xbf16, #tpu.memory_space<vmem>>, vector<32x32xbf16>
    %cst_20 = arith.constant dense<0.000000e+00> : vector<8x32xf32>
    %34 = tpu.matmul %27, %33, %cst_20 {dimension_numbers = #tpu.dot_dimension_numbers<[1], [0], [0], [1], [0, 0, 1, 1], [], []>} : vector<8x32xbf16>, vector<32x32xbf16>, vector<8x32xf32> -> vector<8x32xf32>
    %c0_21 = arith.constant 0 : index
    %c0_22 = arith.constant 0 : index
    %35 = vector.load %arg9[%c0_21, %c0_22] : memref<1x32xf32, #tpu.memory_space<vmem>>, vector<1x32xf32>
    %36 = vector.broadcast %35 : vector<1x32xf32> to vector<8x32xf32>
    %37 = arith.addf %34, %36 : vector<8x32xf32>
    %c0_23 = arith.constant 0 : index
    %c0_24 = arith.constant 0 : index
    %38 = vector.load %arg10[%c0_23, %c0_24] : memref<32x32xbf16, #tpu.memory_space<vmem>>, vector<32x32xbf16>
    %cst_25 = arith.constant dense<0.000000e+00> : vector<8x32xf32>
    %39 = tpu.matmul %27, %38, %cst_25 {dimension_numbers = #tpu.dot_dimension_numbers<[1], [0], [0], [1], [0, 0, 1, 1], [], []>} : vector<8x32xbf16>, vector<32x32xbf16>, vector<8x32xf32> -> vector<8x32xf32>
    %c0_26 = arith.constant 0 : index
    %c0_27 = arith.constant 0 : index
    %40 = vector.load %arg11[%c0_26, %c0_27] : memref<1x32xf32, #tpu.memory_space<vmem>>, vector<1x32xf32>
    %41 = vector.broadcast %40 : vector<1x32xf32> to vector<8x32xf32>
    %42 = arith.addf %39, %41 : vector<8x32xf32>
    %43 = arith.truncf %32 : vector<8x32xf32> to vector<8x32xbf16>
    %44 = arith.truncf %37 : vector<8x32xf32> to vector<8x32xbf16>
    %45 = arith.truncf %42 : vector<8x32xf32> to vector<8x32xbf16>
    %c0_28 = arith.constant 0 : index
    %c0_29 = arith.constant 0 : index
    %c0_30 = arith.constant 0 : index
    %46 = vector.load %arg3[%c0_28, %c0_29, %c0_30] : memref<1x8x8xf32, #tpu.memory_space<vmem>>, vector<1x8x8xf32>
    %47 = vector.shape_cast %46 : vector<1x8x8xf32> to vector<8x8xf32>
    %cst_31 = arith.constant 5.000000e-01 : f32
    %48 = vector.broadcast %cst_31 : f32 to vector<8x8xf32>
    %49 = arith.cmpf olt, %47, %48 : vector<8x8xf32>
    %cst_32 = arith.constant -1.000000e+09 : f32
    %cst_33 = arith.constant 0.000000e+00 : f32
    %50 = vector.broadcast %cst_32 : f32 to vector<8x8xf32>
    %51 = vector.broadcast %cst_33 : f32 to vector<8x8xf32>
    %52 = arith.select %49, %50, %51 : vector<8x8xi1>, vector<8x8xf32>
    %53 = vector.extract_strided_slice %43 {offsets = [0, 0], sizes = [8, 8], strides = [1, 1]} : vector<8x32xbf16> to vector<8x8xbf16>
    %54 = vector.extract_strided_slice %44 {offsets = [0, 0], sizes = [8, 8], strides = [1, 1]} : vector<8x32xbf16> to vector<8x8xbf16>
    %cst_34 = arith.constant dense<0.000000e+00> : vector<8x8xf32>
    %55 = tpu.matmul %53, %54, %cst_34 {dimension_numbers = #tpu.dot_dimension_numbers<[1], [1], [0], [0], [0, 0, 1, 0], [], []>} : vector<8x8xbf16>, vector<8x8xbf16>, vector<8x8xf32> -> vector<8x8xf32>
    %cst_35 = arith.constant 0.353553385 : f32
    %56 = vector.broadcast %cst_35 : f32 to vector<8x8xf32>
    %57 = arith.mulf %55, %56 : vector<8x8xf32>
    %58 = arith.addf %57, %52 : vector<8x8xf32>
    %cst_36 = arith.constant dense<0xFF800000> : vector<8xf32>
    %59 = vector.multi_reduction <maximumf>, %58, %cst_36 [1] : vector<8x8xf32> to vector<8xf32>
    %60 = vector.shape_cast %59 : vector<8xf32> to vector<8x1xf32>
    %61 = vector.broadcast %60 : vector<8x1xf32> to vector<8x8xf32>
    %62 = arith.subf %58, %61 : vector<8x8xf32>
    %63 = math.exp %62 : vector<8x8xf32>
    %cst_37 = arith.constant dense<0.000000e+00> : vector<8xf32>
    %64 = vector.multi_reduction <add>, %63, %cst_37 [1] : vector<8x8xf32> to vector<8xf32>
    %65 = vector.shape_cast %64 : vector<8xf32> to vector<8x1xf32>
    %66 = tpu.reciprocal %65 {approx = true} : vector<8x1xf32> -> vector<8x1xf32>
    %67 = arith.truncf %63 : vector<8x8xf32> to vector<8x8xbf16>
    %68 = vector.extract_strided_slice %45 {offsets = [0, 0], sizes = [8, 8], strides = [1, 1]} : vector<8x32xbf16> to vector<8x8xbf16>
    %cst_38 = arith.constant dense<0.000000e+00> : vector<8x8xf32>
    %69 = tpu.matmul %67, %68, %cst_38 {dimension_numbers = #tpu.dot_dimension_numbers<[1], [0], [0], [1], [0, 0, 1, 1], [], []>} : vector<8x8xbf16>, vector<8x8xbf16>, vector<8x8xf32> -> vector<8x8xf32>
    %70 = vector.broadcast %66 : vector<8x1xf32> to vector<8x8xf32>
    %71 = arith.mulf %69, %70 : vector<8x8xf32>
    %72 = vector.extract_strided_slice %43 {offsets = [0, 8], sizes = [8, 8], strides = [1, 1]} : vector<8x32xbf16> to vector<8x8xbf16>
    %73 = vector.extract_strided_slice %44 {offsets = [0, 8], sizes = [8, 8], strides = [1, 1]} : vector<8x32xbf16> to vector<8x8xbf16>
    %cst_39 = arith.constant dense<0.000000e+00> : vector<8x8xf32>
    %74 = tpu.matmul %72, %73, %cst_39 {dimension_numbers = #tpu.dot_dimension_numbers<[1], [1], [0], [0], [0, 0, 1, 0], [], []>} : vector<8x8xbf16>, vector<8x8xbf16>, vector<8x8xf32> -> vector<8x8xf32>
    %cst_40 = arith.constant 0.353553385 : f32
    %75 = vector.broadcast %cst_40 : f32 to vector<8x8xf32>
    %76 = arith.mulf %74, %75 : vector<8x8xf32>
    %77 = arith.addf %76, %52 : vector<8x8xf32>
    %cst_41 = arith.constant dense<0xFF800000> : vector<8xf32>
    %78 = vector.multi_reduction <maximumf>, %77, %cst_41 [1] : vector<8x8xf32> to vector<8xf32>
    %79 = vector.shape_cast %78 : vector<8xf32> to vector<8x1xf32>
    %80 = vector.broadcast %79 : vector<8x1xf32> to vector<8x8xf32>
    %81 = arith.subf %77, %80 : vector<8x8xf32>
    %82 = math.exp %81 : vector<8x8xf32>
    %cst_42 = arith.constant dense<0.000000e+00> : vector<8xf32>
    %83 = vector.multi_reduction <add>, %82, %cst_42 [1] : vector<8x8xf32> to vector<8xf32>
    %84 = vector.shape_cast %83 : vector<8xf32> to vector<8x1xf32>
    %85 = tpu.reciprocal %84 {approx = true} : vector<8x1xf32> -> vector<8x1xf32>
    %86 = arith.truncf %82 : vector<8x8xf32> to vector<8x8xbf16>
    %87 = vector.extract_strided_slice %45 {offsets = [0, 8], sizes = [8, 8], strides = [1, 1]} : vector<8x32xbf16> to vector<8x8xbf16>
    %cst_43 = arith.constant dense<0.000000e+00> : vector<8x8xf32>
    %88 = tpu.matmul %86, %87, %cst_43 {dimension_numbers = #tpu.dot_dimension_numbers<[1], [0], [0], [1], [0, 0, 1, 1], [], []>} : vector<8x8xbf16>, vector<8x8xbf16>, vector<8x8xf32> -> vector<8x8xf32>
    %89 = vector.broadcast %85 : vector<8x1xf32> to vector<8x8xf32>
    %90 = arith.mulf %88, %89 : vector<8x8xf32>
    %91 = vector.extract_strided_slice %43 {offsets = [0, 16], sizes = [8, 8], strides = [1, 1]} : vector<8x32xbf16> to vector<8x8xbf16>
    %92 = vector.extract_strided_slice %44 {offsets = [0, 16], sizes = [8, 8], strides = [1, 1]} : vector<8x32xbf16> to vector<8x8xbf16>
    %cst_44 = arith.constant dense<0.000000e+00> : vector<8x8xf32>
    %93 = tpu.matmul %91, %92, %cst_44 {dimension_numbers = #tpu.dot_dimension_numbers<[1], [1], [0], [0], [0, 0, 1, 0], [], []>} : vector<8x8xbf16>, vector<8x8xbf16>, vector<8x8xf32> -> vector<8x8xf32>
    %cst_45 = arith.constant 0.353553385 : f32
    %94 = vector.broadcast %cst_45 : f32 to vector<8x8xf32>
    %95 = arith.mulf %93, %94 : vector<8x8xf32>
    %96 = arith.addf %95, %52 : vector<8x8xf32>
    %cst_46 = arith.constant dense<0xFF800000> : vector<8xf32>
    %97 = vector.multi_reduction <maximumf>, %96, %cst_46 [1] : vector<8x8xf32> to vector<8xf32>
    %98 = vector.shape_cast %97 : vector<8xf32> to vector<8x1xf32>
    %99 = vector.broadcast %98 : vector<8x1xf32> to vector<8x8xf32>
    %100 = arith.subf %96, %99 : vector<8x8xf32>
    %101 = math.exp %100 : vector<8x8xf32>
    %cst_47 = arith.constant dense<0.000000e+00> : vector<8xf32>
    %102 = vector.multi_reduction <add>, %101, %cst_47 [1] : vector<8x8xf32> to vector<8xf32>
    %103 = vector.shape_cast %102 : vector<8xf32> to vector<8x1xf32>
    %104 = tpu.reciprocal %103 {approx = true} : vector<8x1xf32> -> vector<8x1xf32>
    %105 = arith.truncf %101 : vector<8x8xf32> to vector<8x8xbf16>
    %106 = vector.extract_strided_slice %45 {offsets = [0, 16], sizes = [8, 8], strides = [1, 1]} : vector<8x32xbf16> to vector<8x8xbf16>
    %cst_48 = arith.constant dense<0.000000e+00> : vector<8x8xf32>
    %107 = tpu.matmul %105, %106, %cst_48 {dimension_numbers = #tpu.dot_dimension_numbers<[1], [0], [0], [1], [0, 0, 1, 1], [], []>} : vector<8x8xbf16>, vector<8x8xbf16>, vector<8x8xf32> -> vector<8x8xf32>
    %108 = vector.broadcast %104 : vector<8x1xf32> to vector<8x8xf32>
    %109 = arith.mulf %107, %108 : vector<8x8xf32>
    %110 = vector.extract_strided_slice %43 {offsets = [0, 24], sizes = [8, 8], strides = [1, 1]} : vector<8x32xbf16> to vector<8x8xbf16>
    %111 = vector.extract_strided_slice %44 {offsets = [0, 24], sizes = [8, 8], strides = [1, 1]} : vector<8x32xbf16> to vector<8x8xbf16>
    %cst_49 = arith.constant dense<0.000000e+00> : vector<8x8xf32>
    %112 = tpu.matmul %110, %111, %cst_49 {dimension_numbers = #tpu.dot_dimension_numbers<[1], [1], [0], [0], [0, 0, 1, 0], [], []>} : vector<8x8xbf16>, vector<8x8xbf16>, vector<8x8xf32> -> vector<8x8xf32>
    %cst_50 = arith.constant 0.353553385 : f32
    %113 = vector.broadcast %cst_50 : f32 to vector<8x8xf32>
    %114 = arith.mulf %112, %113 : vector<8x8xf32>
    %115 = arith.addf %114, %52 : vector<8x8xf32>
    %cst_51 = arith.constant dense<0xFF800000> : vector<8xf32>
    %116 = vector.multi_reduction <maximumf>, %115, %cst_51 [1] : vector<8x8xf32> to vector<8xf32>
    %117 = vector.shape_cast %116 : vector<8xf32> to vector<8x1xf32>
    %118 = vector.broadcast %117 : vector<8x1xf32> to vector<8x8xf32>
    %119 = arith.subf %115, %118 : vector<8x8xf32>
    %120 = math.exp %119 : vector<8x8xf32>
    %cst_52 = arith.constant dense<0.000000e+00> : vector<8xf32>
    %121 = vector.multi_reduction <add>, %120, %cst_52 [1] : vector<8x8xf32> to vector<8xf32>
    %122 = vector.shape_cast %121 : vector<8xf32> to vector<8x1xf32>
    %123 = tpu.reciprocal %122 {approx = true} : vector<8x1xf32> -> vector<8x1xf32>
    %124 = arith.truncf %120 : vector<8x8xf32> to vector<8x8xbf16>
    %125 = vector.extract_strided_slice %45 {offsets = [0, 24], sizes = [8, 8], strides = [1, 1]} : vector<8x32xbf16> to vector<8x8xbf16>
    %cst_53 = arith.constant dense<0.000000e+00> : vector<8x8xf32>
    %126 = tpu.matmul %124, %125, %cst_53 {dimension_numbers = #tpu.dot_dimension_numbers<[1], [0], [0], [1], [0, 0, 1, 1], [], []>} : vector<8x8xbf16>, vector<8x8xbf16>, vector<8x8xf32> -> vector<8x8xf32>
    %127 = vector.broadcast %123 : vector<8x1xf32> to vector<8x8xf32>
    %128 = arith.mulf %126, %127 : vector<8x8xf32>
    %129 = tpu.concatenate %71, %90, %109, %128 in 1 : vector<8x8xf32>, vector<8x8xf32>, vector<8x8xf32>, vector<8x8xf32> -> vector<8x32xf32>
    %130 = arith.truncf %129 : vector<8x32xf32> to vector<8x32xbf16>
    %c0_54 = arith.constant 0 : index
    %c0_55 = arith.constant 0 : index
    %131 = vector.load %arg12[%c0_54, %c0_55] : memref<32x32xbf16, #tpu.memory_space<vmem>>, vector<32x32xbf16>
    %cst_56 = arith.constant dense<0.000000e+00> : vector<8x32xf32>
    %132 = tpu.matmul %130, %131, %cst_56 {dimension_numbers = #tpu.dot_dimension_numbers<[1], [0], [0], [1], [0, 0, 1, 1], [], []>} : vector<8x32xbf16>, vector<32x32xbf16>, vector<8x32xf32> -> vector<8x32xf32>
    %c0_57 = arith.constant 0 : index
    %c0_58 = arith.constant 0 : index
    %133 = vector.load %arg13[%c0_57, %c0_58] : memref<1x32xf32, #tpu.memory_space<vmem>>, vector<1x32xf32>
    %134 = vector.broadcast %133 : vector<1x32xf32> to vector<8x32xf32>
    %135 = arith.addf %132, %134 : vector<8x32xf32>
    %136 = arith.addf %135, %135 : vector<8x32xf32>
    %c0_59 = arith.constant 0 : index
    %c0_60 = arith.constant 0 : index
    %c0_61 = arith.constant 0 : index
    %137 = vector.load %arg14[%c0_59, %c0_60, %c0_61] : memref<1x8x32xf32, #tpu.memory_space<vmem>>, vector<1x8x32xf32>
    %138 = vector.shape_cast %137 : vector<1x8x32xf32> to vector<8x32xf32>
    %139 = vector.shape_cast %136 : vector<8x32xf32> to vector<1x8x32xf32>
    tpu.vector_store %arg14[%c0_59, %c0_60, %c0_61], %139 {strides = array<i32>} : memref<1x8x32xf32, #tpu.memory_space<vmem>>, vector<1x8x32xf32>,
    return
  }
  func.func @transform_0(%arg0: i32) -> (i32, i32, i32) {
    %c0_i32 = arith.constant 0 : i32
    %c0_i32_0 = arith.constant 0 : i32
    %c0_i32_1 = arith.constant 0 : i32
    return %arg0, %c0_i32, %c0_i32_0 : i32, i32, i32
  }
  func.func @transform_1(%arg0: i32) -> (i32, i32, i32) {
    %c0_i32 = arith.constant 0 : i32
    %c0_i32_0 = arith.constant 0 : i32
    %c0_i32_1 = arith.constant 0 : i32
    return %arg0, %c0_i32, %c0_i32_0 : i32, i32, i32
  }
  func.func @transform_2(%arg0: i32) -> (i32, i32, i32) {
    %c0_i32 = arith.constant 0 : i32
    %c0_i32_0 = arith.constant 0 : i32
    %c0_i32_1 = arith.constant 0 : i32
    return %arg0, %c0_i32, %c0_i32_0 : i32, i32, i32
  }
  func.func @transform_3(%arg0: i32) -> (i32, i32) {
    %c0_i32 = arith.constant 0 : i32
    %c0_i32_0 = arith.constant 0 : i32
    %c0_i32_1 = arith.constant 0 : i32
    return %c0_i32, %c0_i32_0 : i32, i32
  }
  func.func @transform_4(%arg0: i32) -> (i32, i32) {
    %c0_i32 = arith.constant 0 : i32
    %c0_i32_0 = arith.constant 0 : i32
    %c0_i32_1 = arith.constant 0 : i32
    return %c0_i32, %c0_i32_0 : i32, i32
  }
  func.func @transform_5(%arg0: i32) -> (i32, i32) {
    %c0_i32 = arith.constant 0 : i32
    %c0_i32_0 = arith.constant 0 : i32
    %c0_i32_1 = arith.constant 0 : i32
    return %c0_i32, %c0_i32_0 : i32, i32
  }
  func.func @transform_6(%arg0: i32) -> (i32, i32) {
    %c0_i32 = arith.constant 0 : i32
    %c0_i32_0 = arith.constant 0 : i32
    %c0_i32_1 = arith.constant 0 : i32
    return %c0_i32, %c0_i32_0 : i32, i32
  }
  func.func @transform_7(%arg0: i32) -> (i32, i32) {
    %c0_i32 = arith.constant 0 : i32
    %c0_i32_0 = arith.constant 0 : i32
    %c0_i32_1 = arith.constant 0 : i32
    return %c0_i32, %c0_i32_0 : i32, i32
  }
  func.func @transform_8(%arg0: i32) -> (i32, i32) {
    %c0_i32 = arith.constant 0 : i32
    %c0_i32_0 = arith.constant 0 : i32
    %c0_i32_1 = arith.constant 0 : i32
    return %c0_i32, %c0_i32_0 : i32, i32
  }
  func.func @transform_9(%arg0: i32) -> (i32, i32) {
    %c0_i32 = arith.constant 0 : i32
    %c0_i32_0 = arith.constant 0 : i32
    %c0_i32_1 = arith.constant 0 : i32
    return %c0_i32, %c0_i32_0 : i32, i32
  }
  func.func @transform_10(%arg0: i32) -> (i32, i32) {
    %c0_i32 = arith.constant 0 : i32
    %c0_i32_0 = arith.constant 0 : i32
    %c0_i32_1 = arith.constant 0 : i32
    return %c0_i32, %c0_i32_0 : i32, i32
  }
  func.func @transform_11(%arg0: i32) -> (i32, i32) {
    %c0_i32 = arith.constant 0 : i32
    %c0_i32_0 = arith.constant 0 : i32
    %c0_i32_1 = arith.constant 0 : i32
    return %c0_i32, %c0_i32_0 : i32, i32
  }
  func.func @transform_12(%arg0: i32) -> (i32, i32) {
    %c0_i32 = arith.constant 0 : i32
    %c0_i32_0 = arith.constant 0 : i32
    %c0_i32_1 = arith.constant 0 : i32
    return %c0_i32, %c0_i32_0 : i32, i32
  }
  func.func @transform_13(%arg0: i32) -> (i32, i32, i32) {
    %c0_i32 = arith.constant 0 : i32
    %c0_i32_0 = arith.constant 0 : i32
    %c0_i32_1 = arith.constant 0 : i32
    return %arg0, %c0_i32, %c0_i32_0 : i32, i32, i32
  }
}

module attributes {stable_mosaic.version = 11 : i64} {
  func.func @ffn_block_kernel(%arg0: i32, %arg1: memref<16x32xf32, #tpu.memory_space<vmem>>, %arg2: memref<1x32xf32, #tpu.memory_space<vmem>>, %arg3: memref<1x32xf32, #tpu.memory_space<vmem>>, %arg4: memref<32x64xbf16, #tpu.memory_space<vmem>>, %arg5: memref<1x64xf32, #tpu.memory_space<vmem>>, %arg6: memref<64x32xbf16, #tpu.memory_space<vmem>>, %arg7: memref<1x32xf32, #tpu.memory_space<vmem>>, %arg8: memref<16x32xf32, #tpu.memory_space<vmem>>) attributes {dimension_semantics = [#tpu.dimension_semantics<parallel>], iteration_bounds = array<i64: 1>, scalar_prefetch = 0 : i64, scratch_operands = 0 : i64, tpu.core_type = #tpu.core_type<tc>, window_params = [{transform_indices = @transform_0, window_bounds = array<i64: 16, 32>}, {pipeline_mode = #tpu.pipeline_mode<synchronous>, transform_indices = @transform_1, window_bounds = array<i64: 1, 32>}, {pipeline_mode = #tpu.pipeline_mode<synchronous>, transform_indices = @transform_2, window_bounds = array<i64: 1, 32>}, {pipeline_mode = #tpu.pipeline_mode<synchronous>, transform_indices = @transform_3, window_bounds = array<i64: 32, 64>}, {pipeline_mode = #tpu.pipeline_mode<synchronous>, transform_indices = @transform_4, window_bounds = array<i64: 1, 64>}, {pipeline_mode = #tpu.pipeline_mode<synchronous>, transform_indices = @transform_5, window_bounds = array<i64: 64, 32>}, {pipeline_mode = #tpu.pipeline_mode<synchronous>, transform_indices = @transform_6, window_bounds = array<i64: 1, 32>}, {transform_indices = @transform_7, window_bounds = array<i64: 16, 32>}]} {
    %c0 = arith.constant 0 : index
    %c0_0 = arith.constant 0 : index
    %0 = vector.load %arg1[%c0, %c0_0] : memref<16x32xf32, #tpu.memory_space<vmem>>, vector<16x32xf32>
    %c0_1 = arith.constant 0 : index
    %c0_2 = arith.constant 0 : index
    %1 = vector.load %arg2[%c0_1, %c0_2] : memref<1x32xf32, #tpu.memory_space<vmem>>, vector<1x32xf32>
    %c0_3 = arith.constant 0 : index
    %c0_4 = arith.constant 0 : index
    %2 = vector.load %arg3[%c0_3, %c0_4] : memref<1x32xf32, #tpu.memory_space<vmem>>, vector<1x32xf32>
    %cst = arith.constant dense<0.000000e+00> : vector<16xf32>
    %3 = vector.multi_reduction <add>, %0, %cst [1] : vector<16x32xf32> to vector<16xf32>
    %4 = vector.shape_cast %3 : vector<16xf32> to vector<16x1xf32>
    %cst_5 = arith.constant 3.200000e+01 : f32
    %5 = vector.broadcast %cst_5 : f32 to vector<16x1xf32>
    %6 = arith.divf %4, %5 : vector<16x1xf32>
    %7 = vector.broadcast %6 : vector<16x1xf32> to vector<16x32xf32>
    %8 = arith.subf %0, %7 : vector<16x32xf32>
    %9 = arith.mulf %8, %8 : vector<16x32xf32>
    %cst_6 = arith.constant dense<0.000000e+00> : vector<16xf32>
    %10 = vector.multi_reduction <add>, %9, %cst_6 [1] : vector<16x32xf32> to vector<16xf32>
    %11 = vector.shape_cast %10 : vector<16xf32> to vector<16x1xf32>
    %cst_7 = arith.constant 3.100000e+01 : f32
    %12 = vector.broadcast %cst_7 : f32 to vector<16x1xf32>
    %13 = arith.divf %11, %12 : vector<16x1xf32>
    %14 = vector.broadcast %1 : vector<1x32xf32> to vector<16x32xf32>
    %15 = arith.mulf %14, %8 : vector<16x32xf32>
    %16 = math.sqrt %13 : vector<16x1xf32>
    %cst_8 = arith.constant 9.99999997E-7 : f32
    %17 = vector.broadcast %cst_8 : f32 to vector<16x1xf32>
    %18 = arith.addf %16, %17 : vector<16x1xf32>
    %19 = vector.broadcast %18 : vector<16x1xf32> to vector<16x32xf32>
    %20 = arith.divf %15, %19 : vector<16x32xf32>
    %21 = vector.broadcast %2 : vector<1x32xf32> to vector<16x32xf32>
    %22 = arith.addf %20, %21 : vector<16x32xf32>
    %23 = arith.truncf %22 : vector<16x32xf32> to vector<16x32xbf16>
    %c0_9 = arith.constant 0 : index
    %c0_10 = arith.constant 0 : index
    %24 = vector.load %arg4[%c0_9, %c0_10] : memref<32x64xbf16, #tpu.memory_space<vmem>>, vector<32x64xbf16>
    %cst_11 = arith.constant dense<0.000000e+00> : vector<16x64xf32>
    %25 = tpu.matmul %23, %24, %cst_11 {dimension_numbers = #tpu.dot_dimension_numbers<[1], [0], [0], [1], [0, 0, 1, 1], [], []>} : vector<16x32xbf16>, vector<32x64xbf16>, vector<16x64xf32> -> vector<16x64xf32>
    %c0_12 = arith.constant 0 : index
    %c0_13 = arith.constant 0 : index
    %26 = vector.load %arg5[%c0_12, %c0_13] : memref<1x64xf32, #tpu.memory_space<vmem>>, vector<1x64xf32>
    %27 = vector.broadcast %26 : vector<1x64xf32> to vector<16x64xf32>
    %28 = arith.addf %25, %27 : vector<16x64xf32>
    %cst_14 = arith.constant 0.000000e+00 : f32
    %29 = vector.broadcast %cst_14 : f32 to vector<16x64xf32>
    %30 = arith.maximumf %28, %29 : vector<16x64xf32>
    %31 = arith.truncf %30 : vector<16x64xf32> to vector<16x64xbf16>
    %c0_15 = arith.constant 0 : index
    %c0_16 = arith.constant 0 : index
    %32 = vector.load %arg6[%c0_15, %c0_16] : memref<64x32xbf16, #tpu.memory_space<vmem>>, vector<64x32xbf16>
    %cst_17 = arith.constant dense<0.000000e+00> : vector<16x32xf32>
    %33 = tpu.matmul %31, %32, %cst_17 {dimension_numbers = #tpu.dot_dimension_numbers<[1], [0], [0], [1], [0, 0, 1, 1], [], []>} : vector<16x64xbf16>, vector<64x32xbf16>, vector<16x32xf32> -> vector<16x32xf32>
    %c0_18 = arith.constant 0 : index
    %c0_19 = arith.constant 0 : index
    %34 = vector.load %arg7[%c0_18, %c0_19] : memref<1x32xf32, #tpu.memory_space<vmem>>, vector<1x32xf32>
    %35 = vector.broadcast %34 : vector<1x32xf32> to vector<16x32xf32>
    %36 = arith.addf %33, %35 : vector<16x32xf32>
    %37 = arith.addf %22, %36 : vector<16x32xf32>
    %c0_20 = arith.constant 0 : index
    %c0_21 = arith.constant 0 : index
    %38 = vector.load %arg8[%c0_20, %c0_21] : memref<16x32xf32, #tpu.memory_space<vmem>>, vector<16x32xf32>
    tpu.vector_store %arg8[%c0_20, %c0_21], %37 {strides = array<i32>} : memref<16x32xf32, #tpu.memory_space<vmem>>, vector<16x32xf32>,
    return
  }
  func.func @transform_0(%arg0: i32) -> (i32, i32) {
    %c0_i32 = arith.constant 0 : i32
    %c0_i32_0 = arith.constant 0 : i32
    return %arg0, %c0_i32 : i32, i32
  }
  func.func @transform_1(%arg0: i32) -> (i32, i32) {
    %c0_i32 = arith.constant 0 : i32
    %c0_i32_0 = arith.constant 0 : i32
    %c0_i32_1 = arith.constant 0 : i32
    return %c0_i32, %c0_i32_0 : i32, i32
  }
  func.func @transform_2(%arg0: i32) -> (i32, i32) {
    %c0_i32 = arith.constant 0 : i32
    %c0_i32_0 = arith.constant 0 : i32
    %c0_i32_1 = arith.constant 0 : i32
    return %c0_i32, %c0_i32_0 : i32, i32
  }
  func.func @transform_3(%arg0: i32) -> (i32, i32) {
    %c0_i32 = arith.constant 0 : i32
    %c0_i32_0 = arith.constant 0 : i32
    %c0_i32_1 = arith.constant 0 : i32
    return %c0_i32, %c0_i32_0 : i32, i32
  }
  func.func @transform_4(%arg0: i32) -> (i32, i32) {
    %c0_i32 = arith.constant 0 : i32
    %c0_i32_0 = arith.constant 0 : i32
    %c0_i32_1 = arith.constant 0 : i32
    return %c0_i32, %c0_i32_0 : i32, i32
  }
  func.func @transform_5(%arg0: i32) -> (i32, i32) {
    %c0_i32 = arith.constant 0 : i32
    %c0_i32_0 = arith.constant 0 : i32
    %c0_i32_1 = arith.constant 0 : i32
    return %c0_i32, %c0_i32_0 : i32, i32
  }
  func.func @transform_6(%arg0: i32) -> (i32, i32) {
    %c0_i32 = arith.constant 0 : i32
    %c0_i32_0 = arith.constant 0 : i32
    %c0_i32_1 = arith.constant 0 : i32
    return %c0_i32, %c0_i32_0 : i32, i32
  }
  func.func @transform_7(%arg0: i32) -> (i32, i32) {
    %c0_i32 = arith.constant 0 : i32
    %c0_i32_0 = arith.constant 0 : i32
    return %arg0, %c0_i32 : i32, i32
  }
}

module attributes {stable_mosaic.version = 11 : i64} {
  func.func @cross_attention_kernel(%arg0: i32, %arg1: i32, %arg2: memref<1x8x32xf32, #tpu.memory_space<vmem>>, %arg3: memref<1x1x8x32xf32, #tpu.memory_space<vmem>>, %arg4: memref<1x8x8xf32, #tpu.memory_space<vmem>>, %arg5: memref<1x32xf32, #tpu.memory_space<vmem>>, %arg6: memref<1x32xf32, #tpu.memory_space<vmem>>, %arg7: memref<32x32xbf16, #tpu.memory_space<vmem>>, %arg8: memref<1x32xf32, #tpu.memory_space<vmem>>, %arg9: memref<32x32xbf16, #tpu.memory_space<vmem>>, %arg10: memref<1x32xf32, #tpu.memory_space<vmem>>, %arg11: memref<32x32xbf16, #tpu.memory_space<vmem>>, %arg12: memref<1x32xf32, #tpu.memory_space<vmem>>, %arg13: memref<32x32xbf16, #tpu.memory_space<vmem>>, %arg14: memref<1x32xf32, #tpu.memory_space<vmem>>, %arg15: memref<1x8x32xf32, #tpu.memory_space<vmem>>, %arg16: memref<8x32xf32, #tpu.memory_space<vmem>>, %arg17: memref<8x32xbf16, #tpu.memory_space<vmem>>, %arg18: memref<4x8x1xf32, #tpu.memory_space<vmem>>, %arg19: memref<4x8x1xf32, #tpu.memory_space<vmem>>, %arg20: memref<4x8x8xf32, #tpu.memory_space<vmem>>) attributes {dimension_semantics = [#tpu.dimension_semantics<parallel>, #tpu.dimension_semantics<arbitrary>], iteration_bounds = array<i64: 2, 2>, scalar_prefetch = 0 : i64, scratch_operands = 5 : i64, tpu.core_type = #tpu.core_type<tc>, window_params = [{transform_indices = @transform_0, window_bounds = array<i64: 1, 8, 32>}, {transform_indices = @transform_1, window_bounds = array<i64: 1, 1, 8, 32>}, {transform_indices = @transform_2, window_bounds = array<i64: 1, 8, 8>}, {pipeline_mode = #tpu.pipeline_mode<synchronous>, transform_indices = @transform_3, window_bounds = array<i64: 1, 32>}, {pipeline_mode = #tpu.pipeline_mode<synchronous>, transform_indices = @transform_4, window_bounds = array<i64: 1, 32>}, {pipeline_mode = #tpu.pipeline_mode<synchronous>, transform_indices = @transform_5, window_bounds = array<i64: 32, 32>}, {pipeline_mode = #tpu.pipeline_mode<synchronous>, transform_indices = @transform_6, window_bounds = array<i64: 1, 32>}, {pipeline_mode = #tpu.pipeline_mode<synchronous>, transform_indices = @transform_7, window_bounds = array<i64: 32, 32>}, {pipeline_mode = #tpu.pipeline_mode<synchronous>, transform_indices = @transform_8, window_bounds = array<i64: 1, 32>}, {pipeline_mode = #tpu.pipeline_mode<synchronous>, transform_indices = @transform_9, window_bounds = array<i64: 32, 32>}, {pipeline_mode = #tpu.pipeline_mode<synchronous>, transform_indices = @transform_10, window_bounds = array<i64: 1, 32>}, {pipeline_mode = #tpu.pipeline_mode<synchronous>, transform_indices = @transform_11, window_bounds = array<i64: 32, 32>}, {pipeline_mode = #tpu.pipeline_mode<synchronous>, transform_indices = @transform_12, window_bounds = array<i64: 1, 32>}, {transform_indices = @transform_13, window_bounds = array<i64: 1, 8, 32>}]} {
    %c0_i32 = arith.constant 0 : i32
    %0 = arith.cmpi eq, %arg1, %c0_i32 : i32
    %1 = arith.extui %0 : i1 to i32
    %c0_i32_0 = arith.constant 0 : i32
    %2 = arith.cmpi ne, %1, %c0_i32_0 : i32
    scf.if %2 {
      %c0_111 = arith.constant 0 : index
      %c0_112 = arith.constant 0 : index
      %c0_113 = arith.constant 0 : index
      %185 = vector.load %arg2[%c0_111, %c0_112, %c0_113] : memref<1x8x32xf32, #tpu.memory_space<vmem>>, vector<1x8x32xf32>
      %186 = vector.shape_cast %185 : vector<1x8x32xf32> to vector<8x32xf32>
      %c0_114 = arith.constant 0 : index
      %c0_115 = arith.constant 0 : index
      %187 = vector.load %arg5[%c0_114, %c0_115] : memref<1x32xf32, #tpu.memory_space<vmem>>, vector<1x32xf32>
      %c0_116 = arith.constant 0 : index
      %c0_117 = arith.constant 0 : index
      %188 = vector.load %arg6[%c0_116, %c0_117] : memref<1x32xf32, #tpu.memory_space<vmem>>, vector<1x32xf32>
      %cst_118 = arith.constant dense<0.000000e+00> : vector<8xf32>
      %189 = vector.multi_reduction <add>, %186, %cst_118 [1] : vector<8x32xf32> to vector<8xf32>
      %190 = vector.shape_cast %189 : vector<8xf32> to vector<8x1xf32>
      %cst_119 = arith.constant 3.200000e+01 : f32
      %191 = vector.broadcast %cst_119 : f32 to vector<8x1xf32>
      %192 = arith.divf %190, %191 : vector<8x1xf32>
      %193 = vector.broadcast %192 : vector<8x1xf32> to vector<8x32xf32>
      %194 = arith.subf %186, %193 : vector<8x32xf32>
      %195 = arith.mulf %194, %194 : vector<8x32xf32>
      %cst_120 = arith.constant dense<0.000000e+00> : vector<8xf32>
      %196 = vector.multi_reduction <add>, %195, %cst_120 [1] : vector<8x32xf32> to vector<8xf32>
      %197 = vector.shape_cast %196 : vector<8xf32> to vector<8x1xf32>
      %cst_121 = arith.constant 3.100000e+01 : f32
      %198 = vector.broadcast %cst_121 : f32 to vector<8x1xf32>
      %199 = arith.divf %197, %198 : vector<8x1xf32>
      %200 = vector.broadcast %187 : vector<1x32xf32> to vector<8x32xf32>
      %201 = arith.mulf %200, %194 : vector<8x32xf32>
      %202 = math.sqrt %199 : vector<8x1xf32>
      %cst_122 = arith.constant 9.99999997E-7 : f32
      %203 = vector.broadcast %cst_122 : f32 to vector<8x1xf32>
      %204 = arith.addf %202, %203 : vector<8x1xf32>
      %205 = vector.broadcast %204 : vector<8x1xf32> to vector<8x32xf32>
      %206 = arith.divf %201, %205 : vector<8x32xf32>
      %207 = vector.broadcast %188 : vector<1x32xf32> to vector<8x32xf32>
      %208 = arith.addf %206, %207 : vector<8x32xf32>
      %c0_123 = arith.constant 0 : index
      %c0_124 = arith.constant 0 : index
      %209 = vector.load %arg16[%c0_123, %c0_124] : memref<8x32xf32, #tpu.memory_space<vmem>>, vector<8x32xf32>
      tpu.vector_store %arg16[%c0_123, %c0_124], %208 {strides = array<i32>} : memref<8x32xf32, #tpu.memory_space<vmem>>, vector<8x32xf32>,
      %210 = arith.truncf %208 : vector<8x32xf32> to vector<8x32xbf16>
      %c0_125 = arith.constant 0 : index
      %c0_126 = arith.constant 0 : index
      %211 = vector.load %arg7[%c0_125, %c0_126] : memref<32x32xbf16, #tpu.memory_space<vmem>>, vector<32x32xbf16>
      %cst_127 = arith.constant dense<0.000000e+00> : vector<8x32xf32>
      %212 = tpu.matmul %210, %211, %cst_127 {dimension_numbers = #tpu.dot_dimension_numbers<[1], [0], [0], [1], [0, 0, 1, 1], [], []>} : vector<8x32xbf16>, vector<32x32xbf16>, vector<8x32xf32> -> vector<8x32xf32>
      %c0_128 = arith.constant 0 : index
      %c0_129 = arith.constant 0 : index
      %213 = vector.load %arg8[%c0_128, %c0_129] : memref<1x32xf32, #tpu.memory_space<vmem>>, vector<1x32xf32>
      %214 = vector.broadcast %213 : vector<1x32xf32> to vector<8x32xf32>
      %215 = arith.addf %212, %214 : vector<8x32xf32>
      %216 = arith.truncf %215 : vector<8x32xf32> to vector<8x32xbf16>
      %c0_130 = arith.constant 0 : index
      %c0_131 = arith.constant 0 : index
      %217 = vector.load %arg17[%c0_130, %c0_131] : memref<8x32xbf16, #tpu.memory_space<vmem>>, vector<8x32xbf16>
      tpu.vector_store %arg17[%c0_130, %c0_131], %216 {strides = array<i32>} : memref<8x32xbf16, #tpu.memory_space<vmem>>, vector<8x32xbf16>,
      %cst_132 = arith.constant -1.000000e+30 : f32
      %218 = vector.broadcast %cst_132 : f32 to vector<4x8x1xf32>
      %c0_133 = arith.constant 0 : index
      %c0_134 = arith.constant 0 : index
      %c0_135 = arith.constant 0 : index
      %219 = vector.load %arg18[%c0_133, %c0_134, %c0_135] : memref<4x8x1xf32, #tpu.memory_space<vmem>>, vector<4x8x1xf32>
      tpu.vector_store %arg18[%c0_133, %c0_134, %c0_135], %218 {strides = array<i32>} : memref<4x8x1xf32, #tpu.memory_space<vmem>>, vector<4x8x1xf32>,
      %cst_136 = arith.constant 0.000000e+00 : f32
      %220 = vector.broadcast %cst_136 : f32 to vector<4x8x1xf32>
      %c0_137 = arith.constant 0 : index
      %c0_138 = arith.constant 0 : index
      %c0_139 = arith.constant 0 : index
      %221 = vector.load %arg19[%c0_137, %c0_138, %c0_139] : memref<4x8x1xf32, #tpu.memory_space<vmem>>, vector<4x8x1xf32>
      tpu.vector_store %arg19[%c0_137, %c0_138, %c0_139], %220 {strides = array<i32>} : memref<4x8x1xf32, #tpu.memory_space<vmem>>, vector<4x8x1xf32>,
      %cst_140 = arith.constant 0.000000e+00 : f32
      %222 = vector.broadcast %cst_140 : f32 to vector<4x8x8xf32>
      %c0_141 = arith.constant 0 : index
      %c0_142 = arith.constant 0 : index
      %c0_143 = arith.constant 0 : index
      %223 = vector.load %arg20[%c0_141, %c0_142, %c0_143] : memref<4x8x8xf32, #tpu.memory_space<vmem>>, vector<4x8x8xf32>
      tpu.vector_store %arg20[%c0_141, %c0_142, %c0_143], %222 {strides = array<i32>} : memref<4x8x8xf32, #tpu.memory_space<vmem>>, vector<4x8x8xf32>,
    } else {
    }
    %c0 = arith.constant 0 : index
    %c0_1 = arith.constant 0 : index
    %c0_2 = arith.constant 0 : index
    %c0_3 = arith.constant 0 : index
    %3 = vector.load %arg3[%c0, %c0_1, %c0_2, %c0_3] : memref<1x1x8x32xf32, #tpu.memory_space<vmem>>, vector<1x1x8x32xf32>
    %4 = vector.shape_cast %3 : vector<1x1x8x32xf32> to vector<8x32xf32>
    %5 = arith.truncf %4 : vector<8x32xf32> to vector<8x32xbf16>
    %c0_4 = arith.constant 0 : index
    %c0_5 = arith.constant 0 : index
    %6 = vector.load %arg9[%c0_4, %c0_5] : memref<32x32xbf16, #tpu.memory_space<vmem>>, vector<32x32xbf16>
    %cst = arith.constant dense<0.000000e+00> : vector<8x32xf32>
    %7 = tpu.matmul %5, %6, %cst {dimension_numbers = #tpu.dot_dimension_numbers<[1], [0], [0], [1], [0, 0, 1, 1], [], []>} : vector<8x32xbf16>, vector<32x32xbf16>, vector<8x32xf32> -> vector<8x32xf32>
    %c0_6 = arith.constant 0 : index
    %c0_7 = arith.constant 0 : index
    %8 = vector.load %arg10[%c0_6, %c0_7] : memref<1x32xf32, #tpu.memory_space<vmem>>, vector<1x32xf32>
    %9 = vector.broadcast %8 : vector<1x32xf32> to vector<8x32xf32>
    %10 = arith.addf %7, %9 : vector<8x32xf32>
    %c0_8 = arith.constant 0 : index
    %c0_9 = arith.constant 0 : index
    %11 = vector.load %arg11[%c0_8, %c0_9] : memref<32x32xbf16, #tpu.memory_space<vmem>>, vector<32x32xbf16>
    %cst_10 = arith.constant dense<0.000000e+00> : vector<8x32xf32>
    %12 = tpu.matmul %5, %11, %cst_10 {dimension_numbers = #tpu.dot_dimension_numbers<[1], [0], [0], [1], [0, 0, 1, 1], [], []>} : vector<8x32xbf16>, vector<32x32xbf16>, vector<8x32xf32> -> vector<8x32xf32>
    %c0_11 = arith.constant 0 : index
    %c0_12 = arith.constant 0 : index
    %13 = vector.load %arg12[%c0_11, %c0_12] : memref<1x32xf32, #tpu.memory_space<vmem>>, vector<1x32xf32>
    %14 = vector.broadcast %13 : vector<1x32xf32> to vector<8x32xf32>
    %15 = arith.addf %12, %14 : vector<8x32xf32>
    %16 = arith.truncf %10 : vector<8x32xf32> to vector<8x32xbf16>
    %17 = arith.truncf %15 : vector<8x32xf32> to vector<8x32xbf16>
    %c0_13 = arith.constant 0 : index
    %c0_14 = arith.constant 0 : index
    %18 = vector.load %arg17[%c0_13, %c0_14] : memref<8x32xbf16, #tpu.memory_space<vmem>>, vector<8x32xbf16>
    %c0_15 = arith.constant 0 : index
    %c0_16 = arith.constant 0 : index
    %c0_17 = arith.constant 0 : index
    %19 = vector.load %arg4[%c0_15, %c0_16, %c0_17] : memref<1x8x8xf32, #tpu.memory_space<vmem>>, vector<1x8x8xf32>
    %20 = vector.shape_cast %19 : vector<1x8x8xf32> to vector<8x8xf32>
    %cst_18 = arith.constant 5.000000e-01 : f32
    %21 = vector.broadcast %cst_18 : f32 to vector<8x8xf32>
    %22 = arith.cmpf olt, %20, %21 : vector<8x8xf32>
    %cst_19 = arith.constant -1.000000e+09 : f32
    %cst_20 = arith.constant 0.000000e+00 : f32
    %23 = vector.broadcast %cst_19 : f32 to vector<8x8xf32>
    %24 = vector.broadcast %cst_20 : f32 to vector<8x8xf32>
    %25 = arith.select %22, %23, %24 : vector<8x8xi1>, vector<8x8xf32>
    %26 = vector.extract_strided_slice %18 {offsets = [0, 0], sizes = [8, 8], strides = [1, 1]} : vector<8x32xbf16> to vector<8x8xbf16>
    %27 = vector.extract_strided_slice %16 {offsets = [0, 0], sizes = [8, 8], strides = [1, 1]} : vector<8x32xbf16> to vector<8x8xbf16>
    %cst_21 = arith.constant dense<0.000000e+00> : vector<8x8xf32>
    %28 = tpu.matmul %26, %27, %cst_21 {dimension_numbers = #tpu.dot_dimension_numbers<[1], [1], [0], [0], [0, 0, 1, 0], [], []>} : vector<8x8xbf16>, vector<8x8xbf16>, vector<8x8xf32> -> vector<8x8xf32>
    %cst_22 = arith.constant 0.353553385 : f32
    %29 = vector.broadcast %cst_22 : f32 to vector<8x8xf32>
    %30 = arith.mulf %28, %29 : vector<8x8xf32>
    %31 = arith.addf %30, %25 : vector<8x8xf32>
    %c0_23 = arith.constant 0 : index
    %c0_24 = arith.constant 0 : index
    %c0_25 = arith.constant 0 : index
    %32 = vector.load %arg18[%c0_23, %c0_24, %c0_25] : memref<4x8x1xf32, #tpu.memory_space<vmem>>, vector<1x8x1xf32>
    %33 = vector.shape_cast %32 : vector<1x8x1xf32> to vector<8x1xf32>
    %cst_26 = arith.constant dense<0xFF800000> : vector<8xf32>
    %34 = vector.multi_reduction <maximumf>, %31, %cst_26 [1] : vector<8x8xf32> to vector<8xf32>
    %35 = vector.shape_cast %34 : vector<8xf32> to vector<8x1xf32>
    %36 = arith.maximumf %33, %35 : vector<8x1xf32>
    %37 = arith.subf %33, %36 : vector<8x1xf32>
    %38 = math.exp %37 : vector<8x1xf32>
    %39 = vector.broadcast %36 : vector<8x1xf32> to vector<8x8xf32>
    %40 = arith.subf %31, %39 : vector<8x8xf32>
    %41 = math.exp %40 : vector<8x8xf32>
    %c0_27 = arith.constant 0 : index
    %c0_28 = arith.constant 0 : index
    %c0_29 = arith.constant 0 : index
    %42 = vector.load %arg19[%c0_27, %c0_28, %c0_29] : memref<4x8x1xf32, #tpu.memory_space<vmem>>, vector<1x8x1xf32>
    %43 = vector.shape_cast %42 : vector<1x8x1xf32> to vector<8x1xf32>
    %44 = arith.mulf %38, %43 : vector<8x1xf32>
    %cst_30 = arith.constant dense<0.000000e+00> : vector<8xf32>
    %45 = vector.multi_reduction <add>, %41, %cst_30 [1] : vector<8x8xf32> to vector<8xf32>
    %46 = vector.shape_cast %45 : vector<8xf32> to vector<8x1xf32>
    %47 = arith.addf %44, %46 : vector<8x1xf32>
    %c0_31 = arith.constant 0 : index
    %c0_32 = arith.constant 0 : index
    %c0_33 = arith.constant 0 : index
    %48 = vector.load %arg19[%c0_31, %c0_32, %c0_33] : memref<4x8x1xf32, #tpu.memory_space<vmem>>, vector<1x8x1xf32>
    %49 = vector.shape_cast %48 : vector<1x8x1xf32> to vector<8x1xf32>
    %50 = vector.shape_cast %47 : vector<8x1xf32> to vector<1x8x1xf32>
    tpu.vector_store %arg19[%c0_31, %c0_32, %c0_33], %50 {strides = array<i32>} : memref<4x8x1xf32, #tpu.memory_space<vmem>>, vector<1x8x1xf32>,
    %c0_34 = arith.constant 0 : index
    %c0_35 = arith.constant 0 : index
    %c0_36 = arith.constant 0 : index
    %51 = vector.load %arg20[%c0_34, %c0_35, %c0_36] : memref<4x8x8xf32, #tpu.memory_space<vmem>>, vector<1x8x8xf32>
    %52 = vector.shape_cast %51 : vector<1x8x8xf32> to vector<8x8xf32>
    %53 = vector.broadcast %38 : vector<8x1xf32> to vector<8x8xf32>
    %54 = arith.mulf %53, %52 : vector<8x8xf32>
    %55 = arith.truncf %41 : vector<8x8xf32> to vector<8x8xbf16>
    %56 = vector.extract_strided_slice %17 {offsets = [0, 0], sizes = [8, 8], strides = [1, 1]} : vector<8x32xbf16> to vector<8x8xbf16>
    %cst_37 = arith.constant dense<0.000000e+00> : vector<8x8xf32>
    %57 = tpu.matmul %55, %56, %cst_37 {dimension_numbers = #tpu.dot_dimension_numbers<[1], [0], [0], [1], [0, 0, 1, 1], [], []>} : vector<8x8xbf16>, vector<8x8xbf16>, vector<8x8xf32> -> vector<8x8xf32>
    %58 = arith.addf %54, %57 : vector<8x8xf32>
    %c0_38 = arith.constant 0 : index
    %c0_39 = arith.constant 0 : index
    %c0_40 = arith.constant 0 : index
    %59 = vector.load %arg20[%c0_38, %c0_39, %c0_40] : memref<4x8x8xf32, #tpu.memory_space<vmem>>, vector<1x8x8xf32>
    %60 = vector.shape_cast %59 : vector<1x8x8xf32> to vector<8x8xf32>
    %61 = vector.shape_cast %58 : vector<8x8xf32> to vector<1x8x8xf32>
    tpu.vector_store %arg20[%c0_38, %c0_39, %c0_40], %61 {strides = array<i32>} : memref<4x8x8xf32, #tpu.memory_space<vmem>>, vector<1x8x8xf32>,
    %c0_41 = arith.constant 0 : index
    %c0_42 = arith.constant 0 : index
    %c0_43 = arith.constant 0 : index
    %62 = vector.load %arg18[%c0_41, %c0_42, %c0_43] : memref<4x8x1xf32, #tpu.memory_space<vmem>>, vector<1x8x1xf32>
    %63 = vector.shape_cast %62 : vector<1x8x1xf32> to vector<8x1xf32>
    %64 = vector.shape_cast %36 : vector<8x1xf32> to vector<1x8x1xf32>
    tpu.vector_store %arg18[%c0_41, %c0_42, %c0_43], %64 {strides = array<i32>} : memref<4x8x1xf32, #tpu.memory_space<vmem>>, vector<1x8x1xf32>,
    %65 = vector.extract_strided_slice %18 {offsets = [0, 8], sizes = [8, 8], strides = [1, 1]} : vector<8x32xbf16> to vector<8x8xbf16>
    %66 = vector.extract_strided_slice %16 {offsets = [0, 8], sizes = [8, 8], strides = [1, 1]} : vector<8x32xbf16> to vector<8x8xbf16>
    %cst_44 = arith.constant dense<0.000000e+00> : vector<8x8xf32>
    %67 = tpu.matmul %65, %66, %cst_44 {dimension_numbers = #tpu.dot_dimension_numbers<[1], [1], [0], [0], [0, 0, 1, 0], [], []>} : vector<8x8xbf16>, vector<8x8xbf16>, vector<8x8xf32> -> vector<8x8xf32>
    %cst_45 = arith.constant 0.353553385 : f32
    %68 = vector.broadcast %cst_45 : f32 to vector<8x8xf32>
    %69 = arith.mulf %67, %68 : vector<8x8xf32>
    %70 = arith.addf %69, %25 : vector<8x8xf32>
    %c1 = arith.constant 1 : index
    %c0_46 = arith.constant 0 : index
    %c0_47 = arith.constant 0 : index
    %71 = vector.load %arg18[%c1, %c0_46, %c0_47] : memref<4x8x1xf32, #tpu.memory_space<vmem>>, vector<1x8x1xf32>
    %72 = vector.shape_cast %71 : vector<1x8x1xf32> to vector<8x1xf32>
    %cst_48 = arith.constant dense<0xFF800000> : vector<8xf32>
    %73 = vector.multi_reduction <maximumf>, %70, %cst_48 [1] : vector<8x8xf32> to vector<8xf32>
    %74 = vector.shape_cast %73 : vector<8xf32> to vector<8x1xf32>
    %75 = arith.maximumf %72, %74 : vector<8x1xf32>
    %76 = arith.subf %72, %75 : vector<8x1xf32>
    %77 = math.exp %76 : vector<8x1xf32>
    %78 = vector.broadcast %75 : vector<8x1xf32> to vector<8x8xf32>
    %79 = arith.subf %70, %78 : vector<8x8xf32>
    %80 = math.exp %79 : vector<8x8xf32>
    %c1_49 = arith.constant 1 : index
    %c0_50 = arith.constant 0 : index
    %c0_51 = arith.constant 0 : index
    %81 = vector.load %arg19[%c1_49, %c0_50, %c0_51] : memref<4x8x1xf32, #tpu.memory_space<vmem>>, vector<1x8x1xf32>
    %82 = vector.shape_cast %81 : vector<1x8x1xf32> to vector<8x1xf32>
    %83 = arith.mulf %77, %82 : vector<8x1xf32>
    %cst_52 = arith.constant dense<0.000000e+00> : vector<8xf32>
    %84 = vector.multi_reduction <add>, %80, %cst_52 [1] : vector<8x8xf32> to vector<8xf32>
    %85 = vector.shape_cast %84 : vector<8xf32> to vector<8x1xf32>
    %86 = arith.addf %83, %85 : vector<8x1xf32>
    %c1_53 = arith.constant 1 : index
    %c0_54 = arith.constant 0 : index
    %c0_55 = arith.constant 0 : index
    %87 = vector.load %arg19[%c1_53, %c0_54, %c0_55] : memref<4x8x1xf32, #tpu.memory_space<vmem>>, vector<1x8x1xf32>
    %88 = vector.shape_cast %87 : vector<1x8x1xf32> to vector<8x1xf32>
    %89 = vector.shape_cast %86 : vector<8x1xf32> to vector<1x8x1xf32>
    tpu.vector_store %arg19[%c1_53, %c0_54, %c0_55], %89 {strides = array<i32>} : memref<4x8x1xf32, #tpu.memory_space<vmem>>, vector<1x8x1xf32>,
    %c1_56 = arith.constant 1 : index
    %c0_57 = arith.constant 0 : index
    %c0_58 = arith.constant 0 : index
    %90 = vector.load %arg20[%c1_56, %c0_57, %c0_58] : memref<4x8x8xf32, #tpu.memory_space<vmem>>, vector<1x8x8xf32>
    %91 = vector.shape_cast %90 : vector<1x8x8xf32> to vector<8x8xf32>
    %92 = vector.broadcast %77 : vector<8x1xf32> to vector<8x8xf32>
    %93 = arith.mulf %92, %91 : vector<8x8xf32>
    %94 = arith.truncf %80 : vector<8x8xf32> to vector<8x8xbf16>
    %95 = vector.extract_strided_slice %17 {offsets = [0, 8], sizes = [8, 8], strides = [1, 1]} : vector<8x32xbf16> to vector<8x8xbf16>
    %cst_59 = arith.constant dense<0.000000e+00> : vector<8x8xf32>
    %96 = tpu.matmul %94, %95, %cst_59 {dimension_numbers = #tpu.dot_dimension_numbers<[1], [0], [0], [1], [0, 0, 1, 1], [], []>} : vector<8x8xbf16>, vector<8x8xbf16>, vector<8x8xf32> -> vector<8x8xf32>
    %97 = arith.addf %93, %96 : vector<8x8xf32>
    %c1_60 = arith.constant 1 : index
    %c0_61 = arith.constant 0 : index
    %c0_62 = arith.constant 0 : index
    %98 = vector.load %arg20[%c1_60, %c0_61, %c0_62] : memref<4x8x8xf32, #tpu.memory_space<vmem>>, vector<1x8x8xf32>
    %99 = vector.shape_cast %98 : vector<1x8x8xf32> to vector<8x8xf32>
    %100 = vector.shape_cast %97 : vector<8x8xf32> to vector<1x8x8xf32>
    tpu.vector_store %arg20[%c1_60, %c0_61, %c0_62], %100 {strides = array<i32>} : memref<4x8x8xf32, #tpu.memory_space<vmem>>, vector<1x8x8xf32>,
    %c1_63 = arith.constant 1 : index
    %c0_64 = arith.constant 0 : index
    %c0_65 = arith.constant 0 : index
    %101 = vector.load %arg18[%c1_63, %c0_64, %c0_65] : memref<4x8x1xf32, #tpu.memory_space<vmem>>, vector<1x8x1xf32>
    %102 = vector.shape_cast %101 : vector<1x8x1xf32> to vector<8x1xf32>
    %103 = vector.shape_cast %75 : vector<8x1xf32> to vector<1x8x1xf32>
    tpu.vector_store %arg18[%c1_63, %c0_64, %c0_65], %103 {strides = array<i32>} : memref<4x8x1xf32, #tpu.memory_space<vmem>>, vector<1x8x1xf32>,
    %104 = vector.extract_strided_slice %18 {offsets = [0, 16], sizes = [8, 8], strides = [1, 1]} : vector<8x32xbf16> to vector<8x8xbf16>
    %105 = vector.extract_strided_slice %16 {offsets = [0, 16], sizes = [8, 8], strides = [1, 1]} : vector<8x32xbf16> to vector<8x8xbf16>
    %cst_66 = arith.constant dense<0.000000e+00> : vector<8x8xf32>
    %106 = tpu.matmul %104, %105, %cst_66 {dimension_numbers = #tpu.dot_dimension_numbers<[1], [1], [0], [0], [0, 0, 1, 0], [], []>} : vector<8x8xbf16>, vector<8x8xbf16>, vector<8x8xf32> -> vector<8x8xf32>
    %cst_67 = arith.constant 0.353553385 : f32
    %107 = vector.broadcast %cst_67 : f32 to vector<8x8xf32>
    %108 = arith.mulf %106, %107 : vector<8x8xf32>
    %109 = arith.addf %108, %25 : vector<8x8xf32>
    %c2 = arith.constant 2 : index
    %c0_68 = arith.constant 0 : index
    %c0_69 = arith.constant 0 : index
    %110 = vector.load %arg18[%c2, %c0_68, %c0_69] : memref<4x8x1xf32, #tpu.memory_space<vmem>>, vector<1x8x1xf32>
    %111 = vector.shape_cast %110 : vector<1x8x1xf32> to vector<8x1xf32>
    %cst_70 = arith.constant dense<0xFF800000> : vector<8xf32>
    %112 = vector.multi_reduction <maximumf>, %109, %cst_70 [1] : vector<8x8xf32> to vector<8xf32>
    %113 = vector.shape_cast %112 : vector<8xf32> to vector<8x1xf32>
    %114 = arith.maximumf %111, %113 : vector<8x1xf32>
    %115 = arith.subf %111, %114 : vector<8x1xf32>
    %116 = math.exp %115 : vector<8x1xf32>
    %117 = vector.broadcast %114 : vector<8x1xf32> to vector<8x8xf32>
    %118 = arith.subf %109, %117 : vector<8x8xf32>
    %119 = math.exp %118 : vector<8x8xf32>
    %c2_71 = arith.constant 2 : index
    %c0_72 = arith.constant 0 : index
    %c0_73 = arith.constant 0 : index
    %120 = vector.load %arg19[%c2_71, %c0_72, %c0_73] : memref<4x8x1xf32, #tpu.memory_space<vmem>>, vector<1x8x1xf32>
    %121 = vector.shape_cast %120 : vector<1x8x1xf32> to vector<8x1xf32>
    %122 = arith.mulf %116, %121 : vector<8x1xf32>
    %cst_74 = arith.constant dense<0.000000e+00> : vector<8xf32>
    %123 = vector.multi_reduction <add>, %119, %cst_74 [1] : vector<8x8xf32> to vector<8xf32>
    %124 = vector.shape_cast %123 : vector<8xf32> to vector<8x1xf32>
    %125 = arith.addf %122, %124 : vector<8x1xf32>
    %c2_75 = arith.constant 2 : index
    %c0_76 = arith.constant 0 : index
    %c0_77 = arith.constant 0 : index
    %126 = vector.load %arg19[%c2_75, %c0_76, %c0_77] : memref<4x8x1xf32, #tpu.memory_space<vmem>>, vector<1x8x1xf32>
    %127 = vector.shape_cast %126 : vector<1x8x1xf32> to vector<8x1xf32>
    %128 = vector.shape_cast %125 : vector<8x1xf32> to vector<1x8x1xf32>
    tpu.vector_store %arg19[%c2_75, %c0_76, %c0_77], %128 {strides = array<i32>} : memref<4x8x1xf32, #tpu.memory_space<vmem>>, vector<1x8x1xf32>,
    %c2_78 = arith.constant 2 : index
    %c0_79 = arith.constant 0 : index
    %c0_80 = arith.constant 0 : index
    %129 = vector.load %arg20[%c2_78, %c0_79, %c0_80] : memref<4x8x8xf32, #tpu.memory_space<vmem>>, vector<1x8x8xf32>
    %130 = vector.shape_cast %129 : vector<1x8x8xf32> to vector<8x8xf32>
    %131 = vector.broadcast %116 : vector<8x1xf32> to vector<8x8xf32>
    %132 = arith.mulf %131, %130 : vector<8x8xf32>
    %133 = arith.truncf %119 : vector<8x8xf32> to vector<8x8xbf16>
    %134 = vector.extract_strided_slice %17 {offsets = [0, 16], sizes = [8, 8], strides = [1, 1]} : vector<8x32xbf16> to vector<8x8xbf16>
    %cst_81 = arith.constant dense<0.000000e+00> : vector<8x8xf32>
    %135 = tpu.matmul %133, %134, %cst_81 {dimension_numbers = #tpu.dot_dimension_numbers<[1], [0], [0], [1], [0, 0, 1, 1], [], []>} : vector<8x8xbf16>, vector<8x8xbf16>, vector<8x8xf32> -> vector<8x8xf32>
    %136 = arith.addf %132, %135 : vector<8x8xf32>
    %c2_82 = arith.constant 2 : index
    %c0_83 = arith.constant 0 : index
    %c0_84 = arith.constant 0 : index
    %137 = vector.load %arg20[%c2_82, %c0_83, %c0_84] : memref<4x8x8xf32, #tpu.memory_space<vmem>>, vector<1x8x8xf32>
    %138 = vector.shape_cast %137 : vector<1x8x8xf32> to vector<8x8xf32>
    %139 = vector.shape_cast %136 : vector<8x8xf32> to vector<1x8x8xf32>
    tpu.vector_store %arg20[%c2_82, %c0_83, %c0_84], %139 {strides = array<i32>} : memref<4x8x8xf32, #tpu.memory_space<vmem>>, vector<1x8x8xf32>,
    %c2_85 = arith.constant 2 : index
    %c0_86 = arith.constant 0 : index
    %c0_87 = arith.constant 0 : index
    %140 = vector.load %arg18[%c2_85, %c0_86, %c0_87] : memref<4x8x1xf32, #tpu.memory_space<vmem>>, vector<1x8x1xf32>
    %141 = vector.shape_cast %140 : vector<1x8x1xf32> to vector<8x1xf32>
    %142 = vector.shape_cast %114 : vector<8x1xf32> to vector<1x8x1xf32>
    tpu.vector_store %arg18[%c2_85, %c0_86, %c0_87], %142 {strides = array<i32>} : memref<4x8x1xf32, #tpu.memory_space<vmem>>, vector<1x8x1xf32>,
    %143 = vector.extract_strided_slice %18 {offsets = [0, 24], sizes = [8, 8], strides = [1, 1]} : vector<8x32xbf16> to vector<8x8xbf16>
    %144 = vector.extract_strided_slice %16 {offsets = [0, 24], sizes = [8, 8], strides = [1, 1]} : vector<8x32xbf16> to vector<8x8xbf16>
    %cst_88 = arith.constant dense<0.000000e+00> : vector<8x8xf32>
    %145 = tpu.matmul %143, %144, %cst_88 {dimension_numbers = #tpu.dot_dimension_numbers<[1], [1], [0], [0], [0, 0, 1, 0], [], []>} : vector<8x8xbf16>, vector<8x8xbf16>, vector<8x8xf32> -> vector<8x8xf32>
    %cst_89 = arith.constant 0.353553385 : f32
    %146 = vector.broadcast %cst_89 : f32 to vector<8x8xf32>
    %147 = arith.mulf %145, %146 : vector<8x8xf32>
    %148 = arith.addf %147, %25 : vector<8x8xf32>
    %c3 = arith.constant 3 : index
    %c0_90 = arith.constant 0 : index
    %c0_91 = arith.constant 0 : index
    %149 = vector.load %arg18[%c3, %c0_90, %c0_91] : memref<4x8x1xf32, #tpu.memory_space<vmem>>, vector<1x8x1xf32>
    %150 = vector.shape_cast %149 : vector<1x8x1xf32> to vector<8x1xf32>
    %cst_92 = arith.constant dense<0xFF800000> : vector<8xf32>
    %151 = vector.multi_reduction <maximumf>, %148, %cst_92 [1] : vector<8x8xf32> to vector<8xf32>
    %152 = vector.shape_cast %151 : vector<8xf32> to vector<8x1xf32>
    %153 = arith.maximumf %150, %152 : vector<8x1xf32>
    %154 = arith.subf %150, %153 : vector<8x1xf32>
    %155 = math.exp %154 : vector<8x1xf32>
    %156 = vector.broadcast %153 : vector<8x1xf32> to vector<8x8xf32>
    %157 = arith.subf %148, %156 : vector<8x8xf32>
    %158 = math.exp %157 : vector<8x8xf32>
    %c3_93 = arith.constant 3 : index
    %c0_94 = arith.constant 0 : index
    %c0_95 = arith.constant 0 : index
    %159 = vector.load %arg19[%c3_93, %c0_94, %c0_95] : memref<4x8x1xf32, #tpu.memory_space<vmem>>, vector<1x8x1xf32>
    %160 = vector.shape_cast %159 : vector<1x8x1xf32> to vector<8x1xf32>
    %161 = arith.mulf %155, %160 : vector<8x1xf32>
    %cst_96 = arith.constant dense<0.000000e+00> : vector<8xf32>
    %162 = vector.multi_reduction <add>, %158, %cst_96 [1] : vector<8x8xf32> to vector<8xf32>
    %163 = vector.shape_cast %162 : vector<8xf32> to vector<8x1xf32>
    %164 = arith.addf %161, %163 : vector<8x1xf32>
    %c3_97 = arith.constant 3 : index
    %c0_98 = arith.constant 0 : index
    %c0_99 = arith.constant 0 : index
    %165 = vector.load %arg19[%c3_97, %c0_98, %c0_99] : memref<4x8x1xf32, #tpu.memory_space<vmem>>, vector<1x8x1xf32>
    %166 = vector.shape_cast %165 : vector<1x8x1xf32> to vector<8x1xf32>
    %167 = vector.shape_cast %164 : vector<8x1xf32> to vector<1x8x1xf32>
    tpu.vector_store %arg19[%c3_97, %c0_98, %c0_99], %167 {strides = array<i32>} : memref<4x8x1xf32, #tpu.memory_space<vmem>>, vector<1x8x1xf32>,
    %c3_100 = arith.constant 3 : index
    %c0_101 = arith.constant 0 : index
    %c0_102 = arith.constant 0 : index
    %168 = vector.load %arg20[%c3_100, %c0_101, %c0_102] : memref<4x8x8xf32, #tpu.memory_space<vmem>>, vector<1x8x8xf32>
    %169 = vector.shape_cast %168 : vector<1x8x8xf32> to vector<8x8xf32>
    %170 = vector.broadcast %155 : vector<8x1xf32> to vector<8x8xf32>
    %171 = arith.mulf %170, %169 : vector<8x8xf32>
    %172 = arith.truncf %158 : vector<8x8xf32> to vector<8x8xbf16>
    %173 = vector.extract_strided_slice %17 {offsets = [0, 24], sizes = [8, 8], strides = [1, 1]} : vector<8x32xbf16> to vector<8x8xbf16>
    %cst_103 = arith.constant dense<0.000000e+00> : vector<8x8xf32>
    %174 = tpu.matmul %172, %173, %cst_103 {dimension_numbers = #tpu.dot_dimension_numbers<[1], [0], [0], [1], [0, 0, 1, 1], [], []>} : vector<8x8xbf16>, vector<8x8xbf16>, vector<8x8xf32> -> vector<8x8xf32>
    %175 = arith.addf %171, %174 : vector<8x8xf32>
    %c3_104 = arith.constant 3 : index
    %c0_105 = arith.constant 0 : index
    %c0_106 = arith.constant 0 : index
    %176 = vector.load %arg20[%c3_104, %c0_105, %c0_106] : memref<4x8x8xf32, #tpu.memory_space<vmem>>, vector<1x8x8xf32>
    %177 = vector.shape_cast %176 : vector<1x8x8xf32> to vector<8x8xf32>
    %178 = vector.shape_cast %175 : vector<8x8xf32> to vector<1x8x8xf32>
    tpu.vector_store %arg20[%c3_104, %c0_105, %c0_106], %178 {strides = array<i32>} : memref<4x8x8xf32, #tpu.memory_space<vmem>>, vector<1x8x8xf32>,
    %c3_107 = arith.constant 3 : index
    %c0_108 = arith.constant 0 : index
    %c0_109 = arith.constant 0 : index
    %179 = vector.load %arg18[%c3_107, %c0_108, %c0_109] : memref<4x8x1xf32, #tpu.memory_space<vmem>>, vector<1x8x1xf32>
    %180 = vector.shape_cast %179 : vector<1x8x1xf32> to vector<8x1xf32>
    %181 = vector.shape_cast %153 : vector<8x1xf32> to vector<1x8x1xf32>
    tpu.vector_store %arg18[%c3_107, %c0_108, %c0_109], %181 {strides = array<i32>} : memref<4x8x1xf32, #tpu.memory_space<vmem>>, vector<1x8x1xf32>,
    %c1_i32 = arith.constant 1 : i32
    %182 = arith.cmpi eq, %arg1, %c1_i32 : i32
    %183 = arith.extui %182 : i1 to i32
    %c0_i32_110 = arith.constant 0 : i32
    %184 = arith.cmpi ne, %183, %c0_i32_110 : i32
    scf.if %184 {
      %c0_111 = arith.constant 0 : index
      %c0_112 = arith.constant 0 : index
      %c0_113 = arith.constant 0 : index
      %185 = vector.load %arg19[%c0_111, %c0_112, %c0_113] : memref<4x8x1xf32, #tpu.memory_space<vmem>>, vector<1x8x1xf32>
      %186 = vector.shape_cast %185 : vector<1x8x1xf32> to vector<8x1xf32>
      %187 = tpu.reciprocal %186 {approx = true} : vector<8x1xf32> -> vector<8x1xf32>
      %c0_114 = arith.constant 0 : index
      %c0_115 = arith.constant 0 : index
      %c0_116 = arith.constant 0 : index
      %188 = vector.load %arg20[%c0_114, %c0_115, %c0_116] : memref<4x8x8xf32, #tpu.memory_space<vmem>>, vector<1x8x8xf32>
      %189 = vector.shape_cast %188 : vector<1x8x8xf32> to vector<8x8xf32>
      %190 = vector.broadcast %187 : vector<8x1xf32> to vector<8x8xf32>
      %191 = arith.mulf %189, %190 : vector<8x8xf32>
      %c1_117 = arith.constant 1 : index
      %c0_118 = arith.constant 0 : index
      %c0_119 = arith.constant 0 : index
      %192 = vector.load %arg19[%c1_117, %c0_118, %c0_119] : memref<4x8x1xf32, #tpu.memory_space<vmem>>, vector<1x8x1xf32>
      %193 = vector.shape_cast %192 : vector<1x8x1xf32> to vector<8x1xf32>
      %194 = tpu.reciprocal %193 {approx = true} : vector<8x1xf32> -> vector<8x1xf32>
      %c1_120 = arith.constant 1 : index
      %c0_121 = arith.constant 0 : index
      %c0_122 = arith.constant 0 : index
      %195 = vector.load %arg20[%c1_120, %c0_121, %c0_122] : memref<4x8x8xf32, #tpu.memory_space<vmem>>, vector<1x8x8xf32>
      %196 = vector.shape_cast %195 : vector<1x8x8xf32> to vector<8x8xf32>
      %197 = vector.broadcast %194 : vector<8x1xf32> to vector<8x8xf32>
      %198 = arith.mulf %196, %197 : vector<8x8xf32>
      %c2_123 = arith.constant 2 : index
      %c0_124 = arith.constant 0 : index
      %c0_125 = arith.constant 0 : index
      %199 = vector.load %arg19[%c2_123, %c0_124, %c0_125] : memref<4x8x1xf32, #tpu.memory_space<vmem>>, vector<1x8x1xf32>
      %200 = vector.shape_cast %199 : vector<1x8x1xf32> to vector<8x1xf32>
      %201 = tpu.reciprocal %200 {approx = true} : vector<8x1xf32> -> vector<8x1xf32>
      %c2_126 = arith.constant 2 : index
      %c0_127 = arith.constant 0 : index
      %c0_128 = arith.constant 0 : index
      %202 = vector.load %arg20[%c2_126, %c0_127, %c0_128] : memref<4x8x8xf32, #tpu.memory_space<vmem>>, vector<1x8x8xf32>
      %203 = vector.shape_cast %202 : vector<1x8x8xf32> to vector<8x8xf32>
      %204 = vector.broadcast %201 : vector<8x1xf32> to vector<8x8xf32>
      %205 = arith.mulf %203, %204 : vector<8x8xf32>
      %c3_129 = arith.constant 3 : index
      %c0_130 = arith.constant 0 : index
      %c0_131 = arith.constant 0 : index
      %206 = vector.load %arg19[%c3_129, %c0_130, %c0_131] : memref<4x8x1xf32, #tpu.memory_space<vmem>>, vector<1x8x1xf32>
      %207 = vector.shape_cast %206 : vector<1x8x1xf32> to vector<8x1xf32>
      %208 = tpu.reciprocal %207 {approx = true} : vector<8x1xf32> -> vector<8x1xf32>
      %c3_132 = arith.constant 3 : index
      %c0_133 = arith.constant 0 : index
      %c0_134 = arith.constant 0 : index
      %209 = vector.load %arg20[%c3_132, %c0_133, %c0_134] : memref<4x8x8xf32, #tpu.memory_space<vmem>>, vector<1x8x8xf32>
      %210 = vector.shape_cast %209 : vector<1x8x8xf32> to vector<8x8xf32>
      %211 = vector.broadcast %208 : vector<8x1xf32> to vector<8x8xf32>
      %212 = arith.mulf %210, %211 : vector<8x8xf32>
      %213 = tpu.concatenate %191, %198, %205, %212 in 1 : vector<8x8xf32>, vector<8x8xf32>, vector<8x8xf32>, vector<8x8xf32> -> vector<8x32xf32>
      %214 = arith.truncf %213 : vector<8x32xf32> to vector<8x32xbf16>
      %c0_135 = arith.constant 0 : index
      %c0_136 = arith.constant 0 : index
      %215 = vector.load %arg13[%c0_135, %c0_136] : memref<32x32xbf16, #tpu.memory_space<vmem>>, vector<32x32xbf16>
      %cst_137 = arith.constant dense<0.000000e+00> : vector<8x32xf32>
      %216 = tpu.matmul %214, %215, %cst_137 {dimension_numbers = #tpu.dot_dimension_numbers<[1], [0], [0], [1], [0, 0, 1, 1], [], []>} : vector<8x32xbf16>, vector<32x32xbf16>, vector<8x32xf32> -> vector<8x32xf32>
      %c0_138 = arith.constant 0 : index
      %c0_139 = arith.constant 0 : index
      %217 = vector.load %arg14[%c0_138, %c0_139] : memref<1x32xf32, #tpu.memory_space<vmem>>, vector<1x32xf32>
      %218 = vector.broadcast %217 : vector<1x32xf32> to vector<8x32xf32>
      %219 = arith.addf %216, %218 : vector<8x32xf32>
      %c0_140 = arith.constant 0 : index
      %c0_141 = arith.constant 0 : index
      %220 = vector.load %arg16[%c0_140, %c0_141] : memref<8x32xf32, #tpu.memory_space<vmem>>, vector<8x32xf32>
      %221 = arith.addf %220, %219 : vector<8x32xf32>
      %c0_142 = arith.constant 0 : index
      %c0_143 = arith.constant 0 : index
      %c0_144 = arith.constant 0 : index
      %222 = vector.load %arg15[%c0_142, %c0_143, %c0_144] : memref<1x8x32xf32, #tpu.memory_space<vmem>>, vector<1x8x32xf32>
      %223 = vector.shape_cast %222 : vector<1x8x32xf32> to vector<8x32xf32>
      %224 = vector.shape_cast %221 : vector<8x32xf32> to vector<1x8x32xf32>
      tpu.vector_store %arg15[%c0_142, %c0_143, %c0_144], %224 {strides = array<i32>} : memref<1x8x32xf32, #tpu.memory_space<vmem>>, vector<1x8x32xf32>,
    } else {
    }
    return
  }
  func.func @transform_0(%arg0: i32, %arg1: i32) -> (i32, i32, i32) {
    %c0_i32 = arith.constant 0 : i32
    %c0_i32_0 = arith.constant 0 : i32
    %c0_i32_1 = arith.constant 0 : i32
    return %arg0, %c0_i32, %c0_i32_0 : i32, i32, i32
  }
  func.func @transform_1(%arg0: i32, %arg1: i32) -> (i32, i32, i32, i32) {
    %c0_i32 = arith.constant 0 : i32
    %c0_i32_0 = arith.constant 0 : i32
    %c0_i32_1 = arith.constant 0 : i32
    return %arg0, %arg1, %c0_i32, %c0_i32_0 : i32, i32, i32, i32
  }
  func.func @transform_2(%arg0: i32, %arg1: i32) -> (i32, i32, i32) {
    %c0_i32 = arith.constant 0 : i32
    %c0_i32_0 = arith.constant 0 : i32
    %c0_i32_1 = arith.constant 0 : i32
    return %arg0, %c0_i32, %c0_i32_0 : i32, i32, i32
  }
  func.func @transform_3(%arg0: i32, %arg1: i32) -> (i32, i32) {
    %c0_i32 = arith.constant 0 : i32
    %c0_i32_0 = arith.constant 0 : i32
    %c0_i32_1 = arith.constant 0 : i32
    return %c0_i32, %c0_i32_0 : i32, i32
  }
  func.func @transform_4(%arg0: i32, %arg1: i32) -> (i32, i32) {
    %c0_i32 = arith.constant 0 : i32
    %c0_i32_0 = arith.constant 0 : i32
    %c0_i32_1 = arith.constant 0 : i32
    return %c0_i32, %c0_i32_0 : i32, i32
  }
  func.func @transform_5(%arg0: i32, %arg1: i32) -> (i32, i32) {
    %c0_i32 = arith.constant 0 : i32
    %c0_i32_0 = arith.constant 0 : i32
    %c0_i32_1 = arith.constant 0 : i32
    return %c0_i32, %c0_i32_0 : i32, i32
  }
  func.func @transform_6(%arg0: i32, %arg1: i32) -> (i32, i32) {
    %c0_i32 = arith.constant 0 : i32
    %c0_i32_0 = arith.constant 0 : i32
    %c0_i32_1 = arith.constant 0 : i32
    return %c0_i32, %c0_i32_0 : i32, i32
  }
  func.func @transform_7(%arg0: i32, %arg1: i32) -> (i32, i32) {
    %c0_i32 = arith.constant 0 : i32
    %c0_i32_0 = arith.constant 0 : i32
    %c0_i32_1 = arith.constant 0 : i32
    return %c0_i32, %c0_i32_0 : i32, i32
  }
  func.func @transform_8(%arg0: i32, %arg1: i32) -> (i32, i32) {
    %c0_i32 = arith.constant 0 : i32
    %c0_i32_0 = arith.constant 0 : i32
    %c0_i32_1 = arith.constant 0 : i32
    return %c0_i32, %c0_i32_0 : i32, i32
  }
  func.func @transform_9(%arg0: i32, %arg1: i32) -> (i32, i32) {
    %c0_i32 = arith.constant 0 : i32
    %c0_i32_0 = arith.constant 0 : i32
    %c0_i32_1 = arith.constant 0 : i32
    return %c0_i32, %c0_i32_0 : i32, i32
  }
  func.func @transform_10(%arg0: i32, %arg1: i32) -> (i32, i32) {
    %c0_i32 = arith.constant 0 : i32
    %c0_i32_0 = arith.constant 0 : i32
    %c0_i32_1 = arith.constant 0 : i32
    return %c0_i32, %c0_i32_0 : i32, i32
  }
  func.func @transform_11(%arg0: i32, %arg1: i32) -> (i32, i32) {
    %c0_i32 = arith.constant 0 : i32
    %c0_i32_0 = arith.constant 0 : i32
    %c0_i32_1 = arith.constant 0 : i32
    return %c0_i32, %c0_i32_0 : i32, i32
  }
  func.func @transform_12(%arg0: i32, %arg1: i32) -> (i32, i32) {
    %c0_i32 = arith.constant 0 : i32
    %c0_i32_0 = arith.constant 0 : i32
    %c0_i32_1 = arith.constant 0 : i32
    return %c0_i32, %c0_i32_0 : i32, i32
  }
  func.func @transform_13(%arg0: i32, %arg1: i32) -> (i32, i32, i32) {
    %c0_i32 = arith.constant 0 : i32
    %c0_i32_0 = arith.constant 0 : i32
    %c0_i32_1 = arith.constant 0 : i32
    return %arg0, %c0_i32, %c0_i32_0 : i32, i32, i32
  }
}

</mosaic_0001>

<bundles_post_ra>
// kernel: simplex_decoder_layer_conv.5
= control target key start
LH: loop header
LB: loop body
LE: loop exit
PB: predicated region body
PF: predicated region fallthrough
CT: control target
= control target key end

     0   :  { %vm32_vm0 = vcmask 261120   ;;  %s449_s0 = inlined_call_operand.vmem [shape: f32[16,32], index: 0, kind: input, shape index: {}]   ;;  %s450_s1 = inlined_call_operand.vmem [shape: f32[1,32], index: 1, kind: input, shape index: {}]   ;;  %s451_s2 = inlined_call_operand.vmem [shape: f32[1,32], index: 2, kind: input, shape index: {}]   ;;  %s452_s3 = inlined_call_operand.vmem [shape: bf16[32,64], index: 3, kind: input, shape index: {}]   ;;  %s453_s4 = inlined_call_operand.vmem [shape: f32[1,64], index: 4, kind: input, shape index: {}]   ;;  %s454_s5 = inlined_call_operand.vmem [shape: bf16[64,32], index: 5, kind: input, shape index: {}]   ;;  %s455_s6 = inlined_call_operand.vmem [shape: f32[1,32], index: 6, kind: input, shape index: {}]   ;;  %s456_s7 = inlined_call_operand.hbm [shape: f32[16,32], index: 7, kind: output, shape index: {}]  }
   0x1   :  { %v28_v0 = vld [vmem:[%s449_s0] sm:$0xff]  ;;  %v29_v1 = vld [vmem:[%s449_s0 + $0x8] sm:$0xff] }
   0x2   :  { %v33_v2 = vsel %vm32_vm0, %v28_v0, 0.0  ;;  %v36_v3 = vsel %vm32_vm0, %v29_v1, 0.0 }
   0x3   :  { %34 = vadd.xlane.f32.xlu0 %v33_v2 }
   0x4   :  { %12 = vsyncpa [#allocation3], 0  ;;  %v311_v14 = vld [vmem:[%s452_s3] sm:$0xff]   ;;  %v349_v15 = vmov 0.0   ;;  %vm350_vm1 = vmmov 0   ;;  %v312_v16 = vld [vmem:[%s452_s3 + $0x8] sm:$0xff]  }
   0x5   :  { %286 = vmatprep.subr.bf16.mxu0 %v349_v15  ;;  %290 = vmatprep.mubr.msk.bf16.mxu0 %vm350_vm1, %v349_v15  ;;  %v313_v17 = vld [vmem:[%s454_s5] sm:$0xff]   ;;  %v314_v18 = vld [vmem:[%s454_s5 + $0x8] sm:$0xff]   ;;  %v315_v46 = vld [vmem:[%s454_s5 + $0x10] sm:$0xff]   ;;  %vm201_vm6 = vcmask 523264  }
   0x6   :  { %287 = vmatpush3.bf16.msra.mxu0 %v311_v14  ;;  %294 = vmatprep.subr.bf16.mxu1 %v349_v15  ;;  %v266_v35 = vld [vmem:[%s450_s1] ss:$0 sm:$0xff]  ;;  %v316_v47 = vld [vmem:[%s454_s5 + $0x18] sm:$0xff]   ;;  %s351_s5 = smov [#allocation2]  }
   0x7   :  { %37 = vadd.xlane.f32.xlu0 %v36_v3  ;;  %288 = vmatprep.subr.bf16.mxu0 %v349_v15  ;;  %v267_v41 = vld [vmem:[%s451_s2] ss:$0 sm:$0xff] }
   0x8   :  { %302 = vmatprep.mubr.msk.bf16.mxu1 %vm350_vm1, %v349_v15  ;;  %295 = vmatpush3.bf16.msra.mxu1 %v313_v17  ;;  %v268_v48 = vld [vmem:[%s453_s4] ss:$0 sm:$0xff]  ;;  %s255_s4 = sshll.u32 %s351_s5, 4  ;;  %s256_s4 = int_to_ptr.vmem [resolvable:$true] %s255_s4 }
   0x9   :  { %296 = vmatprep.subr.bf16.mxu1 %v349_v15  ;;  %v272_v58 = vld [vmem:[%s455_s6] ss:$0 sm:$0xff]  ;;  %s325_s21 = scalar_lea.vmem %s256_s4, 256  ;;  %p330_p1 = scmp.lt.s32.totalorder %s256_s4, %s256_s4 }
   0xa   :  { %289 = vmatpush3.bf16.msra.mxu0 %v312_v16  ;;  %p326_p0 = scmp.ne.s32.totalorder %s256_s4, %s325_s21  ;;  %p331_p2 = scmp.lt.s32.totalorder %s325_s21, %s325_s21 }
   0xc   :  { %297 = vmatpush3.bf16.msra.mxu1 %v314_v18  ;;  %p332_p3 = por %p331_p2, %p330_p1 }
   0xd   :  { %298 = vmatprep.subr.bf16.mxu1 %v349_v15 }
   0xe   :  { %p333_p4 = pnand %p332_p3, %p326_p0 }
  0x10   :  { %299 = vmatpush3.bf16.msra.mxu1 %v315_v46 }
  0x11   :  { %300 = vmatprep.subr.bf16.mxu1 %v349_v15 }
  0x14   :  { %301 = vmatpush3.bf16.msra.mxu1 %v316_v47 }
  0x90   :  { %v35_v4 = vpop.xlane.xlu0 %34 }
  0x91   :  { %v40_v5 = vmul.f32 0.03125, %v35_v4 }
  0x93   :  { %v42_v6 = vsub.f32 %v28_v0, %v40_v5 }
  0x94   :  { %v38_v7 = vpop.xlane.xlu0 %37 }
  0x95   :  { %v41_v8 = vmul.f32 0.03125, %v38_v7  ;;  %v44_v9 = vmul.f32 %v42_v6, %v42_v6  ;;  %v61_v37 = vmul.f32 %v266_v35, %v42_v6 }
  0x97   :  { %v43_v10 = vsub.f32 %v29_v1, %v41_v8  ;;  %v46_v11 = vsel %vm32_vm0, %v44_v9, 0.0 }
  0x98   :  { %47 = vadd.xlane.f32.xlu1 %v46_v11 }
  0x99   :  { %v45_v12 = vmul.f32 %v43_v10, %v43_v10  ;;  %v62_v38 = vmul.f32 %v266_v35, %v43_v10 }
  0x9b   :  { %v49_v13 = vsel %vm32_vm0, %v45_v12, 0.0 }
  0x9c   :  { %50 = vadd.xlane.f32.xlu1 %v49_v13 }
 0x125   :  { %v48_v19 = vpop.xlane.xlu1 %47 }
 0x126   :  { %v53_v20 = vmul.f32 0.032258064, %v48_v19 }
 0x128   :  { %317 = vrsqrt.f32 %v53_v20  ;;  %vm65_vm2 = vcmp.eq.f32.partialorder %v53_v20, inf  ;;  %v68_v25 = vand.u32 2147483648, %v53_v20  ;;  %vm67_vm3 = vcmp.eq.f32.partialorder %v53_v20, 0.0 }
 0x129   :  { %v51_v21 = vpop.xlane.xlu1 %50 }
 0x12a   :  { %v54_v22 = vmul.f32 0.032258064, %v51_v21 }
 0x12c   :  { %319 = vrsqrt.f32 %v54_v22  ;;  %vm72_vm4 = vcmp.eq.f32.partialorder %v54_v22, inf  ;;  %v75_v31 = vand.u32 2147483648, %v54_v22  ;;  %vm74_vm5 = vcmp.eq.f32.partialorder %v54_v22, 0.0 }
 0x132   :  { %v318_v23 = vpop.eup %317 }
 0x133   :  { %v64_v24 = vmul.f32 %v318_v23, %v53_v20 }
 0x135   :  { %v66_v26 = vsel %vm65_vm2, %v53_v20, %v64_v24 }
 0x136   :  { %v320_v27 = vpop.eup %319  ;;  %v69_v28 = vsel %vm67_vm3, %v68_v25, %v66_v26 }
 0x137   :  { %v77_v29 = vadd.f32 1e-06, %v69_v28  ;;  %v71_v30 = vmul.f32 %v320_v27, %v54_v22 }
 0x139   :  { %321 = vrcp.f32 %v77_v29  ;;  %v73_v32 = vsel %vm72_vm4, %v54_v22, %v71_v30 }
 0x13a   :  { %v76_v33 = vsel %vm74_vm5, %v75_v31, %v73_v32 }
 0x13b   :  { %v78_v34 = vadd.f32 1e-06, %v76_v33 }
 0x13d   :  { %323 = vrcp.f32 %v78_v34 }
 0x143   :  { %v322_v36 = vpop.eup %321 }
 0x144   :  { %v80_v39 = vmul.f32 %v322_v36, %v61_v37 }
 0x146   :  { %v89_v43 = vadd.f32 %v267_v41, %v80_v39 }
 0x147   :  { %v324_v40 = vpop.eup %323 }
 0x148   :  { %v82_v42 = vmul.f32 %v324_v40, %v62_v38 }
 0x14a   :  { %v90_v44 = vadd.f32 %v267_v41, %v82_v42 }
 0x14c   :  { %v91_v45 = vpack.c.bf16 %v90_v44, %v89_v43 }
 0x14e   :  { %291 = vmatmul.mubr.msk.bf16.vlgmr.msra.gmra.mrb[0].mxu0 %vm32_vm0, %v91_v45 }
 0x221   :  { %v152_v49 = vpop.f32.mrb[0].mxu0 }
 0x222   :  { %v153_v50 = vadd.f32 %v268_v48, %v152_v49  ;;  %v292_v51 = vpop.f32.mrb[1].mxu0 }
 0x223   :  { %v155_v52 = vpop.f32.mrb[2].mxu0 }
 0x224   :  { %v156_v53 = vadd.f32 %v268_v48, %v155_v52  ;;  %v293_v54 = vpop.f32.mrb[3].mxu0  ;;  %v159_v55 = vmax.f32 %v153_v50, 0.0 }
 0x226   :  { %v160_v56 = vmax.f32 %v156_v53, 0.0 }
 0x228   :  { %v161_v57 = vpack.c.bf16 %v160_v56, %v159_v55 }
 0x22a   :  { %303 = vmatmul.mubr.msk.bf16.vlgmr.msra.gmra.mrb[0].mxu1 %vm201_vm6, %v161_v57 }
 0x2fd   :  { %v239_v59 = vpop.f32.mrb[0].mxu1 }
 0x2fe   :  { %v240_v60 = vadd.f32 %v272_v58, %v239_v59  ;;  %v304_v61 = vpop.f32.mrb[1].mxu1 }
 0x2ff   :  { %v242_v62 = vpop.f32.mrb[2].mxu1 }
 0x300   :  { %v246_v63 = vadd.f32 %v240_v60, %v89_v43  ;;  %v243_v0 = vadd.f32 %v272_v58, %v242_v62  ;;  %v305_v1 = vpop.f32.mrb[3].mxu1 }
 0x302   :  { %248 = vst.msk [vmem:[#allocation2] sm:$0xff] %vm32_vm0, %v246_v63  ;;  %v247_v2 = vadd.f32 %v243_v0, %v90_v44 }
 0x304   :  { %249 = vst.msk [vmem:[#allocation2 + $0x8] sm:$0xff] %vm32_vm0, %v247_v2 }
 0x305   :  { %336 = shalt.err (!%p333_p4)
}
 0x306   :  { %s337_s23 = scalar_lea.hbm %s456_s7, 256 }
 0x307   :  { %p338_p5 = scmp.ne.s32.totalorder %s456_s7, %s337_s23  ;;  %p341_p6 = scmp.lt.u32.totalorder %s337_s23, %s456_s7 }
 0x309   :  { %p343_p7 = pnand %p341_p6, %p338_p5 }
 0x30b   :  { %346 = shalt.err (!%p343_p7)
}
 0x30c   :  { %s352_s0 = smov 128   ;;  %s353_s28 = smov 8  }
 0x30d   :  { %261 = dma.vmem_to_hbm [thread:$0]  %s256_s4, 256, %s456_s7, [#allocation3], %s352_s0, %s352_s0, %s353_s28  }
 0x30e   :  { %347 = dma.done.wait [#allocation3], 256  }
 0x30f   :  { %348 = vsyncadd [#allocation3], 4294967040 }
 0x310   :  { %265 = vsyncpa [#allocation3], 1 }

// kernel: simplex_decoder_layer_conv.3
= control target key start
LH: loop header
LB: loop body
LE: loop exit
PB: predicated region body
PF: predicated region fallthrough
CT: control target
= control target key end

     0   :  { %18 = vsyncpa [#allocation3], 0  ;;  %s1970_s0 = inlined_call_operand.vmem [shape: f32[2,8,32], index: 0, kind: input, shape index: {}]   ;;  %s1971_s1 = inlined_call_operand.vmem [shape: f32[2,8,32], index: 1, kind: input, shape index: {}]   ;;  %s1972_s2 = inlined_call_operand.vmem [shape: f32[2,8,8], index: 2, kind: input, shape index: {}]   ;;  %s1973_s3 = inlined_call_operand.vmem [shape: f32[1,32], index: 3, kind: input, shape index: {}]   ;;  %s1974_s4 = inlined_call_operand.vmem [shape: f32[1,32], index: 4, kind: input, shape index: {}]   ;;  %s1975_s5 = inlined_call_operand.vmem [shape: bf16[32,32], index: 5, kind: input, shape index: {}]   ;;  %s1976_s6 = inlined_call_operand.vmem [shape: f32[1,32], index: 6, kind: input, shape index: {}]   ;;  %s1977_s7 = inlined_call_operand.vmem [shape: bf16[32,32], index: 7, kind: input, shape index: {}]   ;;  %s1978_s8 = inlined_call_operand.vmem [shape: f32[1,32], index: 8, kind: input, shape index: {}]   ;;  %s1979_s9 = inlined_call_operand.hbm [shape: bf16[32,32], index: 9, kind: input, shape index: {}]   ;;  %s1980_s10 = inlined_call_operand.vmem [shape: f32[1,32], index: 10, kind: input, shape index: {}]   ;;  %s1981_s11 = inlined_call_operand.hbm [shape: bf16[32,32], index: 11, kind: input, shape index: {}]   ;;  %s1982_s12 = inlined_call_operand.vmem [shape: f32[1,32], index: 12, kind: input, shape index: {}]   ;;  %s1983_s13 = inlined_call_operand.vmem [shape: f32[2,8,32], index: 13, kind: output, shape index: {}]  }
   0x1   :  { %19 = vsyncpa [#allocation5], 0  ;;  %s1747_s25 = smov 0  }
   0x2 LB: > { %s1753_s26 = sadd.s32 4294967295, %s1663_s25   ;;  %p1379_p0 = scmp.ge.s32.totalorder %s1663_s25, 1  ;;  %s1663_s25 = sphi %s1747_s25, %s25_s25  }
   0x3   : > { %p344_p1 = scmp.lt.s32.totalorder %s1663_s25, 3  ;;  %s1665_s27 = smov [#allocation2]  }
   0x4   : > { %s374_s28 = sshll.u32 %s1665_s27, 4  ;;  %p1984_p3 = scmp.eq.s32.totalorder %s1753_s26, 0  ;;  %s375_s28 = int_to_ptr.vmem [resolvable:$true] %s374_s28 }
   0x5   : > { %p1757_p2 = pnand %p1379_p0, %p344_p1  ;;  %s1666_s30 = smov [#allocation4]  }
   0x6   : > { %s390_s14 = sshll.u32 %s1666_s30, 4  ;;  %s1593_s18 = scalar_lea.hbm %s1979_s9, 256  ;;  %s1770_s14 = int_to_ptr.vmem [resolvable:$true] %s390_s14 }
   0x7   : > { %s1986_s29 = scalar_select %p1757_p2, 1, 0 }
   0x8   : > { %p1534_p4 = pneg %p1757_p2  ;;  %p1594_p6 = scmp.ne.s32.totalorder %s1979_s9, %s1593_s18 }
   0x9   : > { %p1600_p10 = scmp.lt.u32.totalorder %s1593_s18, %s1979_s9 }
   0xa   : > { %p1766_p5 = pnand %p1984_p3, %p1534_p4 }
   0xc   : > { %p1595_p7 = pneg %p1766_p5 }
   0xe   : > { %p1596_p8 = pnand %p1595_p7, %p1594_p6 }
  0x10   : > { %p1597_p9 = pneg %p1596_p8 }
  0x12   : > { %p1602_p11 = pnand %p1600_p10, %p1597_p9 }
  0x14   : > { %1605 = shalt.err (!%p1602_p11)
}
  0x15   : > { %s1606_s23 = scalar_lea.vmem %s375_s28, 256  ;;  %p1614_p1 = scmp.lt.s32.totalorder %s375_s28, %s375_s28 }
  0x16   : > { %p1607_p12 = scmp.ne.s32.totalorder %s375_s28, %s1606_s23  ;;  %p1615_p4 = scmp.lt.s32.totalorder %s1606_s23, %s1606_s23 }
  0x18   : > { %p1609_p13 = pnand %p1607_p12, %p1595_p7  ;;  %p1616_p3 = por %p1615_p4, %p1614_p1 }
  0x1a   : > { %p1610_p0 = pneg %p1609_p13 }
  0x1c   : > { %p1617_p2 = pnand %p1616_p3, %p1610_p0 }
  0x1e   : > { %1620 = shalt.err (!%p1617_p2)
}
  0x1f   : > { %s1667_s24 = smov 64   ;;  %s1668_s27 = smov 4  }
  0x20   : > { %1537 = dma.hbm_to_vmem [thread:$0]  (!%p1766_p5), %s1979_s9, 256, %s375_s28, [#allocation3], %s1667_s24, %s1667_s24, %s1668_s27  }
  0x21   : > { %s1621_s19 = scalar_lea.hbm %s1981_s11, 256 }
  0x22   : > { %p1622_p6 = scmp.ne.s32.totalorder %s1981_s11, %s1621_s19  ;;  %p1628_p8 = scmp.lt.u32.totalorder %s1621_s19, %s1981_s11 }
  0x24   : > { %p1624_p2 = pnand %p1622_p6, %p1595_p7 }
  0x26   : > { %p1625_p3 = pneg %p1624_p2 }
  0x28   : > { %p1630_p9 = pnand %p1628_p8, %p1625_p3 }
  0x2a   : > { %1633 = shalt.err (!%p1630_p9)
}
  0x2b   : > { %s1634_s28 = scalar_lea.vmem %s1770_s14, 256  ;;  %p1642_p13 = scmp.lt.s32.totalorder %s1770_s14, %s1770_s14 }
  0x2c   : > { %p1635_p10 = scmp.ne.s32.totalorder %s1770_s14, %s1634_s28  ;;  %p1643_p0 = scmp.lt.s32.totalorder %s1634_s28, %s1634_s28 }
  0x2e   : > { %p1637_p11 = pnand %p1635_p10, %p1595_p7  ;;  %p1644_p1 = por %p1643_p0, %p1642_p13 }
  0x30   : > { %p1638_p12 = pneg %p1637_p11 }
  0x32   : > { %p1645_p4 = pnand %p1644_p1, %p1638_p12 }
  0x34   : > { %1648 = shalt.err (!%p1645_p4)
}
  0x35   : > { %1540 = dma.hbm_to_vmem [thread:$0]  (!%p1766_p5), %s1981_s11, 256, %s1770_s14, [#allocation5], %s1667_s24, %s1667_s24, %s1668_s27  }
  0x36   : > { %p1988_p6 = scmp.ne.s32.totalorder %s1986_s29, 0 }
  0x37   : > { %p1989_p2 = scmp.eq.s32.totalorder (!%p1988_p6), %s1753_s26, 0 }
  0x38   : > { %430 = sbr.rel (%p1988_p6) target bundleno = 1673 (0x689), region = 72 }
  0x3f   : > { %1654 = dma.done.wait (%p1989_p2), [#allocation3], 256   ;;  %p1990_p7 = pmov %p1989_p2 }
  0x40   : > { %p1991_p3 = pmov %p1989_p2 }
  0x41   : > { %1656 = vsyncadd (%p1990_p7), [#allocation3], 4294967040 }
  0x42   : > { %1658 = dma.done.wait (%p1991_p3), [#allocation5], 256   ;;  %p1992_p8 = pmov %p1989_p2 }
  0x43   : > { %p484_p9 = scmp.lt.s32.totalorder %s1753_s26, 1  ;;  %vm504_vm0 = vcmask 261120   ;;  %v1565_v7 = vld [vmem:[%s1977_s7] sm:$0xff]   ;;  %v1669_v8 = vmov 0.0   ;;  %v1566_v10 = vld [vmem:[%s1977_s7 + $0x8] sm:$0xff]   ;;  %vm1670_vm1 = vmmov 0  }
  0x44   : > { %1660 = vsyncadd (%p1992_p8), [#allocation5], 4294967040  ;;  %1454 = vmatprep.subr.bf16.mxu1 %v1669_v8  ;;  %1446 = vmatprep.subr.bf16.mxu0 %v1669_v8  ;;  %v1567_v9 = vld [vmem:[%s1975_s5] sm:$0xff]   ;;  %v1568_v12 = vld [vmem:[%s1975_s5 + $0x8] sm:$0xff]   ;;  %vm745_vm4 = vcmask 64512   ;;  %s1671_s17 = smov 120  }
  0x45   : > { %s1994_s26 = smov (!%p484_p9, %s1753_s26), 1  ;;  %1455 = vmatpush3.bf16.msra.mxu1 %v1565_v7  ;;  %1458 = vmatprep.mubr.msk.bf16.mxu1 %vm1670_vm1, %v1669_v8  ;;  %v1390_v22 = vld [vmem:[%s1973_s3] ss:$0 sm:$0xff]  ;;  %s1672_s18 = smov 112   ;;  %v1570_v38 = vld [vmem:[#allocation2 + $0x8] sm:$0xff]   ;;  %vm808_vm5 = vcmask 1043456  }
  0x46   : > { %s1831_s14 = sshll.u32 %s1994_s26, 3  ;;  %1456 = vmatprep.subr.bf16.mxu1 %v1669_v8  ;;  %1447 = vmatpush3.bf16.msra.mxu0 %v1567_v9  ;;  %v1391_v25 = vld [vmem:[%s1974_s4] ss:$0 sm:$0xff]  ;;  %s1673_s21 = smov 104   ;;  %vm1205_vm7 = vcmask 130048   ;;  %vm1207_vm8 = vcmask 195584  }
  0x47   : > { %s487_s24 = scalar_lea.vmem %s1970_s0, %s1831_s14  ;;  %s491_s19 = scalar_lea.vmem %s1971_s1, %s1831_s14  ;;  %1448 = vmatprep.subr.bf16.mxu0 %v1669_v8  ;;  %1450 = vmatprep.mubr.msk.bf16.mxu0 %vm1670_vm1, %v1669_v8  ;;  %v1396_v29 = vld [vmem:[%s1978_s8] ss:$0 sm:$0xff] }
  0x48   : > { %v501_v0 = vld [vmem:[%s487_s24] sm:$0xff]  ;;  %s495_s16 = scalar_lea.vmem %s1972_s2, %s1831_s14  ;;  %s1674_s29 = smov 8  }
  0x49   : > { %v505_v1 = vsel %vm504_vm0, %v501_v0, 0.0  ;;  %v542_v11 = vld [vmem:[%s491_s19] sm:$0xff]  ;;  %1457 = vmatpush3.bf16.msra.mxu1 %v1566_v10  ;;  %s1675_s15 = smov 16   ;;  %s1676_s24 = smov 24  }
  0x4a   : > { %506 = vadd.xlane.f32.xlu0 %v505_v1  ;;  %v543_v13 = vpack.c.bf16 %v542_v11, %v542_v11  ;;  %1449 = vmatpush3.bf16.msra.mxu0 %v1568_v12  ;;  %v1569_v37 = vld [vmem:[#allocation2] sm:$0xff]   ;;  %s499_s19 = scalar_lea.vmem %s1983_s13, %s1831_s14 }
  0x4b   : > { %1470 = vmatprep.subr.bf16.mxu1 %v1669_v8  ;;  %1462 = vmatprep.subr.bf16.mxu0 %v1669_v8  ;;  %v1392_v39 = vld [vmem:[%s1976_s6] ss:$0 sm:$0xff] }
  0x4c   : > { %1459 = vmatmul.mubr.msk.bf16.vlgmr.msra.gmra.mrb[0].mxu1 %vm504_vm0, %v543_v13  ;;  %v1400_v48 = vld [vmem:[%s1980_s10] ss:$0 sm:$0xff] }
  0x4d   : > { %1472 = vmatprep.mubr.msk.bf16.mxu1 %vm1670_vm1, %v1669_v8  ;;  %v742_v63 = vld [vmem:[%s495_s16] sm:$0xff] }
  0x4e   : > { %vm743_vm6 = vcmp.lt.f32.partialorder %v742_v63, 0.5 }
  0x4f   : > { %v744_v1 = vsel %vm743_vm6, -1e+09, %v1669_v8 }
  0xd7   : > { %v507_v2 = vpop.xlane.xlu0 %506 }
  0xd8   : > { %v509_v3 = vmul.f32 0.03125, %v507_v2 }
  0xda   : > { %v510_v4 = vsub.f32 %v501_v0, %v509_v3 }
  0xdc   : > { %v511_v5 = vmul.f32 %v510_v4, %v510_v4  ;;  %v523_v23 = vmul.f32 %v1390_v22, %v510_v4 }
  0xde   : > { %v512_v6 = vsel %vm504_vm0, %v511_v5, 0.0 }
  0xdf   : > { %513 = vadd.xlane.f32.xlu0 %v512_v6 }
 0x11f   : > { %v670_v30 = vpop.f32.mrb[0].mxu1 }
 0x120   : > { %v671_v31 = vadd.f32 %v1396_v29, %v670_v30  ;;  %v1460_v32 = vpop.f32.mrb[1].mxu1 }
 0x121   : > { %v673_v33 = vpop.f32.mrb[2].mxu1 }
 0x122   : > { %v740_v34 = vpack.c.bf16 %v671_v31, %v671_v31  ;;  %v1461_v35 = vpop.f32.mrb[3].mxu1 }
 0x124   : > { %857 = vrot.lane.b32.xlu1 %v740_v34, %s1671_s17  ;;  %970 = vrot.lane.b32.xlu0 %v740_v34, %s1672_s18  ;;  %v750_v36 = vsel %vm745_vm4, %v740_v34, 0 }
 0x125   : > { %1471 = vmatpush3.bf16.xpose.msra.mxu1 %v750_v36 }
 0x126   : > { %1482 = vmatprep.subr.bf16.mxu1 %v1669_v8 }
 0x16c   : > { %v514_v14 = vpop.xlane.xlu0 %513 }
 0x16d   : > { %v516_v15 = vmul.f32 0.032258064, %v514_v14 }
 0x16f   : > { %1573 = vrsqrt.f32 %v516_v15  ;;  %vm526_vm2 = vcmp.eq.f32.partialorder %v516_v15, inf  ;;  %v529_v18 = vand.u32 2147483648, %v516_v15  ;;  %vm528_vm3 = vcmp.eq.f32.partialorder %v516_v15, 0.0 }
 0x179   : > { %v1574_v16 = vpop.eup %1573 }
 0x17a   : > { %v525_v17 = vmul.f32 %v1574_v16, %v516_v15 }
 0x17c   : > { %v527_v19 = vsel %vm526_vm2, %v516_v15, %v525_v17 }
 0x17d   : > { %v530_v20 = vsel %vm528_vm3, %v529_v18, %v527_v19 }
 0x17e   : > { %v531_v21 = vadd.f32 1e-06, %v530_v20 }
 0x180   : > { %1575 = vrcp.f32 %v531_v21 }
 0x18a   : > { %v1576_v24 = vpop.eup %1575 }
 0x18b   : > { %v533_v26 = vmul.f32 %v1576_v24, %v523_v23 }
 0x18d   : > { %v540_v27 = vadd.f32 %v1391_v25, %v533_v26 }
 0x18f   : > { %v541_v28 = vpack.c.bf16 %v540_v27, %v540_v27 }
 0x191   : > { %1451 = vmatmul.mubr.msk.bf16.vlgmr.msra.gmra.mrb[0].mxu0 %vm504_vm0, %v541_v28 }
 0x192   : > { %1466 = vmatprep.mubr.msk.bf16.mxu0 %vm1670_vm1, %v1669_v8  ;;  %1463 = vmatpush3.bf16.msra.mxu0 %v1569_v37 }
 0x193   : > { %1464 = vmatprep.subr.bf16.mxu0 %v1669_v8 }
 0x196   : > { %1465 = vmatpush3.bf16.msra.mxu0 %v1570_v38  ;;  %v858_v41 = vpop.permute.xlu1 %857  ;;  %v971_v56 = vpop.permute.xlu0 %970 }
 0x197   : > { %1476 = vmatprep.subr.bf16.mxu0 %v1669_v8  ;;  %v863_v47 = vsel %vm745_vm4, %v858_v41, 0  ;;  %v976_v58 = vsel %vm745_vm4, %v971_v56, 0 }
 0x199   : > { %1467 = vmatmul.mubr.msk.bf16.vlgmr.msra.gmra.mrb[4].mxu0 %vm504_vm0, %v543_v13 }
 0x19a   : > { %1478 = vmatprep.mubr.msk.bf16.mxu0 %vm1670_vm1, %v1669_v8 }
 0x264   : > { %v604_v40 = vpop.f32.mrb[0].mxu0 }
 0x265   : > { %v605_v42 = vadd.f32 %v1392_v39, %v604_v40  ;;  %v1452_v43 = vpop.f32.mrb[1].mxu0 }
 0x266   : > { %v607_v44 = vpop.f32.mrb[2].mxu0 }
 0x267   : > { %v739_v45 = vpack.c.bf16 %v605_v42, %v605_v42  ;;  %v1453_v46 = vpop.f32.mrb[3].mxu0 }
 0x269   : > { %854 = vrot.lane.b32.xlu1 %v739_v45, %s1671_s17  ;;  %1473 = vmatmul.mubr.msk.bf16.vlgmr.msra.gmra.mrb[4].mxu1 %vm745_vm4, %v739_v45 }
 0x26a   : > { %1483 = vmatpush3.bf16.xpose.msra.mxu1 %v863_v47  ;;  %1484 = vmatprep.mubr.msk.bf16.mxu1 %vm1670_vm1, %v1669_v8 }
 0x26b   : > { %1494 = vmatprep.subr.bf16.mxu1 %v1669_v8 }
 0x26c   : > { %v733_v49 = vpop.f32.mrb[4].mxu0 }
 0x26d   : > { %968 = vrot.lane.b32.xlu1 %v739_v45, %s1672_s18  ;;  %v734_v50 = vadd.f32 %v1400_v48, %v733_v49  ;;  %v1468_v51 = vpop.f32.mrb[5].mxu0 }
 0x26e   : > { %v736_v52 = vpop.f32.mrb[6].mxu0 }
 0x26f   : > { %v1904_v53 = vpack.c.bf16 %v734_v50, %v734_v50  ;;  %v1469_v54 = vpop.f32.mrb[7].mxu0 }
 0x271   : > { %1082 = vrot.lane.b32.xlu1 %v740_v34, %s1673_s21  ;;  %v810_v55 = vsel %vm808_vm5, %v1904_v53, 0 }
 0x272   : > { %1477 = vmatpush3.bf16.msra.mxu0 %v810_v55 }
 0x273   : > { %1488 = vmatprep.subr.bf16.mxu0 %v1669_v8 }
 0x275   : > { %1080 = vrot.lane.b32.xlu1 %v739_v45, %s1673_s21 }
 0x2db   : > { %v855_v57 = vpop.permute.xlu1 %854 }
 0x2dc   : > { %1485 = vmatmul.mubr.msk.bf16.vlgmr.msra.gmra.mrb[8].mxu1 %vm745_vm4, %v855_v57 }
 0x2dd   : > { %1495 = vmatpush3.bf16.xpose.msra.mxu1 %v976_v58  ;;  %1496 = vmatprep.mubr.msk.bf16.mxu1 %vm1670_vm1, %v1669_v8 }
 0x2de   : > { %1506 = vmatprep.subr.bf16.mxu1 %v1669_v8 }
 0x2df   : > { %v969_v59 = vpop.permute.xlu1 %968 }
 0x2e3   : > { %v1083_v60 = vpop.permute.xlu1 %1082 }
 0x2e4   : > { %v1088_v61 = vsel %vm745_vm4, %v1083_v60, 0  ;;  %1497 = vmatmul.mubr.msk.bf16.vlgmr.msra.gmra.mrb[12].mxu1 %vm745_vm4, %v969_v59 }
 0x2e5   : > { %1507 = vmatpush3.bf16.xpose.msra.mxu1 %v1088_v61  ;;  %1508 = vmatprep.mubr.msk.bf16.mxu1 %vm1670_vm1, %v1669_v8 }
 0x2e6   : > { %1518 = vmatprep.subr.bf16.mxu1 %v1669_v8 }
 0x2e7   : > { %v1081_v62 = vpop.permute.xlu1 %1080 }
 0x2ec   : > { %1509 = vmatmul.mubr.msk.bf16.vlgmr.msra.gmra.mrb[16].mxu1 %vm745_vm4, %v1081_v62 }
 0x2ed   : > { %1522 = vmatprep.mubr.msk.bf16.mxu1 %vm1670_vm1, %v1669_v8 }
 0x33c   : > { %v786_v0 = vpop.f32.mrb[4].mxu1 }
 0x33d   : > { %v792_v2 = vmul.f32 0.35355338, %v786_v0  ;;  %v1474_v3 = vpop.f32.mrb[5].mxu1 }
 0x33e   : > { %v789_v4 = vpop.f32.mrb[6].mxu1 }
 0x33f   : > { %v1475_v5 = vpop.f32.mrb[7].mxu1  ;;  %v793_v6 = vadd.f32 %v792_v2, %v744_v1  ;;  %v1571_v2 = vld [vmem:[#allocation4] sm:$0xff]  }
 0x340   : > { %1519 = vmatpush3.bf16.msra.mxu1 %v1571_v2 }
 0x341   : > { %v794_v7 = vsel %vm745_vm4, %v793_v6, -inf  ;;  %1520 = vmatprep.subr.bf16.mxu1 %v1669_v8 }
 0x342   : > { %795 = vmax.xlane.f32.xlu1 %v794_v7 }
 0x353   : > { %1031 = vrot.lane.b32.xlu1 %v1904_v53, %s1672_s18 }
 0x3af   : > { %v899_v9 = vpop.f32.mrb[8].mxu1 }
 0x3b0   : > { %v905_v10 = vmul.f32 0.35355338, %v899_v9  ;;  %v1486_v11 = vpop.f32.mrb[9].mxu1 }
 0x3b1   : > { %v902_v12 = vpop.f32.mrb[10].mxu1  ;;  %v1572_v11 = vld [vmem:[#allocation4 + $0x8] sm:$0xff]  }
 0x3b2   : > { %v1487_v13 = vpop.f32.mrb[11].mxu1  ;;  %v906_v14 = vadd.f32 %v905_v10, %v744_v1  ;;  %1521 = vmatpush3.bf16.msra.mxu1 %v1572_v11 }
 0x3b4   : > { %v907_v15 = vsel %vm745_vm4, %v906_v14, -inf }
 0x3b5   : > { %908 = vmax.xlane.f32.xlu0 %v907_v15 }
 0x3b7   : > { %v1012_v16 = vpop.f32.mrb[12].mxu1 }
 0x3b8   : > { %v1018_v17 = vmul.f32 0.35355338, %v1012_v16  ;;  %v1498_v18 = vpop.f32.mrb[13].mxu1 }
 0x3b9   : > { %v1015_v19 = vpop.f32.mrb[14].mxu1 }
 0x3ba   : > { %v1499_v20 = vpop.f32.mrb[15].mxu1  ;;  %v1019_v21 = vadd.f32 %v1018_v17, %v744_v1 }
 0x3bc   : > { %v1020_v22 = vsel %vm745_vm4, %v1019_v21, -inf }
 0x3bd   : > { %1021 = vmax.xlane.f32.xlu1 %v1020_v22 }
 0x3bf   : > { %v1124_v23 = vpop.f32.mrb[16].mxu1 }
 0x3c0   : > { %v1130_v24 = vmul.f32 0.35355338, %v1124_v23  ;;  %v1510_v25 = vpop.f32.mrb[17].mxu1 }
 0x3c1   : > { %v1127_v26 = vpop.f32.mrb[18].mxu1 }
 0x3c2   : > { %v1511_v27 = vpop.f32.mrb[19].mxu1  ;;  %v1131_v28 = vadd.f32 %v1130_v24, %v744_v1 }
 0x3c4   : > { %v1132_v29 = vsel %vm745_vm4, %v1131_v28, -inf }
 0x3c5   : > { %1133 = vmax.xlane.f32.xlu1 %v1132_v29 }
 0x3cb   : > { %919 = vrot.lane.b32.xlu0 %v1904_v53, %s1671_s17 }
 0x3cf   : > { %v796_v30 = vpop.xlane.xlu1 %795 }
 0x3d0   : > { %v797_v31 = vsub.f32 %v793_v6, %v796_v30 }
 0x3d2   : > { %v798_v32 = vmul.f32 1.442695, %v797_v31 }
 0x3d3   : > { %v1032_v38 = vpop.permute.xlu1 %1031 }
 0x3d4   : > { %1577 = vpow2.f32 %v798_v32  ;;  %v1037_v49 = vsel %vm808_vm5, %v1032_v38, 0 }
 0x3d6   : > { %1143 = vrot.lane.b32.xlu1 %v1904_v53, %s1673_s21 }
 0x3de   : > { %v1578_v33 = vpop.eup %1577 }
 0x3df   : > { %v804_v34 = vpack.c.bf16 %v1578_v33, %v1578_v33  ;;  %v800_v59 = vsel %vm745_vm4, %v1578_v33, 0.0  ;;  %v1412_v33 = vld [vmem:[%s1982_s12] ss:$0 sm:$0xff] }
 0x3e1   : > { %1479 = vmatmul.mubr.msk.bf16.vlgmr.msra.gmra.mrb[8].mxu0 %vm745_vm4, %v804_v34 }
 0x3e2   : > { %1490 = vmatprep.mubr.msk.bf16.mxu0 %vm1670_vm1, %v1669_v8 }
 0x442   : > { %v909_v35 = vpop.xlane.xlu0 %908 }
 0x443   : > { %v910_v36 = vsub.f32 %v906_v14, %v909_v35 }
 0x445   : > { %v911_v37 = vmul.f32 1.442695, %v910_v36 }
 0x446   : > { %v920_v39 = vpop.permute.xlu0 %919 }
 0x447   : > { %1579 = vpow2.f32 %v911_v37  ;;  %v925_v40 = vsel %vm808_vm5, %v920_v39, 0 }
 0x448   : > { %1489 = vmatpush3.bf16.msra.mxu0 %v925_v40 }
 0x449   : > { %1500 = vmatprep.subr.bf16.mxu0 %v1669_v8 }
 0x44a   : > { %v1022_v41 = vpop.xlane.xlu1 %1021 }
 0x44b   : > { %v1023_v42 = vsub.f32 %v1019_v21, %v1022_v41 }
 0x44d   : > { %v1024_v43 = vmul.f32 1.442695, %v1023_v42 }
 0x44f   : > { %1581 = vpow2.f32 %v1024_v43 }
 0x451   : > { %v1580_v44 = vpop.eup %1579 }
 0x452   : > { %v1134_v45 = vpop.xlane.xlu1 %1133  ;;  %v913_v46 = vsel %vm745_vm4, %v1580_v44, 0.0  ;;  %v917_v47 = vpack.c.bf16 %v1580_v44, %v1580_v44 }
 0x453   : > { %v1135_v48 = vsub.f32 %v1131_v28, %v1134_v45  ;;  %914 = vadd.xlane.f32.xlu0 %v913_v46 }
 0x454   : > { %1491 = vmatmul.mubr.msk.bf16.vlgmr.msra.gmra.mrb[12].mxu0 %vm745_vm4, %v917_v47 }
 0x455   : > { %v1136_v50 = vmul.f32 1.442695, %v1135_v48  ;;  %1501 = vmatpush3.bf16.msra.mxu0 %v1037_v49  ;;  %1502 = vmatprep.mubr.msk.bf16.mxu0 %vm1670_vm1, %v1669_v8 }
 0x456   : > { %1512 = vmatprep.subr.bf16.mxu0 %v1669_v8  ;;  %v1144_v52 = vpop.permute.xlu1 %1143 }
 0x457   : > { %1583 = vpow2.f32 %v1136_v50  ;;  %v1149_v55 = vsel %vm808_vm5, %v1144_v52, 0 }
 0x459   : > { %v1582_v51 = vpop.eup %1581 }
 0x45a   : > { %v1026_v53 = vsel %vm745_vm4, %v1582_v51, 0.0  ;;  %v1030_v54 = vpack.c.bf16 %v1582_v51, %v1582_v51 }
 0x45b   : > { %1027 = vadd.xlane.f32.xlu1 %v1026_v53 }
 0x45c   : > { %1503 = vmatmul.mubr.msk.bf16.vlgmr.msra.gmra.mrb[16].mxu0 %vm745_vm4, %v1030_v54 }
 0x45d   : > { %1513 = vmatpush3.bf16.msra.mxu0 %v1149_v55  ;;  %1514 = vmatprep.mubr.msk.bf16.mxu0 %vm1670_vm1, %v1669_v8 }
 0x461   : > { %v1584_v56 = vpop.eup %1583 }
 0x462   : > { %v1138_v57 = vsel %vm745_vm4, %v1584_v56, 0.0  ;;  %v1142_v58 = vpack.c.bf16 %v1584_v56, %v1584_v56 }
 0x463   : > { %1139 = vadd.xlane.f32.xlu0 %v1138_v57 }
 0x464   : > { %1515 = vmatmul.mubr.msk.bf16.vlgmr.msra.gmra.mrb[20].mxu0 %vm745_vm4, %v1142_v58 }
 0x467   : > { %801 = vadd.xlane.f32.xlu0 %v800_v59 }
 0x4b4   : > { %v846_v60 = vpop.f32.mrb[8].mxu0 }
 0x4b5   : > { %v1480_v61 = vpop.f32.mrb[9].mxu0 }
 0x4b6   : > { %v849_v62 = vpop.f32.mrb[10].mxu0 }
 0x4b7   : > { %v1481_v63 = vpop.f32.mrb[11].mxu0 }
 0x4e0   : > { %v915_v0 = vpop.xlane.xlu0 %914 }
 0x4e1   : > { %1585 = vrcp.f32 %v915_v0 }
 0x4e8   : > { %v1028_v1 = vpop.xlane.xlu1 %1027 }
 0x4e9   : > { %1587 = vrcp.f32 %v1028_v1 }
 0x4eb   : > { %v1586_v3 = vpop.eup %1585 }
 0x4f0   : > { %v1140_v9 = vpop.xlane.xlu0 %1139 }
 0x4f1   : > { %1589 = vrcp.f32 %v1140_v9 }
 0x4f3   : > { %v1588_v12 = vpop.eup %1587 }
 0x4f4   : > { %v802_v23 = vpop.xlane.xlu0 %801 }
 0x4f5   : > { %1591 = vrcp.f32 %v802_v23 }
 0x4fb   : > { %v1590_v18 = vpop.eup %1589 }
 0x4ff   : > { %v1592_v24 = vpop.eup %1591 }
 0x500   : > { %v852_v26 = vmul.f32 %v1592_v24, %v846_v60 }
 0x527   : > { %v961_v4 = vpop.f32.mrb[12].mxu0 }
 0x528   : > { %v967_v5 = vmul.f32 %v1586_v3, %v961_v4  ;;  %v1492_v6 = vpop.f32.mrb[13].mxu0 }
 0x529   : > { %v964_v7 = vpop.f32.mrb[14].mxu0 }
 0x52a   : > { %v1493_v10 = vpop.f32.mrb[15].mxu0  ;;  %1193 = vrot.lane.b32.xlu1 %v967_v5, %s1674_s29 }
 0x52f   : > { %v1073_v13 = vpop.f32.mrb[16].mxu0 }
 0x530   : > { %v1079_v14 = vmul.f32 %v1588_v12, %v1073_v13  ;;  %v1504_v15 = vpop.f32.mrb[17].mxu0 }
 0x531   : > { %v1076_v16 = vpop.f32.mrb[18].mxu0 }
 0x532   : > { %1197 = vrot.lane.b32.xlu0 %v1079_v14, %s1675_s15  ;;  %v1505_v17 = vpop.f32.mrb[19].mxu0 }
 0x537   : > { %v1185_v19 = vpop.f32.mrb[20].mxu0 }
 0x538   : > { %v1191_v20 = vmul.f32 %v1590_v18, %v1185_v19  ;;  %v1516_v8 = vpop.f32.mrb[21].mxu0 }
 0x539   : > { %v1188_v21 = vpop.f32.mrb[22].mxu0 }
 0x53a   : > { %v1517_v22 = vpop.f32.mrb[23].mxu0  ;;  %1201 = vrot.lane.b32.xlu1 %v1191_v20, %s1676_s24 }
 0x59c   : > { %v1194_v25 = vpop.permute.xlu1 %1193 }
 0x59d   : > { %v1204_v28 = vsel %vm745_vm4, %v852_v26, %v1194_v25 }
 0x5a4   : > { %v1198_v27 = vpop.permute.xlu0 %1197 }
 0x5a5   : > { %v1206_v29 = vsel %vm1205_vm7, %v1204_v28, %v1198_v27 }
 0x5ac   : > { %v1202_v30 = vpop.permute.xlu1 %1201 }
 0x5ad   : > { %v1208_v31 = vsel %vm1207_vm8, %v1206_v29, %v1202_v30 }
 0x5ae   : > { %v1209_v32 = vpack.c.bf16 %v1208_v31, %v1208_v31 }
 0x5b0   : > { %1523 = vmatmul.mubr.msk.bf16.vlgmr.msra.gmra.mrb[20].mxu1 %vm504_vm0, %v1209_v32 }
 0x683   : > { %v1270_v34 = vpop.f32.mrb[20].mxu1 }
 0x684   : > { %v1271_v35 = vadd.f32 %v1412_v33, %v1270_v34  ;;  %v1524_v36 = vpop.f32.mrb[21].mxu1 }
 0x685   : > { %v1273_v37 = vpop.f32.mrb[22].mxu1 }
 0x686   : > { %v1276_v38 = vadd.f32 %v1271_v35, %v1271_v35  ;;  %v1525_v39 = vpop.f32.mrb[23].mxu1 }
 0x688   : > { %1277 = vst.msk [vmem:[%s499_s19] sm:$0xff] %vm504_vm0, %v1276_v38 }
 0x689 PF: > { %s25_s25 = sadd.s32 1, %s1663_s25  }
 0x68a   : > { %p22_p5 = scmp.ge.s32.totalorder %s25_s25, 4  }
 0x68c   :  { %24 = sbr.rel (!%p22_p5) target bundleno = 2 (0x2), region = 117 }
 0x693   :  { %1297 = vsyncpa [#allocation3], 1 }
 0x694   :  { %1299 = vsyncpa [#allocation3 + $0x1], 1 }
 0x695   :  { %1300 = vsyncpa [#allocation5], 1 }

// kernel: simplex_decoder_layer_conv.4
= control target key start
LH: loop header
LB: loop body
LE: loop exit
PB: predicated region body
PF: predicated region fallthrough
CT: control target
= control target key end

     0   :  { %s1902_s25 = smov 0   ;;  %s1904_s26 = smov 0   ;;  %s2144_s0 = inlined_call_operand.vmem [shape: f32[2,8,32], index: 0, kind: input, shape index: {}]   ;;  %s2145_s1 = inlined_call_operand.vmem [shape: f32[2,2,8,32], index: 1, kind: input, shape index: {}]   ;;  %s2146_s2 = inlined_call_operand.vmem [shape: f32[2,8,8], index: 2, kind: input, shape index: {}]   ;;  %s2147_s3 = inlined_call_operand.vmem [shape: f32[1,32], index: 3, kind: input, shape index: {}]   ;;  %s2148_s4 = inlined_call_operand.vmem [shape: f32[1,32], index: 4, kind: input, shape index: {}]   ;;  %s2149_s5 = inlined_call_operand.vmem [shape: bf16[32,32], index: 5, kind: input, shape index: {}]   ;;  %s2150_s6 = inlined_call_operand.vmem [shape: f32[1,32], index: 6, kind: input, shape index: {}]   ;;  %s2151_s7 = inlined_call_operand.vmem [shape: bf16[32,32], index: 7, kind: input, shape index: {}]   ;;  %s2152_s8 = inlined_call_operand.vmem [shape: f32[1,32], index: 8, kind: input, shape index: {}]   ;;  %s2153_s9 = inlined_call_operand.vmem [shape: bf16[32,32], index: 9, kind: input, shape index: {}]   ;;  %s2154_s10 = inlined_call_operand.vmem [shape: f32[1,32], index: 10, kind: input, shape index: {}]   ;;  %s2155_s11 = inlined_call_operand.vmem [shape: bf16[32,32], index: 11, kind: input, shape index: {}]   ;;  %s2156_s12 = inlined_call_operand.vmem [shape: f32[1,32], index: 12, kind: input, shape index: {}]   ;;  %s2157_s13 = inlined_call_operand.vmem [shape: f32[2,8,32], index: 13, kind: output, shape index: {}]  }
   0x1   :  { %2162 = sst [smem:[#allocation12_spill]] %s2155_s11  ;;  %s1906_s27 = smov 0  }
   0x2   :  { %2163 = sst [smem:[#allocation13_spill]] %s2156_s12  ;;  %s1908_s28 = smov 0  }
   0x3   :  { %s1910_s29 = smov 0  }
   0x4 LB: > { %2164 = sst [smem:[#allocation7_spill]] %s1807_s27  ;;  %s32_s30 = sadd.s32 1, %s1807_s27  ;;  %s1815_s29 = sphi %s1910_s29, %s23_s29   ;;  %s1811_s28 = sphi %s1908_s28, %s2175_s28   ;;  %s1807_s27 = sphi %s1906_s27, %s2174_s27   ;;  %s1803_s26 = sphi %s1904_s26, %s2173_s26   ;;  %s1799_s25 = sphi %s1902_s25, %s2172_s25  }
   0x5   : > { %2165 = sst [smem:[#allocation8_spill]] %s1811_s28  ;;  %s35_s14 = sadd.s32 1, %s1811_s28 }
   0x6   : > { %2166 = sst [smem:[#allocation9_spill]] %s1815_s29  ;;  %p33_p0 = scmp.ge.s32.totalorder %s32_s30, 2 }
   0x7   : > { %p1536_p1 = scmp.ge.s32.totalorder %s1815_s29, 1  ;;  %p422_p2 = scmp.lt.s32.totalorder %s1815_s29, 5 }
   0x8   : > { %s2177_s30 = smov (%p33_p0, %s32_s30), 0  ;;  %s2179_s14 = smov (!%p33_p0, %s35_s14), %s1811_s28 }
   0x9   : > { %2167 = sst [smem:[#allocation10_spill]] %s2177_s30  ;;  %p423_p3 = pnand %p1536_p1, %p422_p2 }
   0xa   : > { %p37_p4 = scmp.ge.s32.totalorder %s2179_s14, 2  ;;  %p476_p5 = scmp.lt.s32.totalorder (!%p423_p3), %s1803_s26, 1 }
   0xb   : > { %426 = sbr.rel (%p423_p3) target bundleno = 2067 (0x813), region = 72  ;;  %p482_p6 = scmp.lt.s32.totalorder (!%p423_p3), %s1799_s25, 1 }
   0xc   : > { %s2181_s14 = smov (%p37_p4, %s2179_s14), 0  ;;  %p1542_p7 = scmp.ne.s32.totalorder (!%p423_p3), %s1799_s25, 0 }
   0xd   : > { %2168 = sst [smem:[#allocation11_spill]] %s2181_s14 }
  0x12   : > { %s2183_s26 = smov (!%p476_p5, %s1803_s26), 1  ;;  %500 = sbr.rel (%p1542_p7) target bundleno = 568 (0x238), region = 76 }
  0x13   : > { %s483_s15 = scalar_select %p482_p6, %s1799_s25, 1 }
  0x14   : > { %s1936_s16 = sshll.u32 %s2183_s26, 3  ;;  %s1538_s17 = sshll.u32 %s2183_s26, 1  ;;  %vm504_vm0 = vcmask (!%p1542_p7), 261120   ;;  %vm612_vm1 = vcmask (!%p1542_p7), 7168   ;;  %vm621_vm2 = vcmask (!%p1542_p7), 64512   ;;  %v1736_v7 = vld [vmem:[%s2149_s5] sm:$0xff] (!%p1542_p7)  }
  0x15   : > { %s479_s20 = scalar_lea.vmem %s2144_s0, %s1936_s16  ;;  %s485_s21 = sadd.s32 %s1538_s17, %s483_s15  ;;  %v1817_v8 = vmov (!%p1542_p7), 0.0   ;;  %v1818_v9 = vmov (!%p1542_p7), -1e+30   ;;  %v1737_v10 = vld [vmem:[%s2149_s5 + $0x8] sm:$0xff] (!%p1542_p7)   ;;  %vm1819_vm3 = vmmov (!%p1542_p7), 0   ;;  %vm610_vm6 = vcmask (!%p1542_p7), 257024  }
  0x16   : > { %s1539_s22 = sshll.u32 %s485_s21, 3  ;;  %s491_s14 = scalar_lea.vmem %s2146_s2, %s1936_s16  ;;  %v501_v0 = vld [vmem:[%s479_s20] sm:$0xff] (!%p1542_p7)  ;;  %1601 = vmatprep.subr.bf16.mxu0 (!%p1542_p7), %v1817_v8  ;;  %613 = vst.msk [vmem:[#allocation4] sm:$0xff] (!%p1542_p7), %vm612_vm1, %v1818_v9  ;;  %614 = vst.msk [vmem:[#allocation4 + $0x8] sm:$0xff] (!%p1542_p7), %vm612_vm1, %v1818_v9  ;;  %1605 = vmatprep.mubr.msk.bf16.mxu0 (!%p1542_p7), %vm1819_vm3, %v1817_v8 }
  0x17   : > { %s1949_s27 = scalar_lea.vmem %s2145_s1, %s1539_s22  ;;  %s495_s11 = scalar_lea.vmem %s2157_s13, %s1936_s16  ;;  %v505_v1 = vsel (!%p1542_p7), %vm504_vm0, %v501_v0, 0.0  ;;  %615 = vst.msk [vmem:[#allocation4 + $0x10] sm:$0xff] (!%p1542_p7), %vm612_vm1, %v1818_v9  ;;  %616 = vst.msk [vmem:[#allocation4 + $0x18] sm:$0xff] (!%p1542_p7), %vm612_vm1, %v1818_v9  ;;  %1602 = vmatpush3.bf16.msra.mxu0 (!%p1542_p7), %v1736_v7  ;;  %v1543_v19 = vld [vmem:[%s2147_s3] ss:$0 sm:$0xff] (!%p1542_p7) }
  0x18   : > { %506 = vadd.xlane.f32.xlu0 (!%p1542_p7), %v505_v1  ;;  %617 = vst.msk [vmem:[#allocation5] sm:$0xff] (!%p1542_p7), %vm612_vm1, %v1817_v8  ;;  %618 = vst.msk [vmem:[#allocation5 + $0x8] sm:$0xff] (!%p1542_p7), %vm612_vm1, %v1817_v8  ;;  %1603 = vmatprep.subr.bf16.mxu0 (!%p1542_p7), %v1817_v8  ;;  %v1544_v22 = vld [vmem:[%s2148_s4] ss:$0 sm:$0xff] (!%p1542_p7) }
  0x19   : > { %619 = vst.msk [vmem:[#allocation5 + $0x10] sm:$0xff] %vm612_vm1, %v1817_v8  ;;  %620 = vst.msk [vmem:[#allocation5 + $0x18] sm:$0xff] %vm612_vm1, %v1817_v8  ;;  %v1545_v26 = vld [vmem:[%s2150_s6] ss:$0 sm:$0xff] }
  0x1a   : > { %622 = vst.msk [vmem:[#allocation6] sm:$0xff] %vm621_vm2, %v1817_v8  ;;  %623 = vst.msk [vmem:[#allocation6 + $0x8] sm:$0xff] %vm621_vm2, %v1817_v8 }
  0x1b   : > { %624 = vst.msk [vmem:[#allocation6 + $0x10] sm:$0xff] %vm621_vm2, %v1817_v8  ;;  %625 = vst.msk [vmem:[#allocation6 + $0x18] sm:$0xff] %vm621_vm2, %v1817_v8  ;;  %1604 = vmatpush3.bf16.msra.mxu0 %v1737_v10 }
  0xa5   : > { %v507_v2 = vpop.xlane.xlu0 %506 }
  0xa6   : > { %v509_v3 = vmul.f32 0.03125, %v507_v2 }
  0xa8   : > { %v510_v4 = vsub.f32 %v501_v0, %v509_v3 }
  0xaa   : > { %v511_v5 = vmul.f32 %v510_v4, %v510_v4  ;;  %v523_v20 = vmul.f32 %v1543_v19, %v510_v4 }
  0xac   : > { %v512_v6 = vsel %vm504_vm0, %v511_v5, 0.0 }
  0xad   : > { %513 = vadd.xlane.f32.xlu0 %v512_v6 }
 0x13a   : > { %v514_v11 = vpop.xlane.xlu0 %513 }
 0x13b   : > { %v516_v12 = vmul.f32 0.032258064, %v514_v11 }
 0x13d   : > { %1738 = vrsqrt.f32 %v516_v12  ;;  %vm526_vm4 = vcmp.eq.f32.partialorder %v516_v12, inf  ;;  %v529_v15 = vand.u32 2147483648, %v516_v12  ;;  %vm528_vm5 = vcmp.eq.f32.partialorder %v516_v12, 0.0 }
 0x147   : > { %v1739_v13 = vpop.eup %1738 }
 0x148   : > { %v525_v14 = vmul.f32 %v1739_v13, %v516_v12 }
 0x14a   : > { %v527_v16 = vsel %vm526_vm4, %v516_v12, %v525_v14 }
 0x14b   : > { %v530_v17 = vsel %vm528_vm5, %v529_v15, %v527_v16 }
 0x14c   : > { %v531_v18 = vadd.f32 1e-06, %v530_v17 }
 0x14e   : > { %1740 = vrcp.f32 %v531_v18 }
 0x158   : > { %v1741_v21 = vpop.eup %1740 }
 0x159   : > { %v533_v23 = vmul.f32 %v1741_v21, %v523_v20 }
 0x15b   : > { %v540_v24 = vadd.f32 %v1544_v22, %v533_v23 }
 0x15d   : > { %541 = vst.msk [vmem:[#allocation2] sm:$0xff] %vm504_vm0, %v540_v24  ;;  %v542_v25 = vpack.c.bf16 %v540_v24, %v540_v24 }
 0x15f   : > { %1606 = vmatmul.mubr.msk.bf16.vlgmr.msra.gmra.mrb[0].mxu0 %vm504_vm0, %v542_v25 }
 0x232   : > { %v603_v27 = vpop.f32.mrb[0].mxu0 }
 0x233   : > { %v604_v28 = vadd.f32 %v1545_v26, %v603_v27  ;;  %v1607_v29 = vpop.f32.mrb[1].mxu0 }
 0x234   : > { %v606_v30 = vpop.f32.mrb[2].mxu0 }
 0x235   : > { %v609_v31 = vpack.c.bf16 %v604_v28, %v604_v28  ;;  %v1608_v32 = vpop.f32.mrb[3].mxu0 }
 0x237   : > { %611 = vst.msk [vmem:[#allocation3] sm:$0xf] %vm610_vm6, %v609_v31 }
 0x238 PF: > { %v1744_v33 = vld [vmem:[%s2151_s7] sm:$0xff]   ;;  %v1820_v34 = vmov 0.0   ;;  %v1745_v35 = vld [vmem:[%s2151_s7 + $0x8] sm:$0xff]   ;;  %vm1821_vm7 = vmmov 0   ;;  %vm651_vm8 = vcmask 261120   ;;  %vm764_vm9 = vcmask 64512  }
 0x239   : > { %1609 = vmatprep.subr.bf16.mxu0 %v1820_v34  ;;  %1617 = vmatprep.subr.bf16.mxu1 %v1820_v34  ;;  %v626_v36 = vld [vmem:[%s1949_s27] sm:$0xff]  ;;  %s1822_s27 = smov 112   ;;  %s1823_s28 = smov 120   ;;  %v1748_v49 = vld [vmem:[%s2153_s9 + $0x8] sm:$0xff]   ;;  %v1825_v4 = vmov 0   ;;  %vm835_vm11 = vcmask 7168  }
 0x23a   : > { %1610 = vmatpush3.bf16.msra.mxu0 %v1744_v33  ;;  %1613 = vmatprep.mubr.msk.bf16.mxu0 %vm1821_vm7, %v1820_v34  ;;  %v627_v37 = vpack.c.bf16 %v626_v36, %v626_v36  ;;  %v1549_v38 = vld [vmem:[%s2152_s8] ss:$0 sm:$0xff]  ;;  %s1824_s29 = smov 104   ;;  %vm848_vm12 = vcmask 1043456   ;;  %p1566_p8 = scmp.ne.s32.totalorder %s1799_s25, 1 }
 0x23b   : > { %1611 = vmatprep.subr.bf16.mxu0 %v1820_v34  ;;  %1621 = vmatprep.mubr.msk.bf16.mxu1 %vm1821_vm7, %v1820_v34  ;;  %v1747_v48 = vld [vmem:[%s2153_s9] sm:$0xff]   ;;  %s2169_s23 = sld [smem:[#allocation12_spill]] (!%p1566_p8)  ;;  %vm1828_vm13 = vmmov (!%p1566_p8), 0   ;;  %s1829_s12 = smov (!%p1566_p8), 8   ;;  %vm1364_vm14 = vcmask (!%p1566_p8), 130048   ;;  %vm1366_vm15 = vcmask (!%p1566_p8), 195584  }
 0x23c   : > { %1618 = vmatpush3.bf16.msra.mxu1 %v1747_v48  ;;  %v761_v59 = vld [vmem:[%s491_s14] sm:$0xff]  ;;  %1742 = vset.pattern.permute.xlu1 %v1825_v4  ;;  %v813_v26 = vld [vmem:[#allocation4] sm:$0xff]  ;;  %s2170_s15 = sld [smem:[#allocation13_spill]] (!%p1566_p8) }
 0x23d   : > { %1619 = vmatprep.subr.bf16.mxu1 %v1820_v34  ;;  %vm762_vm10 = vcmp.lt.f32.partialorder %v761_v59, 0.5  ;;  %1743 = vset.pattern.permute.xlu0 %v1825_v4  ;;  %v1553_v31 = vld [vmem:[%s2154_s10] ss:$0 sm:$0xff] }
 0x23e   : > { %1612 = vmatpush3.bf16.msra.mxu0 %v1745_v35  ;;  %v760_v43 = vld [vmem:[#allocation3] sm:$0xf]  ;;  %v763_v61 = vsel %vm762_vm10, -1e+09, %v1820_v34 }
 0x23f   : > { %1625 = vmatprep.subr.bf16.mxu0 %v1820_v34  ;;  %v1559_v47 = vcombine.low %v760_v43, %v760_v43 }
 0x240   : > { %1620 = vmatpush3.bf16.msra.mxu1 %v1748_v49  ;;  %v1227_v49 = vld [vmem:[#allocation4 + $0x18] sm:$0xff] }
 0x241   : > { %1614 = vmatmul.mubr.msk.bf16.vlgmr.msra.gmra.mrb[0].mxu0 %vm651_vm8, %v627_v37  ;;  %1631 = vmatprep.subr.bf16.mxu1 %v1820_v34 }
 0x242   : > { %1627 = vmatprep.mubr.msk.bf16.mxu0 %vm1821_vm7, %v1820_v34 }
 0x243   : > { %1622 = vmatmul.mubr.msk.bf16.vlgmr.msra.gmra.mrb[0].mxu1 %vm651_vm8, %v627_v37 }
 0x244   : > { %1633 = vmatprep.mubr.msk.bf16.mxu1 %vm1821_vm7, %v1820_v34 }
 0x314   : > { %v689_v39 = vpop.f32.mrb[0].mxu0 }
 0x315   : > { %v690_v40 = vadd.f32 %v1549_v38, %v689_v39  ;;  %v1615_v41 = vpop.f32.mrb[1].mxu0 }
 0x316   : > { %v692_v42 = vpop.f32.mrb[2].mxu0  ;;  %v752_v30 = vpop.f32.mrb[0].mxu1 }
 0x317   : > { %v758_v44 = vpack.c.bf16 %v690_v40, %v690_v40  ;;  %v1616_v45 = vpop.f32.mrb[3].mxu0  ;;  %v1623_v32 = vpop.f32.mrb[1].mxu1  ;;  %v753_v36 = vadd.f32 %v1553_v31, %v752_v30  ;;  %v952_v40 = vld [vmem:[#allocation4 + $0x8] sm:$0xff]  ;;  %v837_v30 = vld [vmem:[#allocation6] sm:$0xff] }
 0x318   : > { %v755_v33 = vpop.f32.mrb[2].mxu1 }
 0x319   : > { %1039 = vrot.lane.b32.xlu1 %v758_v44, %s1822_s27  ;;  %901 = vrot.lane.b32.xlu0 %v758_v44, %s1823_s28  ;;  %v769_v46 = vsel %vm764_vm9, %v758_v44, 0  ;;  %v1624_v35 = vpop.f32.mrb[3].mxu1  ;;  %v759_v37 = vpack.c.bf16 %v753_v36, %v753_v36 }
 0x31a   : > { %1626 = vmatpush3.bf16.xpose.msra.mxu0 %v769_v46 }
 0x31b   : > { %1637 = vmatprep.subr.bf16.mxu0 %v1820_v34  ;;  %v850_v38 = vsel %vm848_vm12, %v759_v37, 0 }
 0x31c   : > { %1632 = vmatpush3.bf16.msra.mxu1 %v850_v38 }
 0x31d   : > { %898 = vrot.lane.b32.xlu0 %v1559_v47, %s1823_s28  ;;  %1037 = vrot.lane.b32.xlu1 %v1559_v47, %s1822_s27 }
 0x31e   : > { %1643 = vmatprep.subr.bf16.mxu1 %v1820_v34 }
 0x321   : > { %1176 = vrot.lane.b32.xlu0 %v758_v44, %s1824_s29  ;;  %1628 = vmatmul.mubr.msk.bf16.vlgmr.msra.gmra.mrb[4].mxu0 %vm764_vm9, %v760_v43  ;;  %v1090_v44 = vld [vmem:[#allocation4 + $0x10] sm:$0xff] }
 0x322   : > { %1174 = vrot.lane.b32.xlu1 %v1559_v47, %s1824_s29  ;;  %1639 = vmatprep.mubr.msk.bf16.mxu0 %vm1821_vm7, %v1820_v34 }
 0x38b   : > { %v902_v50 = vpop.permute.xlu0 %901  ;;  %v1040_v52 = vpop.permute.xlu1 %1039 }
 0x38c   : > { %v907_v51 = vsel %vm764_vm9, %v902_v50, 0  ;;  %v1045_v54 = vsel %vm764_vm9, %v1040_v52, 0 }
 0x38d   : > { %1638 = vmatpush3.bf16.xpose.msra.mxu0 %v907_v51 }
 0x38e   : > { %1649 = vmatprep.subr.bf16.mxu0 %v1820_v34 }
 0x38f   : > { %v899_v53 = vpop.permute.xlu0 %898  ;;  %v1038_v56 = vpop.permute.xlu1 %1037 }
 0x393   : > { %v1177_v55 = vpop.permute.xlu0 %1176 }
 0x394   : > { %1640 = vmatmul.mubr.msk.bf16.vlgmr.msra.gmra.mrb[8].mxu0 %vm764_vm9, %v899_v53  ;;  %v1182_v57 = vsel %vm764_vm9, %v1177_v55, 0  ;;  %v1175_v58 = vpop.permute.xlu1 %1174 }
 0x395   : > { %1650 = vmatpush3.bf16.xpose.msra.mxu0 %v1045_v54  ;;  %1651 = vmatprep.mubr.msk.bf16.mxu0 %vm1821_vm7, %v1820_v34 }
 0x396   : > { %1661 = vmatprep.subr.bf16.mxu0 %v1820_v34 }
 0x39c   : > { %1652 = vmatmul.mubr.msk.bf16.vlgmr.msra.gmra.mrb[12].mxu0 %vm764_vm9, %v1038_v56 }
 0x39d   : > { %1662 = vmatpush3.bf16.xpose.msra.mxu0 %v1182_v57  ;;  %1663 = vmatprep.mubr.msk.bf16.mxu0 %vm1821_vm7, %v1820_v34 }
 0x3a4   : > { %1664 = vmatmul.mubr.msk.bf16.vlgmr.msra.gmra.mrb[16].mxu0 %vm764_vm9, %v1175_v58 }
 0x3f4   : > { %v805_v60 = vpop.f32.mrb[4].mxu0 }
 0x3f5   : > { %v811_v62 = vmul.f32 0.35355338, %v805_v60  ;;  %v1629_v63 = vpop.f32.mrb[5].mxu0 }
 0x3f6   : > { %v808_v0 = vpop.f32.mrb[6].mxu0 }
 0x3f7   : > { %v2040_v1 = vadd.f32 %v811_v62, %v763_v61  ;;  %v1630_v2 = vpop.f32.mrb[7].mxu0 }
 0x3f9   : > { %v814_v3 = vsel %vm764_vm9, %v2040_v1, -inf }
 0x3fa   : > { %815 = vmax.xlane.f32.xlu0 %v814_v3 }
 0x467   : > { %v943_v5 = vpop.f32.mrb[8].mxu0 }
 0x468   : > { %v949_v6 = vmul.f32 0.35355338, %v943_v5  ;;  %v1641_v7 = vpop.f32.mrb[9].mxu0 }
 0x469   : > { %v946_v8 = vpop.f32.mrb[10].mxu0 }
 0x46a   : > { %v1642_v9 = vpop.f32.mrb[11].mxu0  ;;  %v2044_v10 = vadd.f32 %v949_v6, %v763_v61 }
 0x46c   : > { %v953_v11 = vsel %vm764_vm9, %v2044_v10, -inf }
 0x46d   : > { %954 = vmax.xlane.f32.xlu1 %v953_v11 }
 0x46f   : > { %v1081_v12 = vpop.f32.mrb[12].mxu0 }
 0x470   : > { %v1087_v13 = vmul.f32 0.35355338, %v1081_v12  ;;  %v1653_v14 = vpop.f32.mrb[13].mxu0 }
 0x471   : > { %v1084_v15 = vpop.f32.mrb[14].mxu0 }
 0x472   : > { %v1654_v16 = vpop.f32.mrb[15].mxu0  ;;  %v2048_v17 = vadd.f32 %v1087_v13, %v763_v61 }
 0x474   : > { %v1091_v18 = vsel %vm764_vm9, %v2048_v17, -inf }
 0x475   : > { %1092 = vmax.xlane.f32.xlu0 %v1091_v18 }
 0x477   : > { %v1218_v19 = vpop.f32.mrb[16].mxu0 }
 0x478   : > { %v1224_v20 = vmul.f32 0.35355338, %v1218_v19  ;;  %v1665_v21 = vpop.f32.mrb[17].mxu0 }
 0x479   : > { %v1221_v22 = vpop.f32.mrb[18].mxu0 }
 0x47a   : > { %v1666_v23 = vpop.f32.mrb[19].mxu0  ;;  %v2052_v24 = vadd.f32 %v1224_v20, %v763_v61 }
 0x47c   : > { %v1228_v25 = vsel %vm764_vm9, %v2052_v24, -inf }
 0x47d   : > { %1229 = vmax.xlane.f32.xlu0 %v1228_v25 }
 0x487   : > { %v816_v27 = vpop.xlane.xlu0 %815 }
 0x488   : > { %v817_v28 = vmax.f32 %v813_v26, %v816_v27 }
 0x48a   : > { %v818_v29 = vsub.f32 %v813_v26, %v817_v28  ;;  %894 = vst.msk [vmem:[#allocation4] sm:$0xff] %vm835_vm11, %v817_v28  ;;  %823 = vperm.xlu1 %1742, %v817_v28   ;;  %v829_v26 = vld [vmem:[#allocation5] sm:$0xff] }
 0x48c   : > { %v819_v39 = vmul.f32 1.442695, %v818_v29 }
 0x48e   : > { %1749 = vpow2.f32 %v819_v39  ;;  %v969_v39 = vld [vmem:[#allocation5 + $0x8] sm:$0xff] }
 0x498   : > { %v2063_v43 = vpop.eup %1749 }
 0x499   : > { %v830_v27 = vmul.f32 %v2063_v43, %v829_v26 }
 0x4fa   : > { %v955_v41 = vpop.xlane.xlu1 %954 }
 0x4fb   : > { %v956_v42 = vmax.f32 %v952_v40, %v955_v41 }
 0x4fd   : > { %1036 = vst.msk [vmem:[#allocation4 + $0x8] sm:$0xff] %vm835_vm11, %v956_v42  ;;  %962 = vperm.xlu0 %1743, %v956_v42   ;;  %v957_v51 = vsub.f32 %v952_v40, %v956_v42 }
 0x4ff   : > { %v958_v57 = vmul.f32 1.442695, %v957_v51  ;;  %v977_v51 = vld [vmem:[#allocation6 + $0x8] sm:$0xff] }
 0x501   : > { %840 = vperm.xlu0 %1743, %v2063_v43   ;;  %v1107_v43 = vld [vmem:[#allocation5 + $0x10] sm:$0xff] }
 0x502   : > { %v1093_v45 = vpop.xlane.xlu0 %1092 }
 0x503   : > { %v1094_v46 = vmax.f32 %v1090_v44, %v1093_v45 }
 0x505   : > { %v1095_v47 = vsub.f32 %v1090_v44, %v1094_v46  ;;  %1173 = vst.msk [vmem:[#allocation4 + $0x10] sm:$0xff] %vm835_vm11, %v1094_v46  ;;  %1100 = vperm.xlu1 %1742, %v1094_v46  }
 0x507   : > { %v1096_v48 = vmul.f32 1.442695, %v1095_v47  ;;  %v1244_v47 = vld [vmem:[#allocation5 + $0x18] sm:$0xff] }
 0x509   : > { %1751 = vpow2.f32 %v1096_v48  ;;  %v824_v50 = vpop.permute.xlu1 %823 }
 0x50a   : > { %v826_v52 = vsub.f32 %v2040_v1, %v824_v50  ;;  %v1230_v53 = vpop.xlane.xlu0 %1229 }
 0x50b   : > { %v1231_v54 = vmax.f32 %v1227_v49, %v1230_v53 }
 0x50c   : > { %v827_v55 = vmul.f32 1.442695, %v826_v52 }
 0x50d   : > { %v1232_v56 = vsub.f32 %v1227_v49, %v1231_v54  ;;  %1310 = vst.msk [vmem:[#allocation4 + $0x18] sm:$0xff] %vm835_vm11, %v1231_v54  ;;  %1237 = vperm.xlu1 %1742, %v1231_v54  }
 0x50e   : > { %1753 = vpow2.f32 %v827_v55 }
 0x50f   : > { %1755 = vpow2.f32 %v958_v57  ;;  %v1233_v20 = vmul.f32 1.442695, %v1232_v56 }
 0x511   : > { %986 = vrot.lane.b32.xlu1 %v759_v37, %s1823_s28  ;;  %s1831_s28 = smov (!%p1566_p8), 24  }
 0x513   : > { %v2070_v58 = vpop.eup %1751 }
 0x514   : > { %1118 = vperm.xlu0 %1743, %v2070_v58   ;;  %v1108_v44 = vmul.f32 %v2070_v58, %v1107_v43  ;;  %v1115_v58 = vld [vmem:[#allocation6 + $0x10] sm:$0xff] }
 0x515   : > { %1123 = vrot.lane.b32.xlu1 %v759_v37, %s1822_s27  ;;  %s1830_s27 = smov (!%p1566_p8), 16  }
 0x518   : > { %v1754_v59 = vpop.eup %1753 }
 0x519   : > { %1260 = vrot.lane.b32.xlu1 %v759_v37, %s1824_s29  ;;  %v844_v60 = vpack.c.bf16 %v1754_v59, %v1754_v59  ;;  %v2076_v61 = vpop.eup %1755  ;;  %v831_v62 = vsel %vm764_vm9, %v1754_v59, 0.0 }
 0x51a   : > { %v970_v40 = vmul.f32 %v2076_v61, %v969_v39 }
 0x51b   : > { %1634 = vmatmul.mubr.msk.bf16.vlgmr.msra.gmra.mrb[4].mxu1 %vm764_vm9, %v844_v60 }
 0x51c   : > { %1645 = vmatprep.mubr.msk.bf16.mxu1 %vm1821_vm7, %v1820_v34 }
 0x51d   : > { %980 = vperm.xlu1 %1742, %v2076_v61  }
 0x541   : > { %832 = vadd.xlane.f32.xlu1 %v831_v62 }
 0x57c   : > { %v963_v63 = vpop.permute.xlu0 %962 }
 0x57d   : > { %v965_v0 = vsub.f32 %v2044_v10, %v963_v63 }
 0x57f   : > { %v966_v1 = vmul.f32 1.442695, %v965_v0 }
 0x580   : > { %v841_v31 = vpop.permute.xlu0 %840 }
 0x581   : > { %1757 = vpow2.f32 %v966_v1  ;;  %v843_v32 = vmul.f32 %v841_v31, %v837_v30  ;;  %v1252_v1 = vld [vmem:[#allocation6 + $0x18] sm:$0xff] }
 0x584   : > { %v1101_v2 = vpop.permute.xlu1 %1100 }
 0x585   : > { %v1103_v3 = vsub.f32 %v2048_v17, %v1101_v2 }
 0x587   : > { %v1104_v4 = vmul.f32 1.442695, %v1103_v3 }
 0x589   : > { %1759 = vpow2.f32 %v1104_v4 }
 0x58b   : > { %v1758_v5 = vpop.eup %1757 }
 0x58c   : > { %v1238_v6 = vpop.permute.xlu1 %1237  ;;  %v971_v7 = vsel %vm764_vm9, %v1758_v5, 0.0  ;;  %v984_v13 = vpack.c.bf16 %v1758_v5, %v1758_v5 }
 0x58d   : > { %v1240_v8 = vsub.f32 %v2052_v24, %v1238_v6  ;;  %972 = vadd.xlane.f32.xlu0 %v971_v7 }
 0x58f   : > { %v1241_v9 = vmul.f32 1.442695, %v1240_v8 }
 0x590   : > { %v987_v11 = vpop.permute.xlu1 %986 }
 0x591   : > { %1761 = vpow2.f32 %v1241_v9  ;;  %v992_v12 = vsel %vm848_vm12, %v987_v11, 0 }
 0x592   : > { %1644 = vmatpush3.bf16.msra.mxu1 %v992_v12  ;;  %1763 = vpow2.f32 %v1233_v20  ;;  %v1768_v20 = vld [vmem:[%s2169_s23 + $0x8] sm:$0xff] (!%p1566_p8)  }
 0x593   : > { %v1760_v10 = vpop.eup %1759  ;;  %1655 = vmatprep.subr.bf16.mxu1 %v1820_v34  ;;  %v1119_v38 = vpop.permute.xlu0 %1118 }
 0x594   : > { %v1124_v14 = vpop.permute.xlu1 %1123  ;;  %v1109_v15 = vsel %vm764_vm9, %v1760_v10, 0.0  ;;  %v1122_v19 = vpack.c.bf16 %v1760_v10, %v1760_v10  ;;  %v1121_v59 = vmul.f32 %v1119_v38, %v1115_v58  ;;  %v1826_v10 = vmov (!%p1566_p8), 0  }
 0x595   : > { %v1129_v16 = vsel %vm848_vm12, %v1124_v14, 0  ;;  %1646 = vmatmul.mubr.msk.bf16.vlgmr.msra.gmra.mrb[8].mxu1 %vm764_vm9, %v984_v13  ;;  %1110 = vadd.xlane.f32.xlu0 %v1109_v15 }
 0x596   : > { %1656 = vmatpush3.bf16.msra.mxu1 %v1129_v16  ;;  %1657 = vmatprep.mubr.msk.bf16.mxu1 %vm1821_vm7, %v1820_v34 }
 0x597   : > { %1667 = vmatprep.subr.bf16.mxu1 %v1820_v34  ;;  %1766 = vset.pattern.permute.xlu1 (!%p1566_p8), %v1826_v10 }
 0x598   : > { %v1261_v17 = vpop.permute.xlu1 %1260 }
 0x599   : > { %v1266_v22 = vsel %vm848_vm12, %v1261_v17, 0 }
 0x59b   : > { %v1762_v18 = vpop.eup %1761 }
 0x59c   : > { %v1246_v21 = vsel %vm764_vm9, %v1762_v18, 0.0  ;;  %v1259_v23 = vpack.c.bf16 %v1762_v18, %v1762_v18  ;;  %v1764_v24 = vpop.eup %1763  ;;  %v981_v25 = vpop.permute.xlu1 %980  ;;  %v1767_v18 = vld [vmem:[%s2169_s23] sm:$0xff] (!%p1566_p8)  }
 0x59d   : > { %1247 = vadd.xlane.f32.xlu1 %v1246_v21  ;;  %1658 = vmatmul.mubr.msk.bf16.vlgmr.msra.gmra.mrb[12].mxu1 %vm764_vm9, %v1122_v19  ;;  %v1245_v48 = vmul.f32 %v1764_v24, %v1244_v47  ;;  %v983_v52 = vmul.f32 %v981_v25, %v977_v51  ;;  %v1827_v19 = vmov (!%p1566_p8), 0.0  }
 0x59e   : > { %1668 = vmatpush3.bf16.msra.mxu1 %v1266_v22  ;;  %1669 = vmatprep.mubr.msk.bf16.mxu1 %vm1821_vm7, %v1820_v34 }
 0x59f   : > { %1673 = vmatprep.subr.bf16.mxu0 (!%p1566_p8), %v1827_v19  ;;  %1677 = vmatprep.mubr.msk.bf16.mxu0 (!%p1566_p8), %vm1828_vm13, %v1827_v19 }
 0x5a0   : > { %1674 = vmatpush3.bf16.msra.mxu0 (!%p1566_p8), %v1767_v18 }
 0x5a1   : > { %1675 = vmatprep.subr.bf16.mxu0 (!%p1566_p8), %v1827_v19 }
 0x5a4   : > { %1676 = vmatpush3.bf16.msra.mxu0 (!%p1566_p8), %v1768_v20 }
 0x5a5   : > { %1670 = vmatmul.mubr.msk.bf16.vlgmr.msra.gmra.mrb[16].mxu1 %vm764_vm9, %v1259_v23 }
 0x5ab   : > { %1255 = vperm.xlu0 %1743, %v1764_v24  }
 0x5af   : > { %1765 = vset.pattern.permute.xlu0 (!%p1566_p8), %v1826_v10 }
 0x5ce   : > { %v833_v28 = vpop.xlane.xlu1 %832 }
 0x5cf   : > { %v834_v29 = vadd.f32 %v833_v28, %v830_v27 }
 0x5d1   : > { %836 = vst.msk [vmem:[#allocation5] sm:$0xff] %vm835_vm11, %v834_v29 }
 0x5d8   : > { %v1315_v13 = vld [vmem:[#allocation5] sm:$0xff] (!%p1566_p8) }
 0x5ee   : > { %v886_v33 = vpop.f32.mrb[4].mxu1 }
 0x5ef   : > { %v892_v35 = vadd.f32 %v886_v33, %v843_v32  ;;  %v1635_v34 = vpop.f32.mrb[5].mxu1 }
 0x5f0   : > { %v889_v36 = vpop.f32.mrb[6].mxu1 }
 0x5f1   : > { %893 = vst.msk [vmem:[#allocation6] sm:$0xff] %vm764_vm9, %v892_v35  ;;  %v1636_v37 = vpop.f32.mrb[7].mxu1 }
 0x5f8   : > { %v1317_v30 = vld [vmem:[#allocation6] sm:$0xff] (!%p1566_p8) }
 0x61a   : > { %v973_v41 = vpop.xlane.xlu0 %972 }
 0x61b   : > { %v974_v42 = vadd.f32 %v973_v41, %v970_v40  ;;  %v1567_v40 = vld [vmem:[%s2170_s15] ss:$0 sm:$0xff] (!%p1566_p8) }
 0x61d   : > { %975 = vst.msk [vmem:[#allocation5 + $0x8] sm:$0xff] %vm835_vm11, %v974_v42  ;;  %v1435_v42 = vld [vmem:[#allocation2] sm:$0xff] (!%p1566_p8) }
 0x622   : > { %v1111_v45 = vpop.xlane.xlu0 %1110 }
 0x623   : > { %v1112_v46 = vadd.f32 %v1111_v45, %v1108_v44 }
 0x624   : > { %v1324_v9 = vld [vmem:[#allocation5 + $0x8] sm:$0xff] (!%p1566_p8) }
 0x625   : > { %1113 = vst.msk [vmem:[#allocation5 + $0x10] sm:$0xff] %vm835_vm11, %v1112_v46  ;;  %1769 = vrcp.f32 (!%p1566_p8), %v1324_v9 }
 0x62a   : > { %v1248_v49 = vpop.xlane.xlu1 %1247  ;;  %v1256_v2 = vpop.permute.xlu0 %1255 }
 0x62b   : > { %v1249_v50 = vadd.f32 %v1248_v49, %v1245_v48  ;;  %v1258_v3 = vmul.f32 %v1256_v2, %v1252_v1 }
 0x62c   : > { %v1333_v12 = vld [vmem:[#allocation5 + $0x10] sm:$0xff] (!%p1566_p8) }
 0x62d   : > { %1250 = vst.msk [vmem:[#allocation5 + $0x18] sm:$0xff] %vm835_vm11, %v1249_v50 }
 0x62f   : > { %v1770_v14 = vpop.eup (!%p1566_p8), %1769 }
 0x630   : > { %1329 = vperm.xlu0 (!%p1566_p8), %1765, %v1770_v14  }
 0x634   : > { %v1342_v11 = vld [vmem:[#allocation5 + $0x18] sm:$0xff] (!%p1566_p8) }
 0x635   : > { %1771 = vrcp.f32 (!%p1566_p8), %v1342_v11 }
 0x636   : > { %1773 = vrcp.f32 (!%p1566_p8), %v1333_v12 }
 0x637   : > { %1775 = vrcp.f32 (!%p1566_p8), %v1315_v13 }
 0x63f   : > { %v1772_v15 = vpop.eup (!%p1566_p8), %1771 }
 0x640   : > { %v1774_v16 = vpop.eup (!%p1566_p8), %1773  ;;  %1347 = vperm.xlu1 (!%p1566_p8), %1766, %v1772_v15  }
 0x641   : > { %v1776_v17 = vpop.eup (!%p1566_p8), %1775  ;;  %1338 = vperm.xlu0 (!%p1566_p8), %1765, %v1774_v16  }
 0x644   : > { %1320 = vperm.xlu1 (!%p1566_p8), %1766, %v1776_v17  }
 0x668   : > { %v1028_v53 = vpop.f32.mrb[8].mxu1 }
 0x669   : > { %v1034_v54 = vadd.f32 %v1028_v53, %v983_v52  ;;  %v1647_v55 = vpop.f32.mrb[9].mxu1 }
 0x66a   : > { %v1031_v56 = vpop.f32.mrb[10].mxu1 }
 0x66b   : > { %1035 = vst.msk [vmem:[#allocation6 + $0x8] sm:$0xff] %vm764_vm9, %v1034_v54  ;;  %v1648_v57 = vpop.f32.mrb[11].mxu1 }
 0x670   : > { %v1165_v60 = vpop.f32.mrb[12].mxu1 }
 0x671   : > { %v1171_v61 = vadd.f32 %v1165_v60, %v1121_v59  ;;  %v1659_v62 = vpop.f32.mrb[13].mxu1 }
 0x672   : > { %v1168_v63 = vpop.f32.mrb[14].mxu1  ;;  %v1326_v21 = vld [vmem:[#allocation6 + $0x8] sm:$0xff] (!%p1566_p8) }
 0x673   : > { %1172 = vst.msk [vmem:[#allocation6 + $0x10] sm:$0xff] %vm764_vm9, %v1171_v61  ;;  %v1660_v0 = vpop.f32.mrb[15].mxu1 }
 0x675   : > { %1314 = sbr.rel (%p1566_p8) target bundleno = 2067 (0x813), region = 80 }
 0x678   : > { %v1302_v4 = vpop.f32.mrb[16].mxu1 }
 0x679   : > { %v1308_v5 = vadd.f32 %v1302_v4, %v1258_v3  ;;  %v1671_v6 = vpop.f32.mrb[17].mxu1 }
 0x67a   : > { %v1305_v7 = vpop.f32.mrb[18].mxu1  ;;  %v1335_v26 = vld [vmem:[#allocation6 + $0x10] sm:$0xff] (!%p1566_p8) }
 0x67b   : > { %1309 = vst.msk [vmem:[#allocation6 + $0x18] sm:$0xff] %vm764_vm9, %v1308_v5  ;;  %v1672_v8 = vpop.f32.mrb[19].mxu1 }
 0x682   : > { %v1344_v23 = vld [vmem:[#allocation6 + $0x18] sm:$0xff] }
 0x6af   : > { %v1330_v22 = vpop.permute.xlu0 %1329 }
 0x6b0   : > { %v1332_v24 = vmul.f32 %v1330_v22, %v1326_v21 }
 0x6b2   : > { %1352 = vrot.lane.b32.xlu0 %v1332_v24, %s1829_s12 }
 0x6bf   : > { %v1348_v25 = vpop.permute.xlu1 %1347 }
 0x6c0   : > { %v1350_v27 = vmul.f32 %v1348_v25, %v1344_v23  ;;  %v1339_v28 = vpop.permute.xlu0 %1338 }
 0x6c1   : > { %v1341_v29 = vmul.f32 %v1339_v28, %v1335_v26 }
 0x6c2   : > { %1360 = vrot.lane.b32.xlu0 %v1350_v27, %s1831_s28 }
 0x6c3   : > { %1356 = vrot.lane.b32.xlu1 %v1341_v29, %s1830_s27  ;;  %v1321_v31 = vpop.permute.xlu1 %1320 }
 0x6c4   : > { %v1323_v33 = vmul.f32 %v1321_v31, %v1317_v30 }
 0x724   : > { %v1353_v32 = vpop.permute.xlu0 %1352 }
 0x725   : > { %v1363_v35 = vsel %vm764_vm9, %v1323_v33, %v1353_v32 }
 0x734   : > { %v1361_v36 = vpop.permute.xlu0 %1360 }
 0x735   : > { %v1357_v34 = vpop.permute.xlu1 %1356 }
 0x736   : > { %v1365_v37 = vsel %vm1364_vm14, %v1363_v35, %v1357_v34 }
 0x737   : > { %v1367_v38 = vsel %vm1366_vm15, %v1365_v37, %v1361_v36 }
 0x738   : > { %v1368_v39 = vpack.c.bf16 %v1367_v38, %v1367_v38 }
 0x73a   : > { %1678 = vmatmul.mubr.msk.bf16.vlgmr.msra.gmra.mrb[0].mxu0 %vm651_vm8, %v1368_v39 }
 0x80d   : > { %v1429_v41 = vpop.f32.mrb[0].mxu0 }
 0x80e   : > { %v1430_v43 = vadd.f32 %v1567_v40, %v1429_v41  ;;  %v1679_v44 = vpop.f32.mrb[1].mxu0 }
 0x80f   : > { %v1432_v45 = vpop.f32.mrb[2].mxu0 }
 0x810   : > { %v1436_v46 = vadd.f32 %v1435_v42, %v1430_v43  ;;  %v1680_v47 = vpop.f32.mrb[3].mxu0 }
 0x812   : > { %1437 = vst.msk [vmem:[%s495_s11] sm:$0xff] %vm651_vm8, %v1436_v46 }
 0x813 PF: > { %s2171_s19 = sld [smem:[#allocation9_spill]]  ;;  %s2172_s25 = sld [smem:[#allocation7_spill]] }
 0x814   : > { %s2173_s26 = sld [smem:[#allocation8_spill]]  ;;  %s2174_s27 = sld [smem:[#allocation10_spill]] }
 0x815   : > { %s2175_s28 = sld [smem:[#allocation11_spill]] }
 0x819   : > { %s23_s29 = sadd.s32 1, %s2171_s19  }
 0x81a   : > { %p20_p9 = scmp.ge.s32.totalorder %s23_s29, 6  }
 0x81c   :  { %22 = sbr.rel (!%p20_p9) target bundleno = 4 (0x4), region = 125 }

</bundles_post_ra>
